<compile_context>
chip_gen: v7x
topology: tpu7x:2x2x1
jax: 0.10.0
libtpu: 0.0.40
codegen_flags: <defaults>
</compile_context>

<pallas_src>
import math
import functools

import jax
import jax.numpy as jnp
from jax.experimental import pallas as pl
from jax.experimental.pallas import tpu as pltpu

LN_EPS = 1e-5


# ----------------------------------------------------------------------------
# Fused decoder-layer kernel (one batch-block per grid step)
# ----------------------------------------------------------------------------
def _layernorm(x, gamma, beta):
    mean = jnp.mean(x, axis=-1, keepdims=True)
    cent = x - mean
    var = jnp.mean(cent * cent, axis=-1, keepdims=True)
    return cent * jax.lax.rsqrt(var + LN_EPS) * gamma + beta


def decoder_layer_kernel(
        tgt_ref, mem_ref,
        # self-attention sublayer
        wq_s_ref, bq_s_ref, wo_s_ref, bo_s_ref, g_s_ref, be_s_ref,
        # cross-attention sublayer
        wq_c_ref, bq_c_ref, wo_c_ref, bo_c_ref, g_c_ref, be_c_ref,
        # fused K/V projection weights for BOTH attention sublayers
        wkv_ref, bkv_ref,
        # feed-forward sublayer
        w1_ref, b1_ref, w2_ref, b2_ref, g_f_ref, be_f_ref,
        out_ref,
        # VMEM scratch
        qh_ref, kh_ref, vh_ref, ctx_ref,
        *, num_heads, dim_k):
    BB, S, D = tgt_ref.shape          # batch-block, seq, model dim
    M = BB * S
    H = num_heads
    bf16 = jnp.bfloat16

    # Leading-dim merge only (S, D untouched) -> no relayout.
    tgt = tgt_ref[...].reshape(M, D)   # f32
    mem = mem_ref[...].reshape(M, D)   # f32

    def proj(x_f32, w_ref, b_ref):
        """bf16 MXU matmul, f32 accumulate, f32 bias add."""
        return jnp.dot(x_f32.astype(bf16), w_ref[...],
                       preferred_element_type=jnp.float32) + b_ref[...]

    # One matmul produces K/V for BOTH attention sublayers (all from `memory`).
    kv = proj(mem, wkv_ref, bkv_ref)                      # (M, 4D) f32

    def load_heads(dst_ref, x):
        """(M, H*dk) -> (BB*H, S, dk) head-major relayout (single pass)."""
        x3 = x.reshape(BB, S, H * dim_k)                  # leading split only
        for b in range(BB):                               # tiny static loop
            for h in range(H):
                dst_ref[b * H + h] = x3[b, :, h * dim_k:(h + 1) * dim_k]

    scale = 1.0 / math.sqrt(dim_k)

    def mha(wo_ref, bo_ref):
        """Head-batched attention over the scratch Q/K/V + ONE output proj."""
        q_h = qh_ref[...].astype(bf16)                    # (BB*H, S, dk)
        k_h = kh_ref[...].astype(bf16)
        v_h = vh_ref[...].astype(bf16)
        logits = jnp.einsum('gqd,gkd->gqk', q_h, k_h,
                            preferred_element_type=jnp.float32) * scale
        m = jnp.max(logits, axis=-1, keepdims=True)
        # exp kept in f32 (v5e-safe); on v6e/v7x a bf16 exp would also work.
        e = jnp.exp(logits - m)
        denom = jnp.sum(e, axis=-1, keepdims=True)
        ctx = jnp.einsum('gqk,gkd->gqd', e.astype(bf16), v_h,
                         preferred_element_type=jnp.float32)
        # Exact reciprocal applied AFTER PV: only S*dk elements per head.
        ctx = ctx / denom                                  # (BB*H, S, dk) f32
        # Write heads into a contiguous (M, D) scratch -> one full-width matmul.
        for b in range(BB):
            for h in range(H):
                ctx_ref[b * S:(b + 1) * S,
                        h * dim_k:(h + 1) * dim_k] = ctx[b * H + h]
        return proj(ctx_ref[...], wo_ref, bo_ref)          # (M, D) f32
    # TODO(synk): for large S, switch to a KV-tiled online-softmax (flash)
    # accumulator so the (S, S) logits are never resident in VMEM.

    # --- sublayer 1: LN(memory + MHA(target, memory, memory)) ---------------
    load_heads(qh_ref, proj(tgt, wq_s_ref, bq_s_ref))
    load_heads(kh_ref, kv[:, 0 * D:1 * D])
    load_heads(vh_ref, kv[:, 1 * D:2 * D])
    t1 = _layernorm(mem + mha(wo_s_ref, bo_s_ref), g_s_ref[...], be_s_ref[...])

    # --- sublayer 2: LN(memory + MHA(t1, memory, memory)) -------------------
    load_heads(qh_ref, proj(t1, wq_c_ref, bq_c_ref))
    load_heads(kh_ref, kv[:, 2 * D:3 * D])
    load_heads(vh_ref, kv[:, 3 * D:4 * D])
    t2 = _layernorm(mem + mha(wo_c_ref, bo_c_ref), g_c_ref[...], be_c_ref[...])

    # --- sublayer 3: LN(t2 + Linear(ReLU(Linear(t2)))) ----------------------
    hid = jnp.maximum(proj(t2, w1_ref, b1_ref), 0.0)
    y = proj(hid, w2_ref, b2_ref)
    out_ref[...] = _layernorm(t2 + y, g_f_ref[...],
                              be_f_ref[...]).reshape(BB, S, D)


# ----------------------------------------------------------------------------
# Wrapper
# ----------------------------------------------------------------------------
def decoder_layer(target, memory, params, *, num_heads, dim_k,
                  num_batch_blocks=1):
    """num_batch_blocks=1 folds the whole batch into one grid step (best on
    v5e/v6e single-TensorCore); pass 2 on v7x so both TensorCores get work."""
    B, S, D = target.shape
    assert B % num_batch_blocks == 0
    BB = B // num_batch_blocks
    ps, pc, pf = params["self_attn"], params["cross_attn"], params["ff"]
    dim_ff = pf["w1"].shape[1]
    bf16 = jnp.bfloat16

    # Fuse the four K/V projection weights (both attention sublayers read
    # `memory`) into one (D, 4D) weight -> one MXU push for all K/V.
    wkv = jnp.concatenate([ps["wk"], ps["wv"], pc["wk"], pc["wv"]],
                          axis=1).astype(bf16)
    bkv = jnp.concatenate([ps["bk"], ps["bv"], pc["bk"], pc["bv"]], axis=1)

    # Matmul weights in bf16 (MXU-native, half the DMA/VMEM); biases & LN in f32.
    weights = (
        ps["wq"].astype(bf16), ps["bq"], ps["wo"].astype(bf16), ps["bo"],
        ps["gamma"], ps["beta"],
        pc["wq"].astype(bf16), pc["bq"], pc["wo"].astype(bf16), pc["bo"],
        pc["gamma"], pc["beta"],
        wkv, bkv,
        pf["w1"].astype(bf16), pf["b1"], pf["w2"].astype(bf16), pf["b2"],
        pf["gamma"], pf["beta"],
    )

    act_spec = pl.BlockSpec((BB, S, D), lambda i: (i, 0, 0))

    def const_spec(w):
        nd = w.ndim
        return pl.BlockSpec(w.shape, lambda i, _nd=nd: (0,) * _nd)
    # TODO(synk): at production sizes (D~1024, ff~4096) single-buffer these
    # constant weight specs and tile w1/w2 over dim_ff so the weight set fits
    # v7x's 64 MiB physical VMEM; also pad/pack activations lane-dense if the
    # real model dim stays < 128.

    kernel = functools.partial(decoder_layer_kernel, num_heads=num_heads,
                               dim_k=dim_k)

    # Advisory cost estimate (helps XLA schedule/overlap the custom call).
    flops = (2 * B * S * D * (4 * D + 2 * D + 2 * D + 2 * dim_ff)
             + 8 * B * num_heads * S * S * dim_k)
    transcendentals = 2 * B * num_heads * S * S + 3 * B * S
    nbytes = (sum(int(w.size) * w.dtype.itemsize for w in weights)
              + 3 * B * S * D * 4)
    cost = pl.CostEstimate(flops=flops, transcendentals=transcendentals,
                           bytes_accessed=nbytes)

    return pl.pallas_call(
        kernel,
        out_shape=jax.ShapeDtypeStruct((B, S, D), jnp.float32),
        grid_spec=pltpu.PrefetchScalarGridSpec(
            num_scalar_prefetch=0,
            grid=(num_batch_blocks,),
            in_specs=[act_spec, act_spec] + [const_spec(w) for w in weights],
            out_specs=act_spec,
            scratch_shapes=[
                pltpu.VMEM((BB * num_heads, S, dim_k), jnp.float32),  # Q heads
                pltpu.VMEM((BB * num_heads, S, dim_k), jnp.float32),  # K heads
                pltpu.VMEM((BB * num_heads, S, dim_k), jnp.float32),  # V heads
                pltpu.VMEM((BB * S, D), jnp.float32),                 # ctx concat
            ],
        ),
        compiler_params=pltpu.CompilerParams(
            dimension_semantics=("parallel",),
            # Plenty at these shapes; raise toward ~100 MiB on v5e/v6e for
            # larger S/D/dim_ff, cap near ~48 MiB on v7x (64 MiB physical).
            vmem_limit_bytes=32 * 1024 * 1024,
        ),
        cost_estimate=cost,
    )(target, memory, *weights)


# ----------------------------------------------------------------------------
# Pure-JAX f32 reference (mirrors the PyTorch module) for the correctness check
# ----------------------------------------------------------------------------
def _ref_ln(x, g, b):
    mean = jnp.mean(x, axis=-1, keepdims=True)
    var = jnp.mean((x - mean) ** 2, axis=-1, keepdims=True)
    return (x - mean) / jnp.sqrt(var + LN_EPS) * g[0] + b[0]


def _ref_mha(xq, xkv, p, num_heads, dim_k):
    q = xq @ p["wq"] + p["bq"][0]
    k = xkv @ p["wk"] + p["bk"][0]
    v = xkv @ p["wv"] + p["bv"][0]
    outs = []
    for h in range(num_heads):
        lo, hi = h * dim_k, (h + 1) * dim_k
        qh, kh, vh = q[..., lo:hi], k[..., lo:hi], v[..., lo:hi]
        logits = jnp.einsum("bqd,bkd->bqk", qh, kh) / math.sqrt(dim_k)
        p_att = jax.nn.softmax(logits, axis=-1)
        outs.append(jnp.einsum("bqk,bkd->bqd", p_att, vh))
    concat = jnp.concatenate(outs, axis=-1)
    attn = concat @ p["wo"] + p["bo"][0]
    return _ref_ln(xkv + attn, p["gamma"], p["beta"])


def _ref_ff(x, p):
    h = jnp.maximum(x @ p["w1"] + p["b1"][0], 0.0)
    y = h @ p["w2"] + p["b2"][0]
    return _ref_ln(x + y, p["gamma"], p["beta"])


def ref_decoder_layer(target, memory, params, num_heads, dim_k):
    t = _ref_mha(target, memory, params["self_attn"], num_heads, dim_k)
    t = _ref_mha(t, memory, params["cross_attn"], num_heads, dim_k)
    return _ref_ff(t, params["ff"])


# ----------------------------------------------------------------------------
# Parameter init (deterministic, synthetic)
# ----------------------------------------------------------------------------
def init_params(key, dim_model, num_heads, dim_ff):
    dim_k = dim_model // num_heads

    def linear(key, din, dout):
        kw, kb = jax.random.split(key)
        s = 1.0 / math.sqrt(din)
        w = jax.random.uniform(kw, (din, dout), jnp.float32, -s, s)
        b = jax.random.uniform(kb, (1, dout), jnp.float32, -s, s)
        return w, b

    def mha_params(key):
        ks = jax.random.split(key, 4)
        wq, bq = linear(ks[0], dim_model, num_heads * dim_k)
        wk, bk = linear(ks[1], dim_model, num_heads * dim_k)
        wv, bv = linear(ks[2], dim_model, num_heads * dim_k)
        wo, bo = linear(ks[3], num_heads * dim_k, dim_model)
        return dict(wq=wq, bq=bq, wk=wk, bk=bk, wv=wv, bv=bv, wo=wo, bo=bo,
                    gamma=jnp.ones((1, dim_model), jnp.float32),
                    beta=jnp.zeros((1, dim_model), jnp.float32))

    k1, k2, k3, k4 = jax.random.split(key, 4)
    w1, b1 = linear(k3, dim_model, dim_ff)
    w2, b2 = linear(k4, dim_ff, dim_model)
    ff = dict(w1=w1, b1=b1, w2=w2, b2=b2,
              gamma=jnp.ones((1, dim_model), jnp.float32),
              beta=jnp.zeros((1, dim_model), jnp.float32))
    return dict(self_attn=mha_params(k1), cross_attn=mha_params(k2), ff=ff)


# ----------------------------------------------------------------------------
if __name__ == "__main__":
    B, S = 2, 8
    dim_model, num_heads, dim_ff = 32, 4, 64
    dim_k = dim_model // num_heads

    key = jax.random.PRNGKey(0)
    k_t, k_m, k_p = jax.random.split(key, 3)
    target = jax.random.normal(k_t, (B, S, dim_model), jnp.float32)
    memory = jax.random.normal(k_m, (B, S, dim_model), jnp.float32)
    params = init_params(k_p, dim_model, num_heads, dim_ff)

    out = decoder_layer(target, memory, params,
                        num_heads=num_heads, dim_k=dim_k)
    out = jax.block_until_ready(out)

    ref = ref_decoder_layer(target, memory, params, num_heads, dim_k)
    assert out.shape == (B, S, dim_model)
    # Kernel matmul operands are bf16 (MXU-native) while the reference is pure
    # f32, so allow bf16-level error; structural bugs would be O(1) errors.
    assert jnp.allclose(out, ref, atol=5e-2, rtol=5e-2), \
        f"max abs diff {jnp.max(jnp.abs(out - ref))}"

    print("KERNEL_OK")
</pallas_src>

<mosaic_0001>
module attributes {stable_mosaic.version = 11 : i64} {
  func.func @decoder_layer_kernel(%arg0: i32, %arg1: memref<2x8x32xf32, #tpu.memory_space<vmem>>, %arg2: memref<2x8x32xf32, #tpu.memory_space<vmem>>, %arg3: memref<32x32xbf16, #tpu.memory_space<vmem>>, %arg4: memref<1x32xf32, #tpu.memory_space<vmem>>, %arg5: memref<32x32xbf16, #tpu.memory_space<vmem>>, %arg6: memref<1x32xf32, #tpu.memory_space<vmem>>, %arg7: memref<1x32xf32, #tpu.memory_space<vmem>>, %arg8: memref<1x32xf32, #tpu.memory_space<vmem>>, %arg9: memref<32x32xbf16, #tpu.memory_space<vmem>>, %arg10: memref<1x32xf32, #tpu.memory_space<vmem>>, %arg11: memref<32x32xbf16, #tpu.memory_space<vmem>>, %arg12: memref<1x32xf32, #tpu.memory_space<vmem>>, %arg13: memref<1x32xf32, #tpu.memory_space<vmem>>, %arg14: memref<1x32xf32, #tpu.memory_space<vmem>>, %arg15: memref<32x128xbf16, #tpu.memory_space<vmem>>, %arg16: memref<1x128xf32, #tpu.memory_space<vmem>>, %arg17: memref<32x64xbf16, #tpu.memory_space<vmem>>, %arg18: memref<1x64xf32, #tpu.memory_space<vmem>>, %arg19: memref<64x32xbf16, #tpu.memory_space<vmem>>, %arg20: memref<1x32xf32, #tpu.memory_space<vmem>>, %arg21: memref<1x32xf32, #tpu.memory_space<vmem>>, %arg22: memref<1x32xf32, #tpu.memory_space<vmem>>, %arg23: memref<2x8x32xf32, #tpu.memory_space<vmem>>, %arg24: memref<8x8x8xf32, #tpu.memory_space<vmem>>, %arg25: memref<8x8x8xf32, #tpu.memory_space<vmem>>, %arg26: memref<8x8x8xf32, #tpu.memory_space<vmem>>, %arg27: memref<16x32xf32, #tpu.memory_space<vmem>>) attributes {dimension_semantics = [#tpu.dimension_semantics<parallel>], iteration_bounds = array<i64: 1>, scalar_prefetch = 0 : i64, scratch_operands = 4 : i64, tpu.core_type = #tpu.core_type<tc>, window_params = [{transform_indices = @transform_0, window_bounds = array<i64: 2, 8, 32>}, {transform_indices = @transform_1, window_bounds = array<i64: 2, 8, 32>}, {pipeline_mode = #tpu.pipeline_mode<synchronous>, transform_indices = @transform_2, window_bounds = array<i64: 32, 32>}, {pipeline_mode = #tpu.pipeline_mode<synchronous>, transform_indices = @transform_3, window_bounds = array<i64: 1, 32>}, {pipeline_mode = #tpu.pipeline_mode<synchronous>, transform_indices = @transform_4, window_bounds = array<i64: 32, 32>}, {pipeline_mode = #tpu.pipeline_mode<synchronous>, transform_indices = @transform_5, window_bounds = array<i64: 1, 32>}, {pipeline_mode = #tpu.pipeline_mode<synchronous>, transform_indices = @transform_6, window_bounds = array<i64: 1, 32>}, {pipeline_mode = #tpu.pipeline_mode<synchronous>, transform_indices = @transform_7, window_bounds = array<i64: 1, 32>}, {pipeline_mode = #tpu.pipeline_mode<synchronous>, transform_indices = @transform_8, window_bounds = array<i64: 32, 32>}, {pipeline_mode = #tpu.pipeline_mode<synchronous>, transform_indices = @transform_9, window_bounds = array<i64: 1, 32>}, {pipeline_mode = #tpu.pipeline_mode<synchronous>, transform_indices = @transform_10, window_bounds = array<i64: 32, 32>}, {pipeline_mode = #tpu.pipeline_mode<synchronous>, transform_indices = @transform_11, window_bounds = array<i64: 1, 32>}, {pipeline_mode = #tpu.pipeline_mode<synchronous>, transform_indices = @transform_12, window_bounds = array<i64: 1, 32>}, {pipeline_mode = #tpu.pipeline_mode<synchronous>, transform_indices = @transform_13, window_bounds = array<i64: 1, 32>}, {pipeline_mode = #tpu.pipeline_mode<synchronous>, transform_indices = @transform_14, window_bounds = array<i64: 32, 128>}, {pipeline_mode = #tpu.pipeline_mode<synchronous>, transform_indices = @transform_15, window_bounds = array<i64: 1, 128>}, {pipeline_mode = #tpu.pipeline_mode<synchronous>, transform_indices = @transform_16, window_bounds = array<i64: 32, 64>}, {pipeline_mode = #tpu.pipeline_mode<synchronous>, transform_indices = @transform_17, window_bounds = array<i64: 1, 64>}, {pipeline_mode = #tpu.pipeline_mode<synchronous>, transform_indices = @transform_18, window_bounds = array<i64: 64, 32>}, {pipeline_mode = #tpu.pipeline_mode<synchronous>, transform_indices = @transform_19, window_bounds = array<i64: 1, 32>}, {pipeline_mode = #tpu.pipeline_mode<synchronous>, transform_indices = @transform_20, window_bounds = array<i64: 1, 32>}, {pipeline_mode = #tpu.pipeline_mode<synchronous>, transform_indices = @transform_21, window_bounds = array<i64: 1, 32>}, {transform_indices = @transform_22, window_bounds = array<i64: 2, 8, 32>}]} {
    %c0 = arith.constant 0 : index
    %c0_0 = arith.constant 0 : index
    %c0_1 = arith.constant 0 : index
    %0 = vector.load %arg1[%c0, %c0_0, %c0_1] : memref<2x8x32xf32, #tpu.memory_space<vmem>>, vector<2x8x32xf32>
    %1 = vector.shape_cast %0 : vector<2x8x32xf32> to vector<16x32xf32>
    %c0_2 = arith.constant 0 : index
    %c0_3 = arith.constant 0 : index
    %c0_4 = arith.constant 0 : index
    %2 = vector.load %arg2[%c0_2, %c0_3, %c0_4] : memref<2x8x32xf32, #tpu.memory_space<vmem>>, vector<2x8x32xf32>
    %3 = vector.shape_cast %2 : vector<2x8x32xf32> to vector<16x32xf32>
    %4 = arith.truncf %3 : vector<16x32xf32> to vector<16x32xbf16>
    %c0_5 = arith.constant 0 : index
    %c0_6 = arith.constant 0 : index
    %5 = vector.load %arg15[%c0_5, %c0_6] : memref<32x128xbf16, #tpu.memory_space<vmem>>, vector<32x128xbf16>
    %cst = arith.constant dense<0.000000e+00> : vector<16x128xf32>
    %6 = tpu.matmul %4, %5, %cst {dimension_numbers = #tpu.dot_dimension_numbers<[1], [0], [0], [1], [0, 0, 1, 1], [], []>} : vector<16x32xbf16>, vector<32x128xbf16>, vector<16x128xf32> -> vector<16x128xf32>
    %c0_7 = arith.constant 0 : index
    %c0_8 = arith.constant 0 : index
    %7 = vector.load %arg16[%c0_7, %c0_8] : memref<1x128xf32, #tpu.memory_space<vmem>>, vector<1x128xf32>
    %8 = vector.broadcast %7 : vector<1x128xf32> to vector<16x128xf32>
    %9 = arith.addf %6, %8 : vector<16x128xf32>
    %10 = arith.truncf %1 : vector<16x32xf32> to vector<16x32xbf16>
    %c0_9 = arith.constant 0 : index
    %c0_10 = arith.constant 0 : index
    %11 = vector.load %arg3[%c0_9, %c0_10] : memref<32x32xbf16, #tpu.memory_space<vmem>>, vector<32x32xbf16>
    %cst_11 = arith.constant dense<0.000000e+00> : vector<16x32xf32>
    %12 = tpu.matmul %10, %11, %cst_11 {dimension_numbers = #tpu.dot_dimension_numbers<[1], [0], [0], [1], [0, 0, 1, 1], [], []>} : vector<16x32xbf16>, vector<32x32xbf16>, vector<16x32xf32> -> vector<16x32xf32>
    %c0_12 = arith.constant 0 : index
    %c0_13 = arith.constant 0 : index
    %13 = vector.load %arg4[%c0_12, %c0_13] : memref<1x32xf32, #tpu.memory_space<vmem>>, vector<1x32xf32>
    %14 = vector.broadcast %13 : vector<1x32xf32> to vector<16x32xf32>
    %15 = arith.addf %12, %14 : vector<16x32xf32>
    %16 = vector.shape_cast %15 : vector<16x32xf32> to vector<2x8x32xf32>
    %17 = vector.extract_strided_slice %16 {offsets = [0, 0, 0], sizes = [1, 8, 8], strides = [1, 1, 1]} : vector<2x8x32xf32> to vector<1x8x8xf32>
    %18 = vector.shape_cast %17 : vector<1x8x8xf32> to vector<8x8xf32>
    %c0_14 = arith.constant 0 : index
    %c0_15 = arith.constant 0 : index
    %c0_16 = arith.constant 0 : index
    %19 = vector.load %arg24[%c0_14, %c0_15, %c0_16] : memref<8x8x8xf32, #tpu.memory_space<vmem>>, vector<1x8x8xf32>
    %20 = vector.shape_cast %19 : vector<1x8x8xf32> to vector<8x8xf32>
    %21 = vector.shape_cast %18 : vector<8x8xf32> to vector<1x8x8xf32>
    tpu.vector_store %arg24[%c0_14, %c0_15, %c0_16], %21 {strides = array<i32>} : memref<8x8x8xf32, #tpu.memory_space<vmem>>, vector<1x8x8xf32>,
    %22 = vector.extract_strided_slice %16 {offsets = [0, 0, 8], sizes = [1, 8, 8], strides = [1, 1, 1]} : vector<2x8x32xf32> to vector<1x8x8xf32>
    %23 = vector.shape_cast %22 : vector<1x8x8xf32> to vector<8x8xf32>
    %c1 = arith.constant 1 : index
    %c0_17 = arith.constant 0 : index
    %c0_18 = arith.constant 0 : index
    %24 = vector.load %arg24[%c1, %c0_17, %c0_18] : memref<8x8x8xf32, #tpu.memory_space<vmem>>, vector<1x8x8xf32>
    %25 = vector.shape_cast %24 : vector<1x8x8xf32> to vector<8x8xf32>
    %26 = vector.shape_cast %23 : vector<8x8xf32> to vector<1x8x8xf32>
    tpu.vector_store %arg24[%c1, %c0_17, %c0_18], %26 {strides = array<i32>} : memref<8x8x8xf32, #tpu.memory_space<vmem>>, vector<1x8x8xf32>,
    %27 = vector.extract_strided_slice %16 {offsets = [0, 0, 16], sizes = [1, 8, 8], strides = [1, 1, 1]} : vector<2x8x32xf32> to vector<1x8x8xf32>
    %28 = vector.shape_cast %27 : vector<1x8x8xf32> to vector<8x8xf32>
    %c2 = arith.constant 2 : index
    %c0_19 = arith.constant 0 : index
    %c0_20 = arith.constant 0 : index
    %29 = vector.load %arg24[%c2, %c0_19, %c0_20] : memref<8x8x8xf32, #tpu.memory_space<vmem>>, vector<1x8x8xf32>
    %30 = vector.shape_cast %29 : vector<1x8x8xf32> to vector<8x8xf32>
    %31 = vector.shape_cast %28 : vector<8x8xf32> to vector<1x8x8xf32>
    tpu.vector_store %arg24[%c2, %c0_19, %c0_20], %31 {strides = array<i32>} : memref<8x8x8xf32, #tpu.memory_space<vmem>>, vector<1x8x8xf32>,
    %32 = vector.extract_strided_slice %16 {offsets = [0, 0, 24], sizes = [1, 8, 8], strides = [1, 1, 1]} : vector<2x8x32xf32> to vector<1x8x8xf32>
    %33 = vector.shape_cast %32 : vector<1x8x8xf32> to vector<8x8xf32>
    %c3 = arith.constant 3 : index
    %c0_21 = arith.constant 0 : index
    %c0_22 = arith.constant 0 : index
    %34 = vector.load %arg24[%c3, %c0_21, %c0_22] : memref<8x8x8xf32, #tpu.memory_space<vmem>>, vector<1x8x8xf32>
    %35 = vector.shape_cast %34 : vector<1x8x8xf32> to vector<8x8xf32>
    %36 = vector.shape_cast %33 : vector<8x8xf32> to vector<1x8x8xf32>
    tpu.vector_store %arg24[%c3, %c0_21, %c0_22], %36 {strides = array<i32>} : memref<8x8x8xf32, #tpu.memory_space<vmem>>, vector<1x8x8xf32>,
    %37 = vector.extract_strided_slice %16 {offsets = [1, 0, 0], sizes = [1, 8, 8], strides = [1, 1, 1]} : vector<2x8x32xf32> to vector<1x8x8xf32>
    %38 = vector.shape_cast %37 : vector<1x8x8xf32> to vector<8x8xf32>
    %c4 = arith.constant 4 : index
    %c0_23 = arith.constant 0 : index
    %c0_24 = arith.constant 0 : index
    %39 = vector.load %arg24[%c4, %c0_23, %c0_24] : memref<8x8x8xf32, #tpu.memory_space<vmem>>, vector<1x8x8xf32>
    %40 = vector.shape_cast %39 : vector<1x8x8xf32> to vector<8x8xf32>
    %41 = vector.shape_cast %38 : vector<8x8xf32> to vector<1x8x8xf32>
    tpu.vector_store %arg24[%c4, %c0_23, %c0_24], %41 {strides = array<i32>} : memref<8x8x8xf32, #tpu.memory_space<vmem>>, vector<1x8x8xf32>,
    %42 = vector.extract_strided_slice %16 {offsets = [1, 0, 8], sizes = [1, 8, 8], strides = [1, 1, 1]} : vector<2x8x32xf32> to vector<1x8x8xf32>
    %43 = vector.shape_cast %42 : vector<1x8x8xf32> to vector<8x8xf32>
    %c5 = arith.constant 5 : index
    %c0_25 = arith.constant 0 : index
    %c0_26 = arith.constant 0 : index
    %44 = vector.load %arg24[%c5, %c0_25, %c0_26] : memref<8x8x8xf32, #tpu.memory_space<vmem>>, vector<1x8x8xf32>
    %45 = vector.shape_cast %44 : vector<1x8x8xf32> to vector<8x8xf32>
    %46 = vector.shape_cast %43 : vector<8x8xf32> to vector<1x8x8xf32>
    tpu.vector_store %arg24[%c5, %c0_25, %c0_26], %46 {strides = array<i32>} : memref<8x8x8xf32, #tpu.memory_space<vmem>>, vector<1x8x8xf32>,
    %47 = vector.extract_strided_slice %16 {offsets = [1, 0, 16], sizes = [1, 8, 8], strides = [1, 1, 1]} : vector<2x8x32xf32> to vector<1x8x8xf32>
    %48 = vector.shape_cast %47 : vector<1x8x8xf32> to vector<8x8xf32>
    %c6 = arith.constant 6 : index
    %c0_27 = arith.constant 0 : index
    %c0_28 = arith.constant 0 : index
    %49 = vector.load %arg24[%c6, %c0_27, %c0_28] : memref<8x8x8xf32, #tpu.memory_space<vmem>>, vector<1x8x8xf32>
    %50 = vector.shape_cast %49 : vector<1x8x8xf32> to vector<8x8xf32>
    %51 = vector.shape_cast %48 : vector<8x8xf32> to vector<1x8x8xf32>
    tpu.vector_store %arg24[%c6, %c0_27, %c0_28], %51 {strides = array<i32>} : memref<8x8x8xf32, #tpu.memory_space<vmem>>, vector<1x8x8xf32>,
    %52 = vector.extract_strided_slice %16 {offsets = [1, 0, 24], sizes = [1, 8, 8], strides = [1, 1, 1]} : vector<2x8x32xf32> to vector<1x8x8xf32>
    %53 = vector.shape_cast %52 : vector<1x8x8xf32> to vector<8x8xf32>
    %c7 = arith.constant 7 : index
    %c0_29 = arith.constant 0 : index
    %c0_30 = arith.constant 0 : index
    %54 = vector.load %arg24[%c7, %c0_29, %c0_30] : memref<8x8x8xf32, #tpu.memory_space<vmem>>, vector<1x8x8xf32>
    %55 = vector.shape_cast %54 : vector<1x8x8xf32> to vector<8x8xf32>
    %56 = vector.shape_cast %53 : vector<8x8xf32> to vector<1x8x8xf32>
    tpu.vector_store %arg24[%c7, %c0_29, %c0_30], %56 {strides = array<i32>} : memref<8x8x8xf32, #tpu.memory_space<vmem>>, vector<1x8x8xf32>,
    %57 = vector.extract_strided_slice %9 {offsets = [0, 0], sizes = [16, 32], strides = [1, 1]} : vector<16x128xf32> to vector<16x32xf32>
    %58 = vector.shape_cast %57 : vector<16x32xf32> to vector<2x8x32xf32>
    %59 = vector.extract_strided_slice %58 {offsets = [0, 0, 0], sizes = [1, 8, 8], strides = [1, 1, 1]} : vector<2x8x32xf32> to vector<1x8x8xf32>
    %60 = vector.shape_cast %59 : vector<1x8x8xf32> to vector<8x8xf32>
    %c0_31 = arith.constant 0 : index
    %c0_32 = arith.constant 0 : index
    %c0_33 = arith.constant 0 : index
    %61 = vector.load %arg25[%c0_31, %c0_32, %c0_33] : memref<8x8x8xf32, #tpu.memory_space<vmem>>, vector<1x8x8xf32>
    %62 = vector.shape_cast %61 : vector<1x8x8xf32> to vector<8x8xf32>
    %63 = vector.shape_cast %60 : vector<8x8xf32> to vector<1x8x8xf32>
    tpu.vector_store %arg25[%c0_31, %c0_32, %c0_33], %63 {strides = array<i32>} : memref<8x8x8xf32, #tpu.memory_space<vmem>>, vector<1x8x8xf32>,
    %64 = vector.extract_strided_slice %58 {offsets = [0, 0, 8], sizes = [1, 8, 8], strides = [1, 1, 1]} : vector<2x8x32xf32> to vector<1x8x8xf32>
    %65 = vector.shape_cast %64 : vector<1x8x8xf32> to vector<8x8xf32>
    %c1_34 = arith.constant 1 : index
    %c0_35 = arith.constant 0 : index
    %c0_36 = arith.constant 0 : index
    %66 = vector.load %arg25[%c1_34, %c0_35, %c0_36] : memref<8x8x8xf32, #tpu.memory_space<vmem>>, vector<1x8x8xf32>
    %67 = vector.shape_cast %66 : vector<1x8x8xf32> to vector<8x8xf32>
    %68 = vector.shape_cast %65 : vector<8x8xf32> to vector<1x8x8xf32>
    tpu.vector_store %arg25[%c1_34, %c0_35, %c0_36], %68 {strides = array<i32>} : memref<8x8x8xf32, #tpu.memory_space<vmem>>, vector<1x8x8xf32>,
    %69 = vector.extract_strided_slice %58 {offsets = [0, 0, 16], sizes = [1, 8, 8], strides = [1, 1, 1]} : vector<2x8x32xf32> to vector<1x8x8xf32>
    %70 = vector.shape_cast %69 : vector<1x8x8xf32> to vector<8x8xf32>
    %c2_37 = arith.constant 2 : index
    %c0_38 = arith.constant 0 : index
    %c0_39 = arith.constant 0 : index
    %71 = vector.load %arg25[%c2_37, %c0_38, %c0_39] : memref<8x8x8xf32, #tpu.memory_space<vmem>>, vector<1x8x8xf32>
    %72 = vector.shape_cast %71 : vector<1x8x8xf32> to vector<8x8xf32>
    %73 = vector.shape_cast %70 : vector<8x8xf32> to vector<1x8x8xf32>
    tpu.vector_store %arg25[%c2_37, %c0_38, %c0_39], %73 {strides = array<i32>} : memref<8x8x8xf32, #tpu.memory_space<vmem>>, vector<1x8x8xf32>,
    %74 = vector.extract_strided_slice %58 {offsets = [0, 0, 24], sizes = [1, 8, 8], strides = [1, 1, 1]} : vector<2x8x32xf32> to vector<1x8x8xf32>
    %75 = vector.shape_cast %74 : vector<1x8x8xf32> to vector<8x8xf32>
    %c3_40 = arith.constant 3 : index
    %c0_41 = arith.constant 0 : index
    %c0_42 = arith.constant 0 : index
    %76 = vector.load %arg25[%c3_40, %c0_41, %c0_42] : memref<8x8x8xf32, #tpu.memory_space<vmem>>, vector<1x8x8xf32>
    %77 = vector.shape_cast %76 : vector<1x8x8xf32> to vector<8x8xf32>
    %78 = vector.shape_cast %75 : vector<8x8xf32> to vector<1x8x8xf32>
    tpu.vector_store %arg25[%c3_40, %c0_41, %c0_42], %78 {strides = array<i32>} : memref<8x8x8xf32, #tpu.memory_space<vmem>>, vector<1x8x8xf32>,
    %79 = vector.extract_strided_slice %58 {offsets = [1, 0, 0], sizes = [1, 8, 8], strides = [1, 1, 1]} : vector<2x8x32xf32> to vector<1x8x8xf32>
    %80 = vector.shape_cast %79 : vector<1x8x8xf32> to vector<8x8xf32>
    %c4_43 = arith.constant 4 : index
    %c0_44 = arith.constant 0 : index
    %c0_45 = arith.constant 0 : index
    %81 = vector.load %arg25[%c4_43, %c0_44, %c0_45] : memref<8x8x8xf32, #tpu.memory_space<vmem>>, vector<1x8x8xf32>
    %82 = vector.shape_cast %81 : vector<1x8x8xf32> to vector<8x8xf32>
    %83 = vector.shape_cast %80 : vector<8x8xf32> to vector<1x8x8xf32>
    tpu.vector_store %arg25[%c4_43, %c0_44, %c0_45], %83 {strides = array<i32>} : memref<8x8x8xf32, #tpu.memory_space<vmem>>, vector<1x8x8xf32>,
    %84 = vector.extract_strided_slice %58 {offsets = [1, 0, 8], sizes = [1, 8, 8], strides = [1, 1, 1]} : vector<2x8x32xf32> to vector<1x8x8xf32>
    %85 = vector.shape_cast %84 : vector<1x8x8xf32> to vector<8x8xf32>
    %c5_46 = arith.constant 5 : index
    %c0_47 = arith.constant 0 : index
    %c0_48 = arith.constant 0 : index
    %86 = vector.load %arg25[%c5_46, %c0_47, %c0_48] : memref<8x8x8xf32, #tpu.memory_space<vmem>>, vector<1x8x8xf32>
    %87 = vector.shape_cast %86 : vector<1x8x8xf32> to vector<8x8xf32>
    %88 = vector.shape_cast %85 : vector<8x8xf32> to vector<1x8x8xf32>
    tpu.vector_store %arg25[%c5_46, %c0_47, %c0_48], %88 {strides = array<i32>} : memref<8x8x8xf32, #tpu.memory_space<vmem>>, vector<1x8x8xf32>,
    %89 = vector.extract_strided_slice %58 {offsets = [1, 0, 16], sizes = [1, 8, 8], strides = [1, 1, 1]} : vector<2x8x32xf32> to vector<1x8x8xf32>
    %90 = vector.shape_cast %89 : vector<1x8x8xf32> to vector<8x8xf32>
    %c6_49 = arith.constant 6 : index
    %c0_50 = arith.constant 0 : index
    %c0_51 = arith.constant 0 : index
    %91 = vector.load %arg25[%c6_49, %c0_50, %c0_51] : memref<8x8x8xf32, #tpu.memory_space<vmem>>, vector<1x8x8xf32>
    %92 = vector.shape_cast %91 : vector<1x8x8xf32> to vector<8x8xf32>
    %93 = vector.shape_cast %90 : vector<8x8xf32> to vector<1x8x8xf32>
    tpu.vector_store %arg25[%c6_49, %c0_50, %c0_51], %93 {strides = array<i32>} : memref<8x8x8xf32, #tpu.memory_space<vmem>>, vector<1x8x8xf32>,
    %94 = vector.extract_strided_slice %58 {offsets = [1, 0, 24], sizes = [1, 8, 8], strides = [1, 1, 1]} : vector<2x8x32xf32> to vector<1x8x8xf32>
    %95 = vector.shape_cast %94 : vector<1x8x8xf32> to vector<8x8xf32>
    %c7_52 = arith.constant 7 : index
    %c0_53 = arith.constant 0 : index
    %c0_54 = arith.constant 0 : index
    %96 = vector.load %arg25[%c7_52, %c0_53, %c0_54] : memref<8x8x8xf32, #tpu.memory_space<vmem>>, vector<1x8x8xf32>
    %97 = vector.shape_cast %96 : vector<1x8x8xf32> to vector<8x8xf32>
    %98 = vector.shape_cast %95 : vector<8x8xf32> to vector<1x8x8xf32>
    tpu.vector_store %arg25[%c7_52, %c0_53, %c0_54], %98 {strides = array<i32>} : memref<8x8x8xf32, #tpu.memory_space<vmem>>, vector<1x8x8xf32>,
    %99 = vector.extract_strided_slice %9 {offsets = [0, 32], sizes = [16, 32], strides = [1, 1]} : vector<16x128xf32> to vector<16x32xf32>
    %100 = vector.shape_cast %99 : vector<16x32xf32> to vector<2x8x32xf32>
    %101 = vector.extract_strided_slice %100 {offsets = [0, 0, 0], sizes = [1, 8, 8], strides = [1, 1, 1]} : vector<2x8x32xf32> to vector<1x8x8xf32>
    %102 = vector.shape_cast %101 : vector<1x8x8xf32> to vector<8x8xf32>
    %c0_55 = arith.constant 0 : index
    %c0_56 = arith.constant 0 : index
    %c0_57 = arith.constant 0 : index
    %103 = vector.load %arg26[%c0_55, %c0_56, %c0_57] : memref<8x8x8xf32, #tpu.memory_space<vmem>>, vector<1x8x8xf32>
    %104 = vector.shape_cast %103 : vector<1x8x8xf32> to vector<8x8xf32>
    %105 = vector.shape_cast %102 : vector<8x8xf32> to vector<1x8x8xf32>
    tpu.vector_store %arg26[%c0_55, %c0_56, %c0_57], %105 {strides = array<i32>} : memref<8x8x8xf32, #tpu.memory_space<vmem>>, vector<1x8x8xf32>,
    %106 = vector.extract_strided_slice %100 {offsets = [0, 0, 8], sizes = [1, 8, 8], strides = [1, 1, 1]} : vector<2x8x32xf32> to vector<1x8x8xf32>
    %107 = vector.shape_cast %106 : vector<1x8x8xf32> to vector<8x8xf32>
    %c1_58 = arith.constant 1 : index
    %c0_59 = arith.constant 0 : index
    %c0_60 = arith.constant 0 : index
    %108 = vector.load %arg26[%c1_58, %c0_59, %c0_60] : memref<8x8x8xf32, #tpu.memory_space<vmem>>, vector<1x8x8xf32>
    %109 = vector.shape_cast %108 : vector<1x8x8xf32> to vector<8x8xf32>
    %110 = vector.shape_cast %107 : vector<8x8xf32> to vector<1x8x8xf32>
    tpu.vector_store %arg26[%c1_58, %c0_59, %c0_60], %110 {strides = array<i32>} : memref<8x8x8xf32, #tpu.memory_space<vmem>>, vector<1x8x8xf32>,
    %111 = vector.extract_strided_slice %100 {offsets = [0, 0, 16], sizes = [1, 8, 8], strides = [1, 1, 1]} : vector<2x8x32xf32> to vector<1x8x8xf32>
    %112 = vector.shape_cast %111 : vector<1x8x8xf32> to vector<8x8xf32>
    %c2_61 = arith.constant 2 : index
    %c0_62 = arith.constant 0 : index
    %c0_63 = arith.constant 0 : index
    %113 = vector.load %arg26[%c2_61, %c0_62, %c0_63] : memref<8x8x8xf32, #tpu.memory_space<vmem>>, vector<1x8x8xf32>
    %114 = vector.shape_cast %113 : vector<1x8x8xf32> to vector<8x8xf32>
    %115 = vector.shape_cast %112 : vector<8x8xf32> to vector<1x8x8xf32>
    tpu.vector_store %arg26[%c2_61, %c0_62, %c0_63], %115 {strides = array<i32>} : memref<8x8x8xf32, #tpu.memory_space<vmem>>, vector<1x8x8xf32>,
    %116 = vector.extract_strided_slice %100 {offsets = [0, 0, 24], sizes = [1, 8, 8], strides = [1, 1, 1]} : vector<2x8x32xf32> to vector<1x8x8xf32>
    %117 = vector.shape_cast %116 : vector<1x8x8xf32> to vector<8x8xf32>
    %c3_64 = arith.constant 3 : index
    %c0_65 = arith.constant 0 : index
    %c0_66 = arith.constant 0 : index
    %118 = vector.load %arg26[%c3_64, %c0_65, %c0_66] : memref<8x8x8xf32, #tpu.memory_space<vmem>>, vector<1x8x8xf32>
    %119 = vector.shape_cast %118 : vector<1x8x8xf32> to vector<8x8xf32>
    %120 = vector.shape_cast %117 : vector<8x8xf32> to vector<1x8x8xf32>
    tpu.vector_store %arg26[%c3_64, %c0_65, %c0_66], %120 {strides = array<i32>} : memref<8x8x8xf32, #tpu.memory_space<vmem>>, vector<1x8x8xf32>,
    %121 = vector.extract_strided_slice %100 {offsets = [1, 0, 0], sizes = [1, 8, 8], strides = [1, 1, 1]} : vector<2x8x32xf32> to vector<1x8x8xf32>
    %122 = vector.shape_cast %121 : vector<1x8x8xf32> to vector<8x8xf32>
    %c4_67 = arith.constant 4 : index
    %c0_68 = arith.constant 0 : index
    %c0_69 = arith.constant 0 : index
    %123 = vector.load %arg26[%c4_67, %c0_68, %c0_69] : memref<8x8x8xf32, #tpu.memory_space<vmem>>, vector<1x8x8xf32>
    %124 = vector.shape_cast %123 : vector<1x8x8xf32> to vector<8x8xf32>
    %125 = vector.shape_cast %122 : vector<8x8xf32> to vector<1x8x8xf32>
    tpu.vector_store %arg26[%c4_67, %c0_68, %c0_69], %125 {strides = array<i32>} : memref<8x8x8xf32, #tpu.memory_space<vmem>>, vector<1x8x8xf32>,
    %126 = vector.extract_strided_slice %100 {offsets = [1, 0, 8], sizes = [1, 8, 8], strides = [1, 1, 1]} : vector<2x8x32xf32> to vector<1x8x8xf32>
    %127 = vector.shape_cast %126 : vector<1x8x8xf32> to vector<8x8xf32>
    %c5_70 = arith.constant 5 : index
    %c0_71 = arith.constant 0 : index
    %c0_72 = arith.constant 0 : index
    %128 = vector.load %arg26[%c5_70, %c0_71, %c0_72] : memref<8x8x8xf32, #tpu.memory_space<vmem>>, vector<1x8x8xf32>
    %129 = vector.shape_cast %128 : vector<1x8x8xf32> to vector<8x8xf32>
    %130 = vector.shape_cast %127 : vector<8x8xf32> to vector<1x8x8xf32>
    tpu.vector_store %arg26[%c5_70, %c0_71, %c0_72], %130 {strides = array<i32>} : memref<8x8x8xf32, #tpu.memory_space<vmem>>, vector<1x8x8xf32>,
    %131 = vector.extract_strided_slice %100 {offsets = [1, 0, 16], sizes = [1, 8, 8], strides = [1, 1, 1]} : vector<2x8x32xf32> to vector<1x8x8xf32>
    %132 = vector.shape_cast %131 : vector<1x8x8xf32> to vector<8x8xf32>
    %c6_73 = arith.constant 6 : index
    %c0_74 = arith.constant 0 : index
    %c0_75 = arith.constant 0 : index
    %133 = vector.load %arg26[%c6_73, %c0_74, %c0_75] : memref<8x8x8xf32, #tpu.memory_space<vmem>>, vector<1x8x8xf32>
    %134 = vector.shape_cast %133 : vector<1x8x8xf32> to vector<8x8xf32>
    %135 = vector.shape_cast %132 : vector<8x8xf32> to vector<1x8x8xf32>
    tpu.vector_store %arg26[%c6_73, %c0_74, %c0_75], %135 {strides = array<i32>} : memref<8x8x8xf32, #tpu.memory_space<vmem>>, vector<1x8x8xf32>,
    %136 = vector.extract_strided_slice %100 {offsets = [1, 0, 24], sizes = [1, 8, 8], strides = [1, 1, 1]} : vector<2x8x32xf32> to vector<1x8x8xf32>
    %137 = vector.shape_cast %136 : vector<1x8x8xf32> to vector<8x8xf32>
    %c7_76 = arith.constant 7 : index
    %c0_77 = arith.constant 0 : index
    %c0_78 = arith.constant 0 : index
    %138 = vector.load %arg26[%c7_76, %c0_77, %c0_78] : memref<8x8x8xf32, #tpu.memory_space<vmem>>, vector<1x8x8xf32>
    %139 = vector.shape_cast %138 : vector<1x8x8xf32> to vector<8x8xf32>
    %140 = vector.shape_cast %137 : vector<8x8xf32> to vector<1x8x8xf32>
    tpu.vector_store %arg26[%c7_76, %c0_77, %c0_78], %140 {strides = array<i32>} : memref<8x8x8xf32, #tpu.memory_space<vmem>>, vector<1x8x8xf32>,
    %c0_79 = arith.constant 0 : index
    %c0_80 = arith.constant 0 : index
    %c0_81 = arith.constant 0 : index
    %141 = vector.load %arg24[%c0_79, %c0_80, %c0_81] : memref<8x8x8xf32, #tpu.memory_space<vmem>>, vector<8x8x8xf32>
    %142 = arith.truncf %141 : vector<8x8x8xf32> to vector<8x8x8xbf16>
    %c0_82 = arith.constant 0 : index
    %c0_83 = arith.constant 0 : index
    %c0_84 = arith.constant 0 : index
    %143 = vector.load %arg25[%c0_82, %c0_83, %c0_84] : memref<8x8x8xf32, #tpu.memory_space<vmem>>, vector<8x8x8xf32>
    %144 = arith.truncf %143 : vector<8x8x8xf32> to vector<8x8x8xbf16>
    %c0_85 = arith.constant 0 : index
    %c0_86 = arith.constant 0 : index
    %c0_87 = arith.constant 0 : index
    %145 = vector.load %arg26[%c0_85, %c0_86, %c0_87] : memref<8x8x8xf32, #tpu.memory_space<vmem>>, vector<8x8x8xf32>
    %146 = arith.truncf %145 : vector<8x8x8xf32> to vector<8x8x8xbf16>
    "tpu.trace_start"() <{level = 10 : i32, message = "gqd,gkd->gqk"}> : () -> ()
    %cst_88 = arith.constant dense<0.000000e+00> : vector<8x8x8xf32>
    %147 = tpu.matmul %142, %144, %cst_88 {dimension_numbers = #tpu.dot_dimension_numbers<[2], [2], [1], [1], [0, 0, 0, 1, 1, 1], [0], [0]>} : vector<8x8x8xbf16>, vector<8x8x8xbf16>, vector<8x8x8xf32> -> vector<8x8x8xf32>
    "tpu.trace_stop"() : () -> ()
    %cst_89 = arith.constant 0.353553385 : f32
    %148 = vector.broadcast %cst_89 : f32 to vector<8x8x8xf32>
    %149 = arith.mulf %147, %148 : vector<8x8x8xf32>
    %cst_90 = arith.constant dense<0xFF800000> : vector<8x8xf32>
    %150 = vector.multi_reduction <maximumf>, %149, %cst_90 [2] : vector<8x8x8xf32> to vector<8x8xf32>
    %151 = vector.shape_cast %150 : vector<8x8xf32> to vector<8x8x1xf32>
    %152 = vector.broadcast %151 : vector<8x8x1xf32> to vector<8x8x8xf32>
    %153 = arith.subf %149, %152 : vector<8x8x8xf32>
    %154 = math.exp %153 : vector<8x8x8xf32>
    %cst_91 = arith.constant dense<0.000000e+00> : vector<8x8xf32>
    %155 = vector.multi_reduction <add>, %154, %cst_91 [2] : vector<8x8x8xf32> to vector<8x8xf32>
    %156 = vector.shape_cast %155 : vector<8x8xf32> to vector<8x8x1xf32>
    %157 = arith.truncf %154 : vector<8x8x8xf32> to vector<8x8x8xbf16>
    "tpu.trace_start"() <{level = 10 : i32, message = "gqk,gkd->gqd"}> : () -> ()
    %cst_92 = arith.constant dense<0.000000e+00> : vector<8x8x8xf32>
    %158 = tpu.matmul %157, %146, %cst_92 {dimension_numbers = #tpu.dot_dimension_numbers<[2], [1], [1], [2], [0, 0, 0, 1, 1, 2], [0], [0]>} : vector<8x8x8xbf16>, vector<8x8x8xbf16>, vector<8x8x8xf32> -> vector<8x8x8xf32>
    "tpu.trace_stop"() : () -> ()
    %159 = vector.broadcast %156 : vector<8x8x1xf32> to vector<8x8x8xf32>
    %160 = arith.divf %158, %159 : vector<8x8x8xf32>
    %161 = vector.extract_strided_slice %160 {offsets = [0, 0, 0], sizes = [1, 8, 8], strides = [1, 1, 1]} : vector<8x8x8xf32> to vector<1x8x8xf32>
    %162 = vector.shape_cast %161 : vector<1x8x8xf32> to vector<8x8xf32>
    %c0_93 = arith.constant 0 : index
    %c0_94 = arith.constant 0 : index
    %163 = vector.load %arg27[%c0_93, %c0_94] : memref<16x32xf32, #tpu.memory_space<vmem>>, vector<8x8xf32>
    tpu.vector_store %arg27[%c0_93, %c0_94], %162 {strides = array<i32>} : memref<16x32xf32, #tpu.memory_space<vmem>>, vector<8x8xf32>,
    %164 = vector.extract_strided_slice %160 {offsets = [1, 0, 0], sizes = [1, 8, 8], strides = [1, 1, 1]} : vector<8x8x8xf32> to vector<1x8x8xf32>
    %165 = vector.shape_cast %164 : vector<1x8x8xf32> to vector<8x8xf32>
    %c0_95 = arith.constant 0 : index
    %c8 = arith.constant 8 : index
    %166 = vector.load %arg27[%c0_95, %c8] : memref<16x32xf32, #tpu.memory_space<vmem>>, vector<8x8xf32>
    tpu.vector_store %arg27[%c0_95, %c8], %165 {strides = array<i32>} : memref<16x32xf32, #tpu.memory_space<vmem>>, vector<8x8xf32>,
    %167 = vector.extract_strided_slice %160 {offsets = [2, 0, 0], sizes = [1, 8, 8], strides = [1, 1, 1]} : vector<8x8x8xf32> to vector<1x8x8xf32>
    %168 = vector.shape_cast %167 : vector<1x8x8xf32> to vector<8x8xf32>
    %c0_96 = arith.constant 0 : index
    %c16 = arith.constant 16 : index
    %169 = vector.load %arg27[%c0_96, %c16] : memref<16x32xf32, #tpu.memory_space<vmem>>, vector<8x8xf32>
    tpu.vector_store %arg27[%c0_96, %c16], %168 {strides = array<i32>} : memref<16x32xf32, #tpu.memory_space<vmem>>, vector<8x8xf32>,
    %170 = vector.extract_strided_slice %160 {offsets = [3, 0, 0], sizes = [1, 8, 8], strides = [1, 1, 1]} : vector<8x8x8xf32> to vector<1x8x8xf32>
    %171 = vector.shape_cast %170 : vector<1x8x8xf32> to vector<8x8xf32>
    %c0_97 = arith.constant 0 : index
    %c24 = arith.constant 24 : index
    %172 = vector.load %arg27[%c0_97, %c24] : memref<16x32xf32, #tpu.memory_space<vmem>>, vector<8x8xf32>
    tpu.vector_store %arg27[%c0_97, %c24], %171 {strides = array<i32>} : memref<16x32xf32, #tpu.memory_space<vmem>>, vector<8x8xf32>,
    %173 = vector.extract_strided_slice %160 {offsets = [4, 0, 0], sizes = [1, 8, 8], strides = [1, 1, 1]} : vector<8x8x8xf32> to vector<1x8x8xf32>
    %174 = vector.shape_cast %173 : vector<1x8x8xf32> to vector<8x8xf32>
    %c8_98 = arith.constant 8 : index
    %c0_99 = arith.constant 0 : index
    %175 = vector.load %arg27[%c8_98, %c0_99] : memref<16x32xf32, #tpu.memory_space<vmem>>, vector<8x8xf32>
    tpu.vector_store %arg27[%c8_98, %c0_99], %174 {strides = array<i32>} : memref<16x32xf32, #tpu.memory_space<vmem>>, vector<8x8xf32>,
    %176 = vector.extract_strided_slice %160 {offsets = [5, 0, 0], sizes = [1, 8, 8], strides = [1, 1, 1]} : vector<8x8x8xf32> to vector<1x8x8xf32>
    %177 = vector.shape_cast %176 : vector<1x8x8xf32> to vector<8x8xf32>
    %c8_100 = arith.constant 8 : index
    %c8_101 = arith.constant 8 : index
    %178 = vector.load %arg27[%c8_100, %c8_101] : memref<16x32xf32, #tpu.memory_space<vmem>>, vector<8x8xf32>
    tpu.vector_store %arg27[%c8_100, %c8_101], %177 {strides = array<i32>} : memref<16x32xf32, #tpu.memory_space<vmem>>, vector<8x8xf32>,
    %179 = vector.extract_strided_slice %160 {offsets = [6, 0, 0], sizes = [1, 8, 8], strides = [1, 1, 1]} : vector<8x8x8xf32> to vector<1x8x8xf32>
    %180 = vector.shape_cast %179 : vector<1x8x8xf32> to vector<8x8xf32>
    %c8_102 = arith.constant 8 : index
    %c16_103 = arith.constant 16 : index
    %181 = vector.load %arg27[%c8_102, %c16_103] : memref<16x32xf32, #tpu.memory_space<vmem>>, vector<8x8xf32>
    tpu.vector_store %arg27[%c8_102, %c16_103], %180 {strides = array<i32>} : memref<16x32xf32, #tpu.memory_space<vmem>>, vector<8x8xf32>,
    %182 = vector.extract_strided_slice %160 {offsets = [7, 0, 0], sizes = [1, 8, 8], strides = [1, 1, 1]} : vector<8x8x8xf32> to vector<1x8x8xf32>
    %183 = vector.shape_cast %182 : vector<1x8x8xf32> to vector<8x8xf32>
    %c8_104 = arith.constant 8 : index
    %c24_105 = arith.constant 24 : index
    %184 = vector.load %arg27[%c8_104, %c24_105] : memref<16x32xf32, #tpu.memory_space<vmem>>, vector<8x8xf32>
    tpu.vector_store %arg27[%c8_104, %c24_105], %183 {strides = array<i32>} : memref<16x32xf32, #tpu.memory_space<vmem>>, vector<8x8xf32>,
    %c0_106 = arith.constant 0 : index
    %c0_107 = arith.constant 0 : index
    %185 = vector.load %arg27[%c0_106, %c0_107] : memref<16x32xf32, #tpu.memory_space<vmem>>, vector<16x32xf32>
    %186 = arith.truncf %185 : vector<16x32xf32> to vector<16x32xbf16>
    %c0_108 = arith.constant 0 : index
    %c0_109 = arith.constant 0 : index
    %187 = vector.load %arg5[%c0_108, %c0_109] : memref<32x32xbf16, #tpu.memory_space<vmem>>, vector<32x32xbf16>
    %cst_110 = arith.constant dense<0.000000e+00> : vector<16x32xf32>
    %188 = tpu.matmul %186, %187, %cst_110 {dimension_numbers = #tpu.dot_dimension_numbers<[1], [0], [0], [1], [0, 0, 1, 1], [], []>} : vector<16x32xbf16>, vector<32x32xbf16>, vector<16x32xf32> -> vector<16x32xf32>
    %c0_111 = arith.constant 0 : index
    %c0_112 = arith.constant 0 : index
    %189 = vector.load %arg6[%c0_111, %c0_112] : memref<1x32xf32, #tpu.memory_space<vmem>>, vector<1x32xf32>
    %190 = vector.broadcast %189 : vector<1x32xf32> to vector<16x32xf32>
    %191 = arith.addf %188, %190 : vector<16x32xf32>
    %192 = arith.addf %3, %191 : vector<16x32xf32>
    %c0_113 = arith.constant 0 : index
    %c0_114 = arith.constant 0 : index
    %193 = vector.load %arg7[%c0_113, %c0_114] : memref<1x32xf32, #tpu.memory_space<vmem>>, vector<1x32xf32>
    %c0_115 = arith.constant 0 : index
    %c0_116 = arith.constant 0 : index
    %194 = vector.load %arg8[%c0_115, %c0_116] : memref<1x32xf32, #tpu.memory_space<vmem>>, vector<1x32xf32>
    %cst_117 = arith.constant dense<0.000000e+00> : vector<16xf32>
    %195 = vector.multi_reduction <add>, %192, %cst_117 [1] : vector<16x32xf32> to vector<16xf32>
    %196 = vector.shape_cast %195 : vector<16xf32> to vector<16x1xf32>
    %cst_118 = arith.constant 3.200000e+01 : f32
    %197 = vector.broadcast %cst_118 : f32 to vector<16x1xf32>
    %198 = arith.divf %196, %197 : vector<16x1xf32>
    %199 = vector.broadcast %198 : vector<16x1xf32> to vector<16x32xf32>
    %200 = arith.subf %192, %199 : vector<16x32xf32>
    %201 = arith.mulf %200, %200 : vector<16x32xf32>
    %cst_119 = arith.constant dense<0.000000e+00> : vector<16xf32>
    %202 = vector.multi_reduction <add>, %201, %cst_119 [1] : vector<16x32xf32> to vector<16xf32>
    %203 = vector.shape_cast %202 : vector<16xf32> to vector<16x1xf32>
    %cst_120 = arith.constant 3.200000e+01 : f32
    %204 = vector.broadcast %cst_120 : f32 to vector<16x1xf32>
    %205 = arith.divf %203, %204 : vector<16x1xf32>
    %cst_121 = arith.constant 9.99999974E-6 : f32
    %206 = vector.broadcast %cst_121 : f32 to vector<16x1xf32>
    %207 = arith.addf %205, %206 : vector<16x1xf32>
    %208 = math.rsqrt %207 : vector<16x1xf32>
    %209 = vector.broadcast %208 : vector<16x1xf32> to vector<16x32xf32>
    %210 = arith.mulf %200, %209 : vector<16x32xf32>
    %211 = vector.broadcast %193 : vector<1x32xf32> to vector<16x32xf32>
    %212 = arith.mulf %210, %211 : vector<16x32xf32>
    %213 = vector.broadcast %194 : vector<1x32xf32> to vector<16x32xf32>
    %214 = arith.addf %212, %213 : vector<16x32xf32>
    %215 = arith.truncf %214 : vector<16x32xf32> to vector<16x32xbf16>
    %c0_122 = arith.constant 0 : index
    %c0_123 = arith.constant 0 : index
    %216 = vector.load %arg9[%c0_122, %c0_123] : memref<32x32xbf16, #tpu.memory_space<vmem>>, vector<32x32xbf16>
    %cst_124 = arith.constant dense<0.000000e+00> : vector<16x32xf32>
    %217 = tpu.matmul %215, %216, %cst_124 {dimension_numbers = #tpu.dot_dimension_numbers<[1], [0], [0], [1], [0, 0, 1, 1], [], []>} : vector<16x32xbf16>, vector<32x32xbf16>, vector<16x32xf32> -> vector<16x32xf32>
    %c0_125 = arith.constant 0 : index
    %c0_126 = arith.constant 0 : index
    %218 = vector.load %arg10[%c0_125, %c0_126] : memref<1x32xf32, #tpu.memory_space<vmem>>, vector<1x32xf32>
    %219 = vector.broadcast %218 : vector<1x32xf32> to vector<16x32xf32>
    %220 = arith.addf %217, %219 : vector<16x32xf32>
    %221 = vector.shape_cast %220 : vector<16x32xf32> to vector<2x8x32xf32>
    %222 = vector.extract_strided_slice %221 {offsets = [0, 0, 0], sizes = [1, 8, 8], strides = [1, 1, 1]} : vector<2x8x32xf32> to vector<1x8x8xf32>
    %223 = vector.shape_cast %222 : vector<1x8x8xf32> to vector<8x8xf32>
    %c0_127 = arith.constant 0 : index
    %c0_128 = arith.constant 0 : index
    %c0_129 = arith.constant 0 : index
    %224 = vector.load %arg24[%c0_127, %c0_128, %c0_129] : memref<8x8x8xf32, #tpu.memory_space<vmem>>, vector<1x8x8xf32>
    %225 = vector.shape_cast %224 : vector<1x8x8xf32> to vector<8x8xf32>
    %226 = vector.shape_cast %223 : vector<8x8xf32> to vector<1x8x8xf32>
    tpu.vector_store %arg24[%c0_127, %c0_128, %c0_129], %226 {strides = array<i32>} : memref<8x8x8xf32, #tpu.memory_space<vmem>>, vector<1x8x8xf32>,
    %227 = vector.extract_strided_slice %221 {offsets = [0, 0, 8], sizes = [1, 8, 8], strides = [1, 1, 1]} : vector<2x8x32xf32> to vector<1x8x8xf32>
    %228 = vector.shape_cast %227 : vector<1x8x8xf32> to vector<8x8xf32>
    %c1_130 = arith.constant 1 : index
    %c0_131 = arith.constant 0 : index
    %c0_132 = arith.constant 0 : index
    %229 = vector.load %arg24[%c1_130, %c0_131, %c0_132] : memref<8x8x8xf32, #tpu.memory_space<vmem>>, vector<1x8x8xf32>
    %230 = vector.shape_cast %229 : vector<1x8x8xf32> to vector<8x8xf32>
    %231 = vector.shape_cast %228 : vector<8x8xf32> to vector<1x8x8xf32>
    tpu.vector_store %arg24[%c1_130, %c0_131, %c0_132], %231 {strides = array<i32>} : memref<8x8x8xf32, #tpu.memory_space<vmem>>, vector<1x8x8xf32>,
    %232 = vector.extract_strided_slice %221 {offsets = [0, 0, 16], sizes = [1, 8, 8], strides = [1, 1, 1]} : vector<2x8x32xf32> to vector<1x8x8xf32>
    %233 = vector.shape_cast %232 : vector<1x8x8xf32> to vector<8x8xf32>
    %c2_133 = arith.constant 2 : index
    %c0_134 = arith.constant 0 : index
    %c0_135 = arith.constant 0 : index
    %234 = vector.load %arg24[%c2_133, %c0_134, %c0_135] : memref<8x8x8xf32, #tpu.memory_space<vmem>>, vector<1x8x8xf32>
    %235 = vector.shape_cast %234 : vector<1x8x8xf32> to vector<8x8xf32>
    %236 = vector.shape_cast %233 : vector<8x8xf32> to vector<1x8x8xf32>
    tpu.vector_store %arg24[%c2_133, %c0_134, %c0_135], %236 {strides = array<i32>} : memref<8x8x8xf32, #tpu.memory_space<vmem>>, vector<1x8x8xf32>,
    %237 = vector.extract_strided_slice %221 {offsets = [0, 0, 24], sizes = [1, 8, 8], strides = [1, 1, 1]} : vector<2x8x32xf32> to vector<1x8x8xf32>
    %238 = vector.shape_cast %237 : vector<1x8x8xf32> to vector<8x8xf32>
    %c3_136 = arith.constant 3 : index
    %c0_137 = arith.constant 0 : index
    %c0_138 = arith.constant 0 : index
    %239 = vector.load %arg24[%c3_136, %c0_137, %c0_138] : memref<8x8x8xf32, #tpu.memory_space<vmem>>, vector<1x8x8xf32>
    %240 = vector.shape_cast %239 : vector<1x8x8xf32> to vector<8x8xf32>
    %241 = vector.shape_cast %238 : vector<8x8xf32> to vector<1x8x8xf32>
    tpu.vector_store %arg24[%c3_136, %c0_137, %c0_138], %241 {strides = array<i32>} : memref<8x8x8xf32, #tpu.memory_space<vmem>>, vector<1x8x8xf32>,
    %242 = vector.extract_strided_slice %221 {offsets = [1, 0, 0], sizes = [1, 8, 8], strides = [1, 1, 1]} : vector<2x8x32xf32> to vector<1x8x8xf32>
    %243 = vector.shape_cast %242 : vector<1x8x8xf32> to vector<8x8xf32>
    %c4_139 = arith.constant 4 : index
    %c0_140 = arith.constant 0 : index
    %c0_141 = arith.constant 0 : index
    %244 = vector.load %arg24[%c4_139, %c0_140, %c0_141] : memref<8x8x8xf32, #tpu.memory_space<vmem>>, vector<1x8x8xf32>
    %245 = vector.shape_cast %244 : vector<1x8x8xf32> to vector<8x8xf32>
    %246 = vector.shape_cast %243 : vector<8x8xf32> to vector<1x8x8xf32>
    tpu.vector_store %arg24[%c4_139, %c0_140, %c0_141], %246 {strides = array<i32>} : memref<8x8x8xf32, #tpu.memory_space<vmem>>, vector<1x8x8xf32>,
    %247 = vector.extract_strided_slice %221 {offsets = [1, 0, 8], sizes = [1, 8, 8], strides = [1, 1, 1]} : vector<2x8x32xf32> to vector<1x8x8xf32>
    %248 = vector.shape_cast %247 : vector<1x8x8xf32> to vector<8x8xf32>
    %c5_142 = arith.constant 5 : index
    %c0_143 = arith.constant 0 : index
    %c0_144 = arith.constant 0 : index
    %249 = vector.load %arg24[%c5_142, %c0_143, %c0_144] : memref<8x8x8xf32, #tpu.memory_space<vmem>>, vector<1x8x8xf32>
    %250 = vector.shape_cast %249 : vector<1x8x8xf32> to vector<8x8xf32>
    %251 = vector.shape_cast %248 : vector<8x8xf32> to vector<1x8x8xf32>
    tpu.vector_store %arg24[%c5_142, %c0_143, %c0_144], %251 {strides = array<i32>} : memref<8x8x8xf32, #tpu.memory_space<vmem>>, vector<1x8x8xf32>,
    %252 = vector.extract_strided_slice %221 {offsets = [1, 0, 16], sizes = [1, 8, 8], strides = [1, 1, 1]} : vector<2x8x32xf32> to vector<1x8x8xf32>
    %253 = vector.shape_cast %252 : vector<1x8x8xf32> to vector<8x8xf32>
    %c6_145 = arith.constant 6 : index
    %c0_146 = arith.constant 0 : index
    %c0_147 = arith.constant 0 : index
    %254 = vector.load %arg24[%c6_145, %c0_146, %c0_147] : memref<8x8x8xf32, #tpu.memory_space<vmem>>, vector<1x8x8xf32>
    %255 = vector.shape_cast %254 : vector<1x8x8xf32> to vector<8x8xf32>
    %256 = vector.shape_cast %253 : vector<8x8xf32> to vector<1x8x8xf32>
    tpu.vector_store %arg24[%c6_145, %c0_146, %c0_147], %256 {strides = array<i32>} : memref<8x8x8xf32, #tpu.memory_space<vmem>>, vector<1x8x8xf32>,
    %257 = vector.extract_strided_slice %221 {offsets = [1, 0, 24], sizes = [1, 8, 8], strides = [1, 1, 1]} : vector<2x8x32xf32> to vector<1x8x8xf32>
    %258 = vector.shape_cast %257 : vector<1x8x8xf32> to vector<8x8xf32>
    %c7_148 = arith.constant 7 : index
    %c0_149 = arith.constant 0 : index
    %c0_150 = arith.constant 0 : index
    %259 = vector.load %arg24[%c7_148, %c0_149, %c0_150] : memref<8x8x8xf32, #tpu.memory_space<vmem>>, vector<1x8x8xf32>
    %260 = vector.shape_cast %259 : vector<1x8x8xf32> to vector<8x8xf32>
    %261 = vector.shape_cast %258 : vector<8x8xf32> to vector<1x8x8xf32>
    tpu.vector_store %arg24[%c7_148, %c0_149, %c0_150], %261 {strides = array<i32>} : memref<8x8x8xf32, #tpu.memory_space<vmem>>, vector<1x8x8xf32>,
    %262 = vector.extract_strided_slice %9 {offsets = [0, 64], sizes = [16, 32], strides = [1, 1]} : vector<16x128xf32> to vector<16x32xf32>
    %263 = vector.shape_cast %262 : vector<16x32xf32> to vector<2x8x32xf32>
    %264 = vector.extract_strided_slice %263 {offsets = [0, 0, 0], sizes = [1, 8, 8], strides = [1, 1, 1]} : vector<2x8x32xf32> to vector<1x8x8xf32>
    %265 = vector.shape_cast %264 : vector<1x8x8xf32> to vector<8x8xf32>
    %c0_151 = arith.constant 0 : index
    %c0_152 = arith.constant 0 : index
    %c0_153 = arith.constant 0 : index
    %266 = vector.load %arg25[%c0_151, %c0_152, %c0_153] : memref<8x8x8xf32, #tpu.memory_space<vmem>>, vector<1x8x8xf32>
    %267 = vector.shape_cast %266 : vector<1x8x8xf32> to vector<8x8xf32>
    %268 = vector.shape_cast %265 : vector<8x8xf32> to vector<1x8x8xf32>
    tpu.vector_store %arg25[%c0_151, %c0_152, %c0_153], %268 {strides = array<i32>} : memref<8x8x8xf32, #tpu.memory_space<vmem>>, vector<1x8x8xf32>,
    %269 = vector.extract_strided_slice %263 {offsets = [0, 0, 8], sizes = [1, 8, 8], strides = [1, 1, 1]} : vector<2x8x32xf32> to vector<1x8x8xf32>
    %270 = vector.shape_cast %269 : vector<1x8x8xf32> to vector<8x8xf32>
    %c1_154 = arith.constant 1 : index
    %c0_155 = arith.constant 0 : index
    %c0_156 = arith.constant 0 : index
    %271 = vector.load %arg25[%c1_154, %c0_155, %c0_156] : memref<8x8x8xf32, #tpu.memory_space<vmem>>, vector<1x8x8xf32>
    %272 = vector.shape_cast %271 : vector<1x8x8xf32> to vector<8x8xf32>
    %273 = vector.shape_cast %270 : vector<8x8xf32> to vector<1x8x8xf32>
    tpu.vector_store %arg25[%c1_154, %c0_155, %c0_156], %273 {strides = array<i32>} : memref<8x8x8xf32, #tpu.memory_space<vmem>>, vector<1x8x8xf32>,
    %274 = vector.extract_strided_slice %263 {offsets = [0, 0, 16], sizes = [1, 8, 8], strides = [1, 1, 1]} : vector<2x8x32xf32> to vector<1x8x8xf32>
    %275 = vector.shape_cast %274 : vector<1x8x8xf32> to vector<8x8xf32>
    %c2_157 = arith.constant 2 : index
    %c0_158 = arith.constant 0 : index
    %c0_159 = arith.constant 0 : index
    %276 = vector.load %arg25[%c2_157, %c0_158, %c0_159] : memref<8x8x8xf32, #tpu.memory_space<vmem>>, vector<1x8x8xf32>
    %277 = vector.shape_cast %276 : vector<1x8x8xf32> to vector<8x8xf32>
    %278 = vector.shape_cast %275 : vector<8x8xf32> to vector<1x8x8xf32>
    tpu.vector_store %arg25[%c2_157, %c0_158, %c0_159], %278 {strides = array<i32>} : memref<8x8x8xf32, #tpu.memory_space<vmem>>, vector<1x8x8xf32>,
    %279 = vector.extract_strided_slice %263 {offsets = [0, 0, 24], sizes = [1, 8, 8], strides = [1, 1, 1]} : vector<2x8x32xf32> to vector<1x8x8xf32>
    %280 = vector.shape_cast %279 : vector<1x8x8xf32> to vector<8x8xf32>
    %c3_160 = arith.constant 3 : index
    %c0_161 = arith.constant 0 : index
    %c0_162 = arith.constant 0 : index
    %281 = vector.load %arg25[%c3_160, %c0_161, %c0_162] : memref<8x8x8xf32, #tpu.memory_space<vmem>>, vector<1x8x8xf32>
    %282 = vector.shape_cast %281 : vector<1x8x8xf32> to vector<8x8xf32>
    %283 = vector.shape_cast %280 : vector<8x8xf32> to vector<1x8x8xf32>
    tpu.vector_store %arg25[%c3_160, %c0_161, %c0_162], %283 {strides = array<i32>} : memref<8x8x8xf32, #tpu.memory_space<vmem>>, vector<1x8x8xf32>,
    %284 = vector.extract_strided_slice %263 {offsets = [1, 0, 0], sizes = [1, 8, 8], strides = [1, 1, 1]} : vector<2x8x32xf32> to vector<1x8x8xf32>
    %285 = vector.shape_cast %284 : vector<1x8x8xf32> to vector<8x8xf32>
    %c4_163 = arith.constant 4 : index
    %c0_164 = arith.constant 0 : index
    %c0_165 = arith.constant 0 : index
    %286 = vector.load %arg25[%c4_163, %c0_164, %c0_165] : memref<8x8x8xf32, #tpu.memory_space<vmem>>, vector<1x8x8xf32>
    %287 = vector.shape_cast %286 : vector<1x8x8xf32> to vector<8x8xf32>
    %288 = vector.shape_cast %285 : vector<8x8xf32> to vector<1x8x8xf32>
    tpu.vector_store %arg25[%c4_163, %c0_164, %c0_165], %288 {strides = array<i32>} : memref<8x8x8xf32, #tpu.memory_space<vmem>>, vector<1x8x8xf32>,
    %289 = vector.extract_strided_slice %263 {offsets = [1, 0, 8], sizes = [1, 8, 8], strides = [1, 1, 1]} : vector<2x8x32xf32> to vector<1x8x8xf32>
    %290 = vector.shape_cast %289 : vector<1x8x8xf32> to vector<8x8xf32>
    %c5_166 = arith.constant 5 : index
    %c0_167 = arith.constant 0 : index
    %c0_168 = arith.constant 0 : index
    %291 = vector.load %arg25[%c5_166, %c0_167, %c0_168] : memref<8x8x8xf32, #tpu.memory_space<vmem>>, vector<1x8x8xf32>
    %292 = vector.shape_cast %291 : vector<1x8x8xf32> to vector<8x8xf32>
    %293 = vector.shape_cast %290 : vector<8x8xf32> to vector<1x8x8xf32>
    tpu.vector_store %arg25[%c5_166, %c0_167, %c0_168], %293 {strides = array<i32>} : memref<8x8x8xf32, #tpu.memory_space<vmem>>, vector<1x8x8xf32>,
    %294 = vector.extract_strided_slice %263 {offsets = [1, 0, 16], sizes = [1, 8, 8], strides = [1, 1, 1]} : vector<2x8x32xf32> to vector<1x8x8xf32>
    %295 = vector.shape_cast %294 : vector<1x8x8xf32> to vector<8x8xf32>
    %c6_169 = arith.constant 6 : index
    %c0_170 = arith.constant 0 : index
    %c0_171 = arith.constant 0 : index
    %296 = vector.load %arg25[%c6_169, %c0_170, %c0_171] : memref<8x8x8xf32, #tpu.memory_space<vmem>>, vector<1x8x8xf32>
    %297 = vector.shape_cast %296 : vector<1x8x8xf32> to vector<8x8xf32>
    %298 = vector.shape_cast %295 : vector<8x8xf32> to vector<1x8x8xf32>
    tpu.vector_store %arg25[%c6_169, %c0_170, %c0_171], %298 {strides = array<i32>} : memref<8x8x8xf32, #tpu.memory_space<vmem>>, vector<1x8x8xf32>,
    %299 = vector.extract_strided_slice %263 {offsets = [1, 0, 24], sizes = [1, 8, 8], strides = [1, 1, 1]} : vector<2x8x32xf32> to vector<1x8x8xf32>
    %300 = vector.shape_cast %299 : vector<1x8x8xf32> to vector<8x8xf32>
    %c7_172 = arith.constant 7 : index
    %c0_173 = arith.constant 0 : index
    %c0_174 = arith.constant 0 : index
    %301 = vector.load %arg25[%c7_172, %c0_173, %c0_174] : memref<8x8x8xf32, #tpu.memory_space<vmem>>, vector<1x8x8xf32>
    %302 = vector.shape_cast %301 : vector<1x8x8xf32> to vector<8x8xf32>
    %303 = vector.shape_cast %300 : vector<8x8xf32> to vector<1x8x8xf32>
    tpu.vector_store %arg25[%c7_172, %c0_173, %c0_174], %303 {strides = array<i32>} : memref<8x8x8xf32, #tpu.memory_space<vmem>>, vector<1x8x8xf32>,
    %304 = vector.extract_strided_slice %9 {offsets = [0, 96], sizes = [16, 32], strides = [1, 1]} : vector<16x128xf32> to vector<16x32xf32>
    %305 = vector.shape_cast %304 : vector<16x32xf32> to vector<2x8x32xf32>
    %306 = vector.extract_strided_slice %305 {offsets = [0, 0, 0], sizes = [1, 8, 8], strides = [1, 1, 1]} : vector<2x8x32xf32> to vector<1x8x8xf32>
    %307 = vector.shape_cast %306 : vector<1x8x8xf32> to vector<8x8xf32>
    %c0_175 = arith.constant 0 : index
    %c0_176 = arith.constant 0 : index
    %c0_177 = arith.constant 0 : index
    %308 = vector.load %arg26[%c0_175, %c0_176, %c0_177] : memref<8x8x8xf32, #tpu.memory_space<vmem>>, vector<1x8x8xf32>
    %309 = vector.shape_cast %308 : vector<1x8x8xf32> to vector<8x8xf32>
    %310 = vector.shape_cast %307 : vector<8x8xf32> to vector<1x8x8xf32>
    tpu.vector_store %arg26[%c0_175, %c0_176, %c0_177], %310 {strides = array<i32>} : memref<8x8x8xf32, #tpu.memory_space<vmem>>, vector<1x8x8xf32>,
    %311 = vector.extract_strided_slice %305 {offsets = [0, 0, 8], sizes = [1, 8, 8], strides = [1, 1, 1]} : vector<2x8x32xf32> to vector<1x8x8xf32>
    %312 = vector.shape_cast %311 : vector<1x8x8xf32> to vector<8x8xf32>
    %c1_178 = arith.constant 1 : index
    %c0_179 = arith.constant 0 : index
    %c0_180 = arith.constant 0 : index
    %313 = vector.load %arg26[%c1_178, %c0_179, %c0_180] : memref<8x8x8xf32, #tpu.memory_space<vmem>>, vector<1x8x8xf32>
    %314 = vector.shape_cast %313 : vector<1x8x8xf32> to vector<8x8xf32>
    %315 = vector.shape_cast %312 : vector<8x8xf32> to vector<1x8x8xf32>
    tpu.vector_store %arg26[%c1_178, %c0_179, %c0_180], %315 {strides = array<i32>} : memref<8x8x8xf32, #tpu.memory_space<vmem>>, vector<1x8x8xf32>,
    %316 = vector.extract_strided_slice %305 {offsets = [0, 0, 16], sizes = [1, 8, 8], strides = [1, 1, 1]} : vector<2x8x32xf32> to vector<1x8x8xf32>
    %317 = vector.shape_cast %316 : vector<1x8x8xf32> to vector<8x8xf32>
    %c2_181 = arith.constant 2 : index
    %c0_182 = arith.constant 0 : index
    %c0_183 = arith.constant 0 : index
    %318 = vector.load %arg26[%c2_181, %c0_182, %c0_183] : memref<8x8x8xf32, #tpu.memory_space<vmem>>, vector<1x8x8xf32>
    %319 = vector.shape_cast %318 : vector<1x8x8xf32> to vector<8x8xf32>
    %320 = vector.shape_cast %317 : vector<8x8xf32> to vector<1x8x8xf32>
    tpu.vector_store %arg26[%c2_181, %c0_182, %c0_183], %320 {strides = array<i32>} : memref<8x8x8xf32, #tpu.memory_space<vmem>>, vector<1x8x8xf32>,
    %321 = vector.extract_strided_slice %305 {offsets = [0, 0, 24], sizes = [1, 8, 8], strides = [1, 1, 1]} : vector<2x8x32xf32> to vector<1x8x8xf32>
    %322 = vector.shape_cast %321 : vector<1x8x8xf32> to vector<8x8xf32>
    %c3_184 = arith.constant 3 : index
    %c0_185 = arith.constant 0 : index
    %c0_186 = arith.constant 0 : index
    %323 = vector.load %arg26[%c3_184, %c0_185, %c0_186] : memref<8x8x8xf32, #tpu.memory_space<vmem>>, vector<1x8x8xf32>
    %324 = vector.shape_cast %323 : vector<1x8x8xf32> to vector<8x8xf32>
    %325 = vector.shape_cast %322 : vector<8x8xf32> to vector<1x8x8xf32>
    tpu.vector_store %arg26[%c3_184, %c0_185, %c0_186], %325 {strides = array<i32>} : memref<8x8x8xf32, #tpu.memory_space<vmem>>, vector<1x8x8xf32>,
    %326 = vector.extract_strided_slice %305 {offsets = [1, 0, 0], sizes = [1, 8, 8], strides = [1, 1, 1]} : vector<2x8x32xf32> to vector<1x8x8xf32>
    %327 = vector.shape_cast %326 : vector<1x8x8xf32> to vector<8x8xf32>
    %c4_187 = arith.constant 4 : index
    %c0_188 = arith.constant 0 : index
    %c0_189 = arith.constant 0 : index
    %328 = vector.load %arg26[%c4_187, %c0_188, %c0_189] : memref<8x8x8xf32, #tpu.memory_space<vmem>>, vector<1x8x8xf32>
    %329 = vector.shape_cast %328 : vector<1x8x8xf32> to vector<8x8xf32>
    %330 = vector.shape_cast %327 : vector<8x8xf32> to vector<1x8x8xf32>
    tpu.vector_store %arg26[%c4_187, %c0_188, %c0_189], %330 {strides = array<i32>} : memref<8x8x8xf32, #tpu.memory_space<vmem>>, vector<1x8x8xf32>,
    %331 = vector.extract_strided_slice %305 {offsets = [1, 0, 8], sizes = [1, 8, 8], strides = [1, 1, 1]} : vector<2x8x32xf32> to vector<1x8x8xf32>
    %332 = vector.shape_cast %331 : vector<1x8x8xf32> to vector<8x8xf32>
    %c5_190 = arith.constant 5 : index
    %c0_191 = arith.constant 0 : index
    %c0_192 = arith.constant 0 : index
    %333 = vector.load %arg26[%c5_190, %c0_191, %c0_192] : memref<8x8x8xf32, #tpu.memory_space<vmem>>, vector<1x8x8xf32>
    %334 = vector.shape_cast %333 : vector<1x8x8xf32> to vector<8x8xf32>
    %335 = vector.shape_cast %332 : vector<8x8xf32> to vector<1x8x8xf32>
    tpu.vector_store %arg26[%c5_190, %c0_191, %c0_192], %335 {strides = array<i32>} : memref<8x8x8xf32, #tpu.memory_space<vmem>>, vector<1x8x8xf32>,
    %336 = vector.extract_strided_slice %305 {offsets = [1, 0, 16], sizes = [1, 8, 8], strides = [1, 1, 1]} : vector<2x8x32xf32> to vector<1x8x8xf32>
    %337 = vector.shape_cast %336 : vector<1x8x8xf32> to vector<8x8xf32>
    %c6_193 = arith.constant 6 : index
    %c0_194 = arith.constant 0 : index
    %c0_195 = arith.constant 0 : index
    %338 = vector.load %arg26[%c6_193, %c0_194, %c0_195] : memref<8x8x8xf32, #tpu.memory_space<vmem>>, vector<1x8x8xf32>
    %339 = vector.shape_cast %338 : vector<1x8x8xf32> to vector<8x8xf32>
    %340 = vector.shape_cast %337 : vector<8x8xf32> to vector<1x8x8xf32>
    tpu.vector_store %arg26[%c6_193, %c0_194, %c0_195], %340 {strides = array<i32>} : memref<8x8x8xf32, #tpu.memory_space<vmem>>, vector<1x8x8xf32>,
    %341 = vector.extract_strided_slice %305 {offsets = [1, 0, 24], sizes = [1, 8, 8], strides = [1, 1, 1]} : vector<2x8x32xf32> to vector<1x8x8xf32>
    %342 = vector.shape_cast %341 : vector<1x8x8xf32> to vector<8x8xf32>
    %c7_196 = arith.constant 7 : index
    %c0_197 = arith.constant 0 : index
    %c0_198 = arith.constant 0 : index
    %343 = vector.load %arg26[%c7_196, %c0_197, %c0_198] : memref<8x8x8xf32, #tpu.memory_space<vmem>>, vector<1x8x8xf32>
    %344 = vector.shape_cast %343 : vector<1x8x8xf32> to vector<8x8xf32>
    %345 = vector.shape_cast %342 : vector<8x8xf32> to vector<1x8x8xf32>
    tpu.vector_store %arg26[%c7_196, %c0_197, %c0_198], %345 {strides = array<i32>} : memref<8x8x8xf32, #tpu.memory_space<vmem>>, vector<1x8x8xf32>,
    %c0_199 = arith.constant 0 : index
    %c0_200 = arith.constant 0 : index
    %c0_201 = arith.constant 0 : index
    %346 = vector.load %arg24[%c0_199, %c0_200, %c0_201] : memref<8x8x8xf32, #tpu.memory_space<vmem>>, vector<8x8x8xf32>
    %347 = arith.truncf %346 : vector<8x8x8xf32> to vector<8x8x8xbf16>
    %c0_202 = arith.constant 0 : index
    %c0_203 = arith.constant 0 : index
    %c0_204 = arith.constant 0 : index
    %348 = vector.load %arg25[%c0_202, %c0_203, %c0_204] : memref<8x8x8xf32, #tpu.memory_space<vmem>>, vector<8x8x8xf32>
    %349 = arith.truncf %348 : vector<8x8x8xf32> to vector<8x8x8xbf16>
    %c0_205 = arith.constant 0 : index
    %c0_206 = arith.constant 0 : index
    %c0_207 = arith.constant 0 : index
    %350 = vector.load %arg26[%c0_205, %c0_206, %c0_207] : memref<8x8x8xf32, #tpu.memory_space<vmem>>, vector<8x8x8xf32>
    %351 = arith.truncf %350 : vector<8x8x8xf32> to vector<8x8x8xbf16>
    "tpu.trace_start"() <{level = 10 : i32, message = "gqd,gkd->gqk"}> : () -> ()
    %cst_208 = arith.constant dense<0.000000e+00> : vector<8x8x8xf32>
    %352 = tpu.matmul %347, %349, %cst_208 {dimension_numbers = #tpu.dot_dimension_numbers<[2], [2], [1], [1], [0, 0, 0, 1, 1, 1], [0], [0]>} : vector<8x8x8xbf16>, vector<8x8x8xbf16>, vector<8x8x8xf32> -> vector<8x8x8xf32>
    "tpu.trace_stop"() : () -> ()
    %cst_209 = arith.constant 0.353553385 : f32
    %353 = vector.broadcast %cst_209 : f32 to vector<8x8x8xf32>
    %354 = arith.mulf %352, %353 : vector<8x8x8xf32>
    %cst_210 = arith.constant dense<0xFF800000> : vector<8x8xf32>
    %355 = vector.multi_reduction <maximumf>, %354, %cst_210 [2] : vector<8x8x8xf32> to vector<8x8xf32>
    %356 = vector.shape_cast %355 : vector<8x8xf32> to vector<8x8x1xf32>
    %357 = vector.broadcast %356 : vector<8x8x1xf32> to vector<8x8x8xf32>
    %358 = arith.subf %354, %357 : vector<8x8x8xf32>
    %359 = math.exp %358 : vector<8x8x8xf32>
    %cst_211 = arith.constant dense<0.000000e+00> : vector<8x8xf32>
    %360 = vector.multi_reduction <add>, %359, %cst_211 [2] : vector<8x8x8xf32> to vector<8x8xf32>
    %361 = vector.shape_cast %360 : vector<8x8xf32> to vector<8x8x1xf32>
    %362 = arith.truncf %359 : vector<8x8x8xf32> to vector<8x8x8xbf16>
    "tpu.trace_start"() <{level = 10 : i32, message = "gqk,gkd->gqd"}> : () -> ()
    %cst_212 = arith.constant dense<0.000000e+00> : vector<8x8x8xf32>
    %363 = tpu.matmul %362, %351, %cst_212 {dimension_numbers = #tpu.dot_dimension_numbers<[2], [1], [1], [2], [0, 0, 0, 1, 1, 2], [0], [0]>} : vector<8x8x8xbf16>, vector<8x8x8xbf16>, vector<8x8x8xf32> -> vector<8x8x8xf32>
    "tpu.trace_stop"() : () -> ()
    %364 = vector.broadcast %361 : vector<8x8x1xf32> to vector<8x8x8xf32>
    %365 = arith.divf %363, %364 : vector<8x8x8xf32>
    %366 = vector.extract_strided_slice %365 {offsets = [0, 0, 0], sizes = [1, 8, 8], strides = [1, 1, 1]} : vector<8x8x8xf32> to vector<1x8x8xf32>
    %367 = vector.shape_cast %366 : vector<1x8x8xf32> to vector<8x8xf32>
    %c0_213 = arith.constant 0 : index
    %c0_214 = arith.constant 0 : index
    %368 = vector.load %arg27[%c0_213, %c0_214] : memref<16x32xf32, #tpu.memory_space<vmem>>, vector<8x8xf32>
    tpu.vector_store %arg27[%c0_213, %c0_214], %367 {strides = array<i32>} : memref<16x32xf32, #tpu.memory_space<vmem>>, vector<8x8xf32>,
    %369 = vector.extract_strided_slice %365 {offsets = [1, 0, 0], sizes = [1, 8, 8], strides = [1, 1, 1]} : vector<8x8x8xf32> to vector<1x8x8xf32>
    %370 = vector.shape_cast %369 : vector<1x8x8xf32> to vector<8x8xf32>
    %c0_215 = arith.constant 0 : index
    %c8_216 = arith.constant 8 : index
    %371 = vector.load %arg27[%c0_215, %c8_216] : memref<16x32xf32, #tpu.memory_space<vmem>>, vector<8x8xf32>
    tpu.vector_store %arg27[%c0_215, %c8_216], %370 {strides = array<i32>} : memref<16x32xf32, #tpu.memory_space<vmem>>, vector<8x8xf32>,
    %372 = vector.extract_strided_slice %365 {offsets = [2, 0, 0], sizes = [1, 8, 8], strides = [1, 1, 1]} : vector<8x8x8xf32> to vector<1x8x8xf32>
    %373 = vector.shape_cast %372 : vector<1x8x8xf32> to vector<8x8xf32>
    %c0_217 = arith.constant 0 : index
    %c16_218 = arith.constant 16 : index
    %374 = vector.load %arg27[%c0_217, %c16_218] : memref<16x32xf32, #tpu.memory_space<vmem>>, vector<8x8xf32>
    tpu.vector_store %arg27[%c0_217, %c16_218], %373 {strides = array<i32>} : memref<16x32xf32, #tpu.memory_space<vmem>>, vector<8x8xf32>,
    %375 = vector.extract_strided_slice %365 {offsets = [3, 0, 0], sizes = [1, 8, 8], strides = [1, 1, 1]} : vector<8x8x8xf32> to vector<1x8x8xf32>
    %376 = vector.shape_cast %375 : vector<1x8x8xf32> to vector<8x8xf32>
    %c0_219 = arith.constant 0 : index
    %c24_220 = arith.constant 24 : index
    %377 = vector.load %arg27[%c0_219, %c24_220] : memref<16x32xf32, #tpu.memory_space<vmem>>, vector<8x8xf32>
    tpu.vector_store %arg27[%c0_219, %c24_220], %376 {strides = array<i32>} : memref<16x32xf32, #tpu.memory_space<vmem>>, vector<8x8xf32>,
    %378 = vector.extract_strided_slice %365 {offsets = [4, 0, 0], sizes = [1, 8, 8], strides = [1, 1, 1]} : vector<8x8x8xf32> to vector<1x8x8xf32>
    %379 = vector.shape_cast %378 : vector<1x8x8xf32> to vector<8x8xf32>
    %c8_221 = arith.constant 8 : index
    %c0_222 = arith.constant 0 : index
    %380 = vector.load %arg27[%c8_221, %c0_222] : memref<16x32xf32, #tpu.memory_space<vmem>>, vector<8x8xf32>
    tpu.vector_store %arg27[%c8_221, %c0_222], %379 {strides = array<i32>} : memref<16x32xf32, #tpu.memory_space<vmem>>, vector<8x8xf32>,
    %381 = vector.extract_strided_slice %365 {offsets = [5, 0, 0], sizes = [1, 8, 8], strides = [1, 1, 1]} : vector<8x8x8xf32> to vector<1x8x8xf32>
    %382 = vector.shape_cast %381 : vector<1x8x8xf32> to vector<8x8xf32>
    %c8_223 = arith.constant 8 : index
    %c8_224 = arith.constant 8 : index
    %383 = vector.load %arg27[%c8_223, %c8_224] : memref<16x32xf32, #tpu.memory_space<vmem>>, vector<8x8xf32>
    tpu.vector_store %arg27[%c8_223, %c8_224], %382 {strides = array<i32>} : memref<16x32xf32, #tpu.memory_space<vmem>>, vector<8x8xf32>,
    %384 = vector.extract_strided_slice %365 {offsets = [6, 0, 0], sizes = [1, 8, 8], strides = [1, 1, 1]} : vector<8x8x8xf32> to vector<1x8x8xf32>
    %385 = vector.shape_cast %384 : vector<1x8x8xf32> to vector<8x8xf32>
    %c8_225 = arith.constant 8 : index
    %c16_226 = arith.constant 16 : index
    %386 = vector.load %arg27[%c8_225, %c16_226] : memref<16x32xf32, #tpu.memory_space<vmem>>, vector<8x8xf32>
    tpu.vector_store %arg27[%c8_225, %c16_226], %385 {strides = array<i32>} : memref<16x32xf32, #tpu.memory_space<vmem>>, vector<8x8xf32>,
    %387 = vector.extract_strided_slice %365 {offsets = [7, 0, 0], sizes = [1, 8, 8], strides = [1, 1, 1]} : vector<8x8x8xf32> to vector<1x8x8xf32>
    %388 = vector.shape_cast %387 : vector<1x8x8xf32> to vector<8x8xf32>
    %c8_227 = arith.constant 8 : index
    %c24_228 = arith.constant 24 : index
    %389 = vector.load %arg27[%c8_227, %c24_228] : memref<16x32xf32, #tpu.memory_space<vmem>>, vector<8x8xf32>
    tpu.vector_store %arg27[%c8_227, %c24_228], %388 {strides = array<i32>} : memref<16x32xf32, #tpu.memory_space<vmem>>, vector<8x8xf32>,
    %c0_229 = arith.constant 0 : index
    %c0_230 = arith.constant 0 : index
    %390 = vector.load %arg27[%c0_229, %c0_230] : memref<16x32xf32, #tpu.memory_space<vmem>>, vector<16x32xf32>
    %391 = arith.truncf %390 : vector<16x32xf32> to vector<16x32xbf16>
    %c0_231 = arith.constant 0 : index
    %c0_232 = arith.constant 0 : index
    %392 = vector.load %arg11[%c0_231, %c0_232] : memref<32x32xbf16, #tpu.memory_space<vmem>>, vector<32x32xbf16>
    %cst_233 = arith.constant dense<0.000000e+00> : vector<16x32xf32>
    %393 = tpu.matmul %391, %392, %cst_233 {dimension_numbers = #tpu.dot_dimension_numbers<[1], [0], [0], [1], [0, 0, 1, 1], [], []>} : vector<16x32xbf16>, vector<32x32xbf16>, vector<16x32xf32> -> vector<16x32xf32>
    %c0_234 = arith.constant 0 : index
    %c0_235 = arith.constant 0 : index
    %394 = vector.load %arg12[%c0_234, %c0_235] : memref<1x32xf32, #tpu.memory_space<vmem>>, vector<1x32xf32>
    %395 = vector.broadcast %394 : vector<1x32xf32> to vector<16x32xf32>
    %396 = arith.addf %393, %395 : vector<16x32xf32>
    %397 = arith.addf %3, %396 : vector<16x32xf32>
    %c0_236 = arith.constant 0 : index
    %c0_237 = arith.constant 0 : index
    %398 = vector.load %arg13[%c0_236, %c0_237] : memref<1x32xf32, #tpu.memory_space<vmem>>, vector<1x32xf32>
    %c0_238 = arith.constant 0 : index
    %c0_239 = arith.constant 0 : index
    %399 = vector.load %arg14[%c0_238, %c0_239] : memref<1x32xf32, #tpu.memory_space<vmem>>, vector<1x32xf32>
    %cst_240 = arith.constant dense<0.000000e+00> : vector<16xf32>
    %400 = vector.multi_reduction <add>, %397, %cst_240 [1] : vector<16x32xf32> to vector<16xf32>
    %401 = vector.shape_cast %400 : vector<16xf32> to vector<16x1xf32>
    %cst_241 = arith.constant 3.200000e+01 : f32
    %402 = vector.broadcast %cst_241 : f32 to vector<16x1xf32>
    %403 = arith.divf %401, %402 : vector<16x1xf32>
    %404 = vector.broadcast %403 : vector<16x1xf32> to vector<16x32xf32>
    %405 = arith.subf %397, %404 : vector<16x32xf32>
    %406 = arith.mulf %405, %405 : vector<16x32xf32>
    %cst_242 = arith.constant dense<0.000000e+00> : vector<16xf32>
    %407 = vector.multi_reduction <add>, %406, %cst_242 [1] : vector<16x32xf32> to vector<16xf32>
    %408 = vector.shape_cast %407 : vector<16xf32> to vector<16x1xf32>
    %cst_243 = arith.constant 3.200000e+01 : f32
    %409 = vector.broadcast %cst_243 : f32 to vector<16x1xf32>
    %410 = arith.divf %408, %409 : vector<16x1xf32>
    %cst_244 = arith.constant 9.99999974E-6 : f32
    %411 = vector.broadcast %cst_244 : f32 to vector<16x1xf32>
    %412 = arith.addf %410, %411 : vector<16x1xf32>
    %413 = math.rsqrt %412 : vector<16x1xf32>
    %414 = vector.broadcast %413 : vector<16x1xf32> to vector<16x32xf32>
    %415 = arith.mulf %405, %414 : vector<16x32xf32>
    %416 = vector.broadcast %398 : vector<1x32xf32> to vector<16x32xf32>
    %417 = arith.mulf %415, %416 : vector<16x32xf32>
    %418 = vector.broadcast %399 : vector<1x32xf32> to vector<16x32xf32>
    %419 = arith.addf %417, %418 : vector<16x32xf32>
    %420 = arith.truncf %419 : vector<16x32xf32> to vector<16x32xbf16>
    %c0_245 = arith.constant 0 : index
    %c0_246 = arith.constant 0 : index
    %421 = vector.load %arg17[%c0_245, %c0_246] : memref<32x64xbf16, #tpu.memory_space<vmem>>, vector<32x64xbf16>
    %cst_247 = arith.constant dense<0.000000e+00> : vector<16x64xf32>
    %422 = tpu.matmul %420, %421, %cst_247 {dimension_numbers = #tpu.dot_dimension_numbers<[1], [0], [0], [1], [0, 0, 1, 1], [], []>} : vector<16x32xbf16>, vector<32x64xbf16>, vector<16x64xf32> -> vector<16x64xf32>
    %c0_248 = arith.constant 0 : index
    %c0_249 = arith.constant 0 : index
    %423 = vector.load %arg18[%c0_248, %c0_249] : memref<1x64xf32, #tpu.memory_space<vmem>>, vector<1x64xf32>
    %424 = vector.broadcast %423 : vector<1x64xf32> to vector<16x64xf32>
    %425 = arith.addf %422, %424 : vector<16x64xf32>
    %cst_250 = arith.constant 0.000000e+00 : f32
    %426 = vector.broadcast %cst_250 : f32 to vector<16x64xf32>
    %427 = arith.maximumf %425, %426 : vector<16x64xf32>
    %428 = arith.truncf %427 : vector<16x64xf32> to vector<16x64xbf16>
    %c0_251 = arith.constant 0 : index
    %c0_252 = arith.constant 0 : index
    %429 = vector.load %arg19[%c0_251, %c0_252] : memref<64x32xbf16, #tpu.memory_space<vmem>>, vector<64x32xbf16>
    %cst_253 = arith.constant dense<0.000000e+00> : vector<16x32xf32>
    %430 = tpu.matmul %428, %429, %cst_253 {dimension_numbers = #tpu.dot_dimension_numbers<[1], [0], [0], [1], [0, 0, 1, 1], [], []>} : vector<16x64xbf16>, vector<64x32xbf16>, vector<16x32xf32> -> vector<16x32xf32>
    %c0_254 = arith.constant 0 : index
    %c0_255 = arith.constant 0 : index
    %431 = vector.load %arg20[%c0_254, %c0_255] : memref<1x32xf32, #tpu.memory_space<vmem>>, vector<1x32xf32>
    %432 = vector.broadcast %431 : vector<1x32xf32> to vector<16x32xf32>
    %433 = arith.addf %430, %432 : vector<16x32xf32>
    %434 = arith.addf %419, %433 : vector<16x32xf32>
    %c0_256 = arith.constant 0 : index
    %c0_257 = arith.constant 0 : index
    %435 = vector.load %arg21[%c0_256, %c0_257] : memref<1x32xf32, #tpu.memory_space<vmem>>, vector<1x32xf32>
    %c0_258 = arith.constant 0 : index
    %c0_259 = arith.constant 0 : index
    %436 = vector.load %arg22[%c0_258, %c0_259] : memref<1x32xf32, #tpu.memory_space<vmem>>, vector<1x32xf32>
    %cst_260 = arith.constant dense<0.000000e+00> : vector<16xf32>
    %437 = vector.multi_reduction <add>, %434, %cst_260 [1] : vector<16x32xf32> to vector<16xf32>
    %438 = vector.shape_cast %437 : vector<16xf32> to vector<16x1xf32>
    %cst_261 = arith.constant 3.200000e+01 : f32
    %439 = vector.broadcast %cst_261 : f32 to vector<16x1xf32>
    %440 = arith.divf %438, %439 : vector<16x1xf32>
    %441 = vector.broadcast %440 : vector<16x1xf32> to vector<16x32xf32>
    %442 = arith.subf %434, %441 : vector<16x32xf32>
    %443 = arith.mulf %442, %442 : vector<16x32xf32>
    %cst_262 = arith.constant dense<0.000000e+00> : vector<16xf32>
    %444 = vector.multi_reduction <add>, %443, %cst_262 [1] : vector<16x32xf32> to vector<16xf32>
    %445 = vector.shape_cast %444 : vector<16xf32> to vector<16x1xf32>
    %cst_263 = arith.constant 3.200000e+01 : f32
    %446 = vector.broadcast %cst_263 : f32 to vector<16x1xf32>
    %447 = arith.divf %445, %446 : vector<16x1xf32>
    %cst_264 = arith.constant 9.99999974E-6 : f32
    %448 = vector.broadcast %cst_264 : f32 to vector<16x1xf32>
    %449 = arith.addf %447, %448 : vector<16x1xf32>
    %450 = math.rsqrt %449 : vector<16x1xf32>
    %451 = vector.broadcast %450 : vector<16x1xf32> to vector<16x32xf32>
    %452 = arith.mulf %442, %451 : vector<16x32xf32>
    %453 = vector.broadcast %435 : vector<1x32xf32> to vector<16x32xf32>
    %454 = arith.mulf %452, %453 : vector<16x32xf32>
    %455 = vector.broadcast %436 : vector<1x32xf32> to vector<16x32xf32>
    %456 = arith.addf %454, %455 : vector<16x32xf32>
    %457 = vector.shape_cast %456 : vector<16x32xf32> to vector<2x8x32xf32>
    %c0_265 = arith.constant 0 : index
    %c0_266 = arith.constant 0 : index
    %c0_267 = arith.constant 0 : index
    %458 = vector.load %arg23[%c0_265, %c0_266, %c0_267] : memref<2x8x32xf32, #tpu.memory_space<vmem>>, vector<2x8x32xf32>
    tpu.vector_store %arg23[%c0_265, %c0_266, %c0_267], %457 {strides = array<i32>} : memref<2x8x32xf32, #tpu.memory_space<vmem>>, vector<2x8x32xf32>,
    return
  }
  func.func @transform_0(%arg0: i32) -> (i32, i32, i32) {
    %c0_i32 = arith.constant 0 : i32
    %c0_i32_0 = arith.constant 0 : i32
    %c0_i32_1 = arith.constant 0 : i32
    return %arg0, %c0_i32, %c0_i32_0 : i32, i32, i32
  }
  func.func @transform_1(%arg0: i32) -> (i32, i32, i32) {
    %c0_i32 = arith.constant 0 : i32
    %c0_i32_0 = arith.constant 0 : i32
    %c0_i32_1 = arith.constant 0 : i32
    return %arg0, %c0_i32, %c0_i32_0 : i32, i32, i32
  }
  func.func @transform_2(%arg0: i32) -> (i32, i32) {
    %c0_i32 = arith.constant 0 : i32
    %c0_i32_0 = arith.constant 0 : i32
    %c0_i32_1 = arith.constant 0 : i32
    return %c0_i32, %c0_i32_0 : i32, i32
  }
  func.func @transform_3(%arg0: i32) -> (i32, i32) {
    %c0_i32 = arith.constant 0 : i32
    %c0_i32_0 = arith.constant 0 : i32
    %c0_i32_1 = arith.constant 0 : i32
    return %c0_i32, %c0_i32_0 : i32, i32
  }
  func.func @transform_4(%arg0: i32) -> (i32, i32) {
    %c0_i32 = arith.constant 0 : i32
    %c0_i32_0 = arith.constant 0 : i32
    %c0_i32_1 = arith.constant 0 : i32
    return %c0_i32, %c0_i32_0 : i32, i32
  }
  func.func @transform_5(%arg0: i32) -> (i32, i32) {
    %c0_i32 = arith.constant 0 : i32
    %c0_i32_0 = arith.constant 0 : i32
    %c0_i32_1 = arith.constant 0 : i32
    return %c0_i32, %c0_i32_0 : i32, i32
  }
  func.func @transform_6(%arg0: i32) -> (i32, i32) {
    %c0_i32 = arith.constant 0 : i32
    %c0_i32_0 = arith.constant 0 : i32
    %c0_i32_1 = arith.constant 0 : i32
    return %c0_i32, %c0_i32_0 : i32, i32
  }
  func.func @transform_7(%arg0: i32) -> (i32, i32) {
    %c0_i32 = arith.constant 0 : i32
    %c0_i32_0 = arith.constant 0 : i32
    %c0_i32_1 = arith.constant 0 : i32
    return %c0_i32, %c0_i32_0 : i32, i32
  }
  func.func @transform_8(%arg0: i32) -> (i32, i32) {
    %c0_i32 = arith.constant 0 : i32
    %c0_i32_0 = arith.constant 0 : i32
    %c0_i32_1 = arith.constant 0 : i32
    return %c0_i32, %c0_i32_0 : i32, i32
  }
  func.func @transform_9(%arg0: i32) -> (i32, i32) {
    %c0_i32 = arith.constant 0 : i32
    %c0_i32_0 = arith.constant 0 : i32
    %c0_i32_1 = arith.constant 0 : i32
    return %c0_i32, %c0_i32_0 : i32, i32
  }
  func.func @transform_10(%arg0: i32) -> (i32, i32) {
    %c0_i32 = arith.constant 0 : i32
    %c0_i32_0 = arith.constant 0 : i32
    %c0_i32_1 = arith.constant 0 : i32
    return %c0_i32, %c0_i32_0 : i32, i32
  }
  func.func @transform_11(%arg0: i32) -> (i32, i32) {
    %c0_i32 = arith.constant 0 : i32
    %c0_i32_0 = arith.constant 0 : i32
    %c0_i32_1 = arith.constant 0 : i32
    return %c0_i32, %c0_i32_0 : i32, i32
  }
  func.func @transform_12(%arg0: i32) -> (i32, i32) {
    %c0_i32 = arith.constant 0 : i32
    %c0_i32_0 = arith.constant 0 : i32
    %c0_i32_1 = arith.constant 0 : i32
    return %c0_i32, %c0_i32_0 : i32, i32
  }
  func.func @transform_13(%arg0: i32) -> (i32, i32) {
    %c0_i32 = arith.constant 0 : i32
    %c0_i32_0 = arith.constant 0 : i32
    %c0_i32_1 = arith.constant 0 : i32
    return %c0_i32, %c0_i32_0 : i32, i32
  }
  func.func @transform_14(%arg0: i32) -> (i32, i32) {
    %c0_i32 = arith.constant 0 : i32
    %c0_i32_0 = arith.constant 0 : i32
    %c0_i32_1 = arith.constant 0 : i32
    return %c0_i32, %c0_i32_0 : i32, i32
  }
  func.func @transform_15(%arg0: i32) -> (i32, i32) {
    %c0_i32 = arith.constant 0 : i32
    %c0_i32_0 = arith.constant 0 : i32
    %c0_i32_1 = arith.constant 0 : i32
    return %c0_i32, %c0_i32_0 : i32, i32
  }
  func.func @transform_16(%arg0: i32) -> (i32, i32) {
    %c0_i32 = arith.constant 0 : i32
    %c0_i32_0 = arith.constant 0 : i32
    %c0_i32_1 = arith.constant 0 : i32
    return %c0_i32, %c0_i32_0 : i32, i32
  }
  func.func @transform_17(%arg0: i32) -> (i32, i32) {
    %c0_i32 = arith.constant 0 : i32
    %c0_i32_0 = arith.constant 0 : i32
    %c0_i32_1 = arith.constant 0 : i32
    return %c0_i32, %c0_i32_0 : i32, i32
  }
  func.func @transform_18(%arg0: i32) -> (i32, i32) {
    %c0_i32 = arith.constant 0 : i32
    %c0_i32_0 = arith.constant 0 : i32
    %c0_i32_1 = arith.constant 0 : i32
    return %c0_i32, %c0_i32_0 : i32, i32
  }
  func.func @transform_19(%arg0: i32) -> (i32, i32) {
    %c0_i32 = arith.constant 0 : i32
    %c0_i32_0 = arith.constant 0 : i32
    %c0_i32_1 = arith.constant 0 : i32
    return %c0_i32, %c0_i32_0 : i32, i32
  }
  func.func @transform_20(%arg0: i32) -> (i32, i32) {
    %c0_i32 = arith.constant 0 : i32
    %c0_i32_0 = arith.constant 0 : i32
    %c0_i32_1 = arith.constant 0 : i32
    return %c0_i32, %c0_i32_0 : i32, i32
  }
  func.func @transform_21(%arg0: i32) -> (i32, i32) {
    %c0_i32 = arith.constant 0 : i32
    %c0_i32_0 = arith.constant 0 : i32
    %c0_i32_1 = arith.constant 0 : i32
    return %c0_i32, %c0_i32_0 : i32, i32
  }
  func.func @transform_22(%arg0: i32) -> (i32, i32, i32) {
    %c0_i32 = arith.constant 0 : i32
    %c0_i32_0 = arith.constant 0 : i32
    %c0_i32_1 = arith.constant 0 : i32
    return %arg0, %c0_i32, %c0_i32_0 : i32, i32, i32
  }
}

</mosaic_0001>

<bundles_post_ra>
// kernel: tpu_custom_call.1
= control target key start
LH: loop header
LB: loop body
LE: loop exit
PB: predicated region body
PF: predicated region fallthrough
CT: control target
= control target key end

     0   :  { %s4490_s0 = inlined_call_operand.vmem [shape: f32[2,8,32], index: 0, kind: input, shape index: {}]   ;;  %s4491_s1 = inlined_call_operand.vmem [shape: f32[2,8,32], index: 1, kind: input, shape index: {}]   ;;  %s4492_s2 = inlined_call_operand.vmem [shape: bf16[32,32], index: 2, kind: input, shape index: {}]   ;;  %s4493_s3 = inlined_call_operand.vmem [shape: f32[1,32], index: 3, kind: input, shape index: {}]   ;;  %s4494_s4 = inlined_call_operand.hbm [shape: bf16[32,32], index: 4, kind: input, shape index: {}]   ;;  %s4495_s5 = inlined_call_operand.hbm [shape: f32[1,32], index: 5, kind: input, shape index: {}]   ;;  %s4496_s6 = inlined_call_operand.hbm [shape: f32[1,32], index: 6, kind: input, shape index: {}]   ;;  %s4497_s7 = inlined_call_operand.hbm [shape: f32[1,32], index: 7, kind: input, shape index: {}]   ;;  %s4498_s8 = inlined_call_operand.hbm [shape: bf16[32,32], index: 8, kind: input, shape index: {}]   ;;  %s4499_s9 = inlined_call_operand.hbm [shape: f32[1,32], index: 9, kind: input, shape index: {}]   ;;  %s4500_s10 = inlined_call_operand.vmem [shape: bf16[32,32], index: 10, kind: input, shape index: {}]   ;;  %s4501_s11 = inlined_call_operand.hbm [shape: f32[1,32], index: 11, kind: input, shape index: {}]   ;;  %s4502_s12 = inlined_call_operand.hbm [shape: f32[1,32], index: 12, kind: input, shape index: {}]   ;;  %s4503_s13 = inlined_call_operand.hbm [shape: f32[1,32], index: 13, kind: input, shape index: {}]   ;;  %s4504_s14 = inlined_call_operand.vmem [shape: bf16[32,128], index: 14, kind: input, shape index: {}]   ;;  %s4505_s15 = inlined_call_operand.vmem [shape: f32[1,128], index: 15, kind: input, shape index: {}]   ;;  %s4506_s16 = inlined_call_operand.hbm [shape: bf16[32,64], index: 16, kind: input, shape index: {}]   ;;  %s4507_s17 = inlined_call_operand.vmem [shape: f32[1,64], index: 17, kind: input, shape index: {}]   ;;  %s4508_s18 = inlined_call_operand.vmem [shape: bf16[64,32], index: 18, kind: input, shape index: {}]   ;;  %s4509_s19 = inlined_call_operand.vmem [shape: f32[1,32], index: 19, kind: input, shape index: {}]   ;;  %s4510_s20 = inlined_call_operand.vmem [shape: f32[1,32], index: 20, kind: input, shape index: {}]   ;;  %s4511_s21 = inlined_call_operand.vmem [shape: f32[1,32], index: 21, kind: input, shape index: {}]   ;;  %s4512_s22 = inlined_call_operand.hbm [shape: f32[2,8,32], index: 22, kind: output, shape index: {}]  }
   0x1   :  { %4519 = sst [smem:[#allocation31_spill]] %s4490_s0 }
   0x2   :  { %4520 = sst [smem:[#allocation32_spill]] %s4491_s1 }
   0x3   :  { %4521 = sst [smem:[#allocation33_spill]] %s4492_s2 }
   0x4   :  { %4522 = sst [smem:[#allocation34_spill]] %s4493_s3 }
   0x5   :  { %4523 = sst [smem:[#allocation35_spill]] %s4494_s4 }
   0x6   :  { %4524 = sst [smem:[#allocation36_spill]] %s4495_s5 }
   0x7   :  { %4525 = sst [smem:[#allocation37_spill]] %s4496_s6 }
   0x8   :  { %27 = vsyncpa [#allocation7], 0 }
   0x9   :  { %28 = vsyncpa [#allocation10], 0 }
   0xa   :  { %29 = vsyncpa [#allocation13], 0 }
   0xb   :  { %30 = vsyncpa [#allocation16], 0 }
   0xc   :  { %31 = vsyncpa [#allocation19], 0 }
   0xd   :  { %32 = vsyncpa [#allocation22], 0 }
   0xe   :  { %33 = vsyncpa [#allocation8], 0  ;;  %s3695_s3 = smov [#allocation9]   ;;  %s3696_s29 = smov [#allocation12]  }
   0xf   :  { %s60_s28 = sshll.u32 %s3695_s3, 4  ;;  %s80_s30 = sshll.u32 %s3696_s29, 4  ;;  %s61_s28 = int_to_ptr.vmem [resolvable:$true] %s60_s28  ;;  %s81_s30 = int_to_ptr.vmem [resolvable:$true] %s80_s30 }
  0x10   :  { %s4526_s23 = sld [smem:[#allocation36_spill]] }
  0x16   :  { %s3439_s1 = scalar_lea.hbm %s4526_s23, 16 }
  0x17   :  { %p3440_p0 = scmp.ne.s32.totalorder %s4526_s23, %s3439_s1  ;;  %p3443_p1 = scmp.lt.u32.totalorder %s3439_s1, %s4526_s23 }
  0x19   :  { %p3445_p2 = pnand %p3443_p1, %p3440_p0 }
  0x1b   :  { %3448 = shalt.err (!%p3445_p2)
}
  0x1c   :  { %s3449_s26 = scalar_lea.vmem %s61_s28, 16  ;;  %s3453_s2 = scalar_lea.vmem %s61_s28, 32 }
  0x1d   :  { %p3450_p3 = scmp.ne.s32.totalorder %s61_s28, %s3449_s26  ;;  %p3454_p4 = scmp.lt.s32.totalorder %s61_s28, %s61_s28 }
  0x1e   :  { %p3455_p5 = scmp.lt.s32.totalorder %s3453_s2, %s3449_s26 }
  0x20   :  { %p3456_p6 = por %p3455_p5, %p3454_p4 }
  0x22   :  { %p3457_p7 = pnand %p3456_p6, %p3450_p3 }
  0x24   :  { %3460 = shalt.err (!%p3457_p7)
}
  0x25   :  { %63 = dma.hbm_to_vmem [thread:$0]  %s4526_s23, 16, %s61_s28, [#allocation10]  }
  0x26   :  { %s3461_s0 = scalar_lea.hbm %s4497_s7, 16 }
  0x27   :  { %p3462_p8 = scmp.ne.s32.totalorder %s4497_s7, %s3461_s0  ;;  %p3465_p9 = scmp.lt.u32.totalorder %s3461_s0, %s4497_s7 }
  0x29   :  { %p3467_p10 = pnand %p3465_p9, %p3462_p8 }
  0x2b   :  { %3470 = shalt.err (!%p3467_p10)
}
  0x2c   :  { %s3471_s25 = scalar_lea.vmem %s81_s30, 16  ;;  %s3475_s26 = scalar_lea.vmem %s81_s30, 32 }
  0x2d   :  { %p3472_p11 = scmp.ne.s32.totalorder %s81_s30, %s3471_s25  ;;  %p3476_p12 = scmp.lt.s32.totalorder %s81_s30, %s81_s30 }
  0x2e   :  { %p3477_p13 = scmp.lt.s32.totalorder %s3475_s26, %s3471_s25 }
  0x30   :  { %p3478_p0 = por %p3477_p13, %p3476_p12 }
  0x32   :  { %p3479_p1 = pnand %p3478_p0, %p3472_p11 }
  0x34   :  { %3482 = shalt.err (!%p3479_p1)
}
  0x35   :  { %83 = dma.hbm_to_vmem [thread:$0]  %s4497_s7, 16, %s81_s30, [#allocation13]  }
  0x36   :  { %s3697_s2 = smov [#allocation15]   ;;  %s3698_s3 = smov [#allocation18]  }
  0x37   :  { %s102_s27 = sshll.u32 %s3697_s2, 4  ;;  %s124_s29 = sshll.u32 %s3698_s3, 4  ;;  %s103_s27 = int_to_ptr.vmem [resolvable:$true] %s102_s27  ;;  %s125_s29 = int_to_ptr.vmem [resolvable:$true] %s124_s29 }
  0x38   :  { %s3483_s5 = scalar_lea.hbm %s4499_s9, 16 }
  0x39   :  { %p3484_p2 = scmp.ne.s32.totalorder %s4499_s9, %s3483_s5  ;;  %p3487_p3 = scmp.lt.u32.totalorder %s3483_s5, %s4499_s9 }
  0x3b   :  { %p3489_p4 = pnand %p3487_p3, %p3484_p2 }
  0x3d   :  { %3492 = shalt.err (!%p3489_p4)
}
  0x3e   :  { %s3493_s7 = scalar_lea.vmem %s103_s27, 16  ;;  %s3497_s30 = scalar_lea.vmem %s103_s27, 32 }
  0x3f   :  { %p3494_p5 = scmp.ne.s32.totalorder %s103_s27, %s3493_s7  ;;  %p3498_p6 = scmp.lt.s32.totalorder %s103_s27, %s103_s27 }
  0x40   :  { %p3499_p7 = scmp.lt.s32.totalorder %s3497_s30, %s3493_s7 }
  0x42   :  { %p3500_p8 = por %p3499_p7, %p3498_p6 }
  0x44   :  { %p3501_p9 = pnand %p3500_p8, %p3494_p5 }
  0x46   :  { %3504 = shalt.err (!%p3501_p9)
}
  0x47   :  { %105 = dma.hbm_to_vmem [thread:$0]  %s4499_s9, 16, %s103_s27, [#allocation16]  }
  0x48   :  { %s3505_s3 = scalar_lea.hbm %s4502_s12, 16 }
  0x49   :  { %p3506_p10 = scmp.ne.s32.totalorder %s4502_s12, %s3505_s3  ;;  %p3509_p11 = scmp.lt.u32.totalorder %s3505_s3, %s4502_s12 }
  0x4b   :  { %p3511_p12 = pnand %p3509_p11, %p3506_p10 }
  0x4d   :  { %3514 = shalt.err (!%p3511_p12)
}
  0x4e   :  { %s3515_s24 = scalar_lea.vmem %s125_s29, 16  ;;  %s3519_s6 = scalar_lea.vmem %s125_s29, 32 }
  0x4f   :  { %p3516_p13 = scmp.ne.s32.totalorder %s125_s29, %s3515_s24  ;;  %p3520_p0 = scmp.lt.s32.totalorder %s125_s29, %s125_s29 }
  0x50   :  { %p3521_p1 = scmp.lt.s32.totalorder %s3519_s6, %s3515_s24 }
  0x52   :  { %p3522_p2 = por %p3521_p1, %p3520_p0 }
  0x54   :  { %p3523_p3 = pnand %p3522_p2, %p3516_p13 }
  0x56   :  { %3526 = shalt.err (!%p3523_p3)
}
  0x57   :  { %127 = dma.hbm_to_vmem [thread:$0]  %s4502_s12, 16, %s125_s29, [#allocation19]  }
  0x58   :  { %s3699_s25 = smov [#allocation6]   ;;  %s4527_s28 = sld [smem:[#allocation35_spill]] }
  0x59   :  { %s47_s7 = sshll.u32 %s3699_s25, 4  ;;  %s48_s7 = int_to_ptr.vmem [resolvable:$true] %s47_s7 }
  0x5e   :  { %s3527_s23 = scalar_lea.hbm %s4527_s28, 256 }
  0x5f   :  { %p3528_p4 = scmp.ne.s32.totalorder %s4527_s28, %s3527_s23  ;;  %p3531_p5 = scmp.lt.u32.totalorder %s3527_s23, %s4527_s28 }
  0x61   :  { %p3533_p6 = pnand %p3531_p5, %p3528_p4 }
  0x63   :  { %3536 = shalt.err (!%p3533_p6)
}
  0x64   :  { %s3537_s5 = scalar_lea.vmem %s48_s7, 256  ;;  %p3542_p8 = scmp.lt.s32.totalorder %s48_s7, %s48_s7 }
  0x65   :  { %p3538_p7 = scmp.ne.s32.totalorder %s48_s7, %s3537_s5  ;;  %p3543_p9 = scmp.lt.s32.totalorder %s3537_s5, %s3537_s5 }
  0x67   :  { %p3544_p10 = por %p3543_p9, %p3542_p8 }
  0x69   :  { %p3545_p11 = pnand %p3544_p10, %p3538_p7 }
  0x6b   :  { %3548 = shalt.err (!%p3545_p11)
}
  0x6c   :  { %s3700_s12 = smov 64   ;;  %s3701_s29 = smov 4  }
  0x6d   :  { %53 = dma.hbm_to_vmem [thread:$0]  %s4527_s28, 256, %s48_s7, [#allocation7], %s3700_s12, %s3700_s12, %s3701_s29  }
  0x6e   :  { %s3702_s6 = smov [#allocation11]   ;;  %s3703_s27 = smov [#allocation14]  }
  0x6f   :  { %s70_s9 = sshll.u32 %s3702_s6, 4  ;;  %s89_s25 = sshll.u32 %s3703_s27, 4  ;;  %s71_s9 = int_to_ptr.vmem [resolvable:$true] %s70_s9  ;;  %s90_s25 = int_to_ptr.vmem [resolvable:$true] %s89_s25 }
  0x70   :  { %s4528_s23 = sld [smem:[#allocation37_spill]] }
  0x76   :  { %s3549_s2 = scalar_lea.hbm %s4528_s23, 16 }
  0x77   :  { %p3550_p12 = scmp.ne.s32.totalorder %s4528_s23, %s3549_s2  ;;  %p3553_p13 = scmp.lt.u32.totalorder %s3549_s2, %s4528_s23 }
  0x79   :  { %p3555_p0 = pnand %p3553_p13, %p3550_p12 }
  0x7b   :  { %3558 = shalt.err (!%p3555_p0)
}
  0x7c   :  { %s3559_s7 = scalar_lea.vmem %s71_s9, 16  ;;  %s3563_s28 = scalar_lea.vmem %s71_s9, 32 }
  0x7d   :  { %p3560_p1 = scmp.ne.s32.totalorder %s71_s9, %s3559_s7  ;;  %p3564_p2 = scmp.lt.s32.totalorder %s71_s9, %s71_s9 }
  0x7e   :  { %p3565_p3 = scmp.lt.s32.totalorder %s3563_s28, %s3559_s7 }
  0x80   :  { %p3566_p4 = por %p3565_p3, %p3564_p2 }
  0x82   :  { %p3567_p5 = pnand %p3566_p4, %p3560_p1 }
  0x84   :  { %3570 = shalt.err (!%p3567_p5)
}
  0x85   :  { %73 = dma.hbm_to_vmem [thread:$0]  %s4528_s23, 16, %s71_s9, [#allocation10]  }
  0x86   :  { %s3571_s30 = scalar_lea.hbm %s4498_s8, 256 }
  0x87   :  { %p3572_p6 = scmp.ne.s32.totalorder %s4498_s8, %s3571_s30  ;;  %p3575_p7 = scmp.lt.u32.totalorder %s3571_s30, %s4498_s8 }
  0x89   :  { %p3577_p8 = pnand %p3575_p7, %p3572_p6 }
  0x8b   :  { %3580 = shalt.err (!%p3577_p8)
}
  0x8c   :  { %s3581_s0 = scalar_lea.vmem %s90_s25, 256  ;;  %p3586_p10 = scmp.lt.s32.totalorder %s90_s25, %s90_s25 }
  0x8d   :  { %p3582_p9 = scmp.ne.s32.totalorder %s90_s25, %s3581_s0  ;;  %p3587_p11 = scmp.lt.s32.totalorder %s3581_s0, %s3581_s0 }
  0x8f   :  { %p3588_p12 = por %p3587_p11, %p3586_p10 }
  0x91   :  { %p3589_p13 = pnand %p3588_p12, %p3582_p9 }
  0x93   :  { %3592 = shalt.err (!%p3589_p13)
}
  0x94   :  { %95 = dma.hbm_to_vmem [thread:$0]  %s4498_s8, 256, %s90_s25, [#allocation13], %s3700_s12, %s3700_s12, %s3701_s29  }
  0x95   :  { %s3704_s5 = smov [#allocation17]   ;;  %s3705_s28 = smov [#allocation20]  }
  0x96   :  { %s114_s7 = sshll.u32 %s3704_s5, 4  ;;  %s134_s1 = sshll.u32 %s3705_s28, 4  ;;  %s115_s7 = int_to_ptr.vmem [resolvable:$true] %s114_s7  ;;  %s135_s1 = int_to_ptr.vmem [resolvable:$true] %s134_s1 }
  0x97   :  { %s3593_s27 = scalar_lea.hbm %s4501_s11, 16 }
  0x98   :  { %p3594_p0 = scmp.ne.s32.totalorder %s4501_s11, %s3593_s27  ;;  %p3597_p1 = scmp.lt.u32.totalorder %s3593_s27, %s4501_s11 }
  0x9a   :  { %p3599_p2 = pnand %p3597_p1, %p3594_p0 }
  0x9c   :  { %3602 = shalt.err (!%p3599_p2)
}
  0x9d   :  { %s3603_s8 = scalar_lea.vmem %s115_s7, 16  ;;  %s3607_s25 = scalar_lea.vmem %s115_s7, 32 }
  0x9e   :  { %p3604_p3 = scmp.ne.s32.totalorder %s115_s7, %s3603_s8  ;;  %p3608_p4 = scmp.lt.s32.totalorder %s115_s7, %s115_s7 }
  0x9f   :  { %p3609_p5 = scmp.lt.s32.totalorder %s3607_s25, %s3603_s8 }
  0xa1   :  { %p3610_p6 = por %p3609_p5, %p3608_p4 }
  0xa3   :  { %p3611_p7 = pnand %p3610_p6, %p3604_p3 }
  0xa5   :  { %3614 = shalt.err (!%p3611_p7)
}
  0xa6   :  { %117 = dma.hbm_to_vmem [thread:$0]  %s4501_s11, 16, %s115_s7, [#allocation16]  }
  0xa7   :  { %s3615_s5 = scalar_lea.hbm %s4503_s13, 16 }
  0xa8   :  { %p3616_p8 = scmp.ne.s32.totalorder %s4503_s13, %s3615_s5  ;;  %p3619_p9 = scmp.lt.u32.totalorder %s3615_s5, %s4503_s13 }
  0xaa   :  { %p3621_p10 = pnand %p3619_p9, %p3616_p8 }
  0xac   :  { %3624 = shalt.err (!%p3621_p10)
}
  0xad   :  { %s3625_s30 = scalar_lea.vmem %s135_s1, 16  ;;  %s3629_s26 = scalar_lea.vmem %s135_s1, 32 }
  0xae   :  { %p3626_p11 = scmp.ne.s32.totalorder %s135_s1, %s3625_s30  ;;  %p3630_p12 = scmp.lt.s32.totalorder %s135_s1, %s135_s1 }
  0xaf   :  { %p3631_p13 = scmp.lt.s32.totalorder %s3629_s26, %s3625_s30 }
  0xb1   :  { %p3632_p0 = por %p3631_p13, %p3630_p12 }
  0xb3   :  { %p3633_p1 = pnand %p3632_p0, %p3626_p11 }
  0xb5   :  { %3636 = shalt.err (!%p3633_p1)
}
  0xb6   :  { %137 = dma.hbm_to_vmem [thread:$0]  %s4503_s13, 16, %s135_s1, [#allocation19]  }
  0xb7   :  { %s3706_s2 = smov [#allocation21]   ;;  %s3637_s4 = scalar_lea.hbm %s4506_s16, 256 }
  0xb8   :  { %s147_s3 = sshll.u32 %s3706_s2, 4  ;;  %p3638_p2 = scmp.ne.s32.totalorder %s4506_s16, %s3637_s4  ;;  %s148_s3 = int_to_ptr.vmem [resolvable:$true] %s147_s3 }
  0xb9   :  { %p3641_p3 = scmp.lt.u32.totalorder %s3637_s4, %s4506_s16 }
  0xbb   :  { %p3643_p4 = pnand %p3641_p3, %p3638_p2 }
  0xbd   :  { %3646 = shalt.err (!%p3643_p4)
}
  0xbe   :  { %s3647_s28 = scalar_lea.vmem %s148_s3, 256  ;;  %p3652_p6 = scmp.lt.s32.totalorder %s148_s3, %s148_s3 }
  0xbf   :  { %p3648_p5 = scmp.ne.s32.totalorder %s148_s3, %s3647_s28  ;;  %p3653_p7 = scmp.lt.s32.totalorder %s3647_s28, %s3647_s28 }
  0xc1   :  { %p3654_p8 = por %p3653_p7, %p3652_p6 }
  0xc3   :  { %p3655_p9 = pnand %p3654_p8, %p3648_p5 }
  0xc5   :  { %3658 = shalt.err (!%p3655_p9)
}
  0xc6   :  { %153 = dma.hbm_to_vmem [thread:$0]  %s4506_s16, 256, %s148_s3, [#allocation22], %s3700_s12, %s3700_s12, %s3701_s29  }
  0xc7   :  { %3681 = dma.done.wait [#allocation7], 256  }
  0xc8   :  { %3682 = vsyncadd [#allocation7], 4294967040 }
  0xc9   :  { %3683 = dma.done.wait [#allocation10], 32  }
  0xca   :  { %3684 = vsyncadd [#allocation10], 4294967264 }
  0xcb   :  { %3685 = dma.done.wait [#allocation13], 272  }
  0xcc   :  { %3686 = vsyncadd [#allocation13], 4294967024 }
  0xcd   :  { %3687 = dma.done.wait [#allocation16], 32  }
  0xce   :  { %3688 = vsyncadd [#allocation16], 4294967264 }
  0xcf   :  { %3689 = dma.done.wait [#allocation19], 32  }
  0xd0   :  { %3690 = vsyncadd [#allocation19], 4294967264 }
  0xd1   :  { %3691 = dma.done.wait [#allocation22], 256  }
  0xd2   :  { %3692 = vsyncadd [#allocation22], 4294967040  ;;  %v3707_v0 = vmov 0.0   ;;  %vm3708_vm0 = vmmov 0   ;;  %v3345_v1 = vld [vmem:[%s4504_s14] sm:$0xff]   ;;  %v3346_v2 = vld [vmem:[%s4504_s14 + $0x8] sm:$0xff]  }
  0xd3   :  { %3063 = vmatprep.subr.bf16.mxu1 %v3707_v0  ;;  %3067 = vmatprep.mubr.msk.bf16.mxu1 %vm3708_vm0, %v3707_v0  ;;  %s4529_s26 = sld [smem:[#allocation32_spill]]  ;;  %vm223_vm1 = vcmask 261120   ;;  %s4530_s14 = sld [smem:[#allocation33_spill]]  ;;  %v2908_v11 = vld [vmem:[%s4505_s15] ss:$0 sm:$0xff]  ;;  %vm336_vm2 = vcmask 64512  }
  0xd4   :  { %3079 = vmatprep.subr.bf16.mxu0 %v3707_v0  ;;  %3081 = vmatprep.mubr.msk.bf16.mxu0 %vm3708_vm0, %v3707_v0  ;;  %s4531_s9 = sld [smem:[#allocation31_spill]]  ;;  %s3709_s1 = smov 120   ;;  %vm953_vm3 = vcmask 1043456   ;;  %vm1340_vm4 = vcmask 130112   ;;  %vm1346_vm5 = vcmask 195712   ;;  %vm1352_vm6 = vcmask 261312  }
  0xd5   :  { %3064 = vmatpush3.bf16.msra.mxu1 %v3345_v1  ;;  %s4532_s29 = sld [smem:[#allocation34_spill]]  ;;  %s3710_s24 = smov 112   ;;  %vm2793_vm7 = vcmask 523264  }
  0xd6   :  { %3065 = vmatprep.subr.bf16.mxu1 %v3707_v0  ;;  %s3711_s6 = smov 104   ;;  %s3712_s27 = smov 96  }
  0xd7   :  { %s3713_s30 = smov 72   ;;  %s3714_s11 = smov 88  }
  0xd8   :  { %s3715_s7 = smov 80   ;;  %s3716_s2 = smov 8  }
  0xd9   :  { %v3984_v3 = vld [vmem:[%s4529_s26] sm:$0xff]  ;;  %v3989_v4 = vld [vmem:[%s4529_s26 + $0x8] sm:$0xff]  ;;  %3066 = vmatpush3.bf16.msra.mxu1 %v3346_v2  ;;  %s3717_s3 = smov 16   ;;  %s3719_s8 = smov 48  }
  0xda   :  { %v199_v5 = vpack.c.bf16 %v3989_v4, %v3984_v3  ;;  %v3347_v6 = vld [vmem:[%s4530_s14] sm:$0xff]   ;;  %3071 = vmatprep.subr.bf16.mxu1 %v3707_v0  ;;  %v3348_v7 = vld [vmem:[%s4530_s14 + $0x8] sm:$0xff]   ;;  %s3718_s14 = smov 24   ;;  %s3720_s25 = smov 56  }
  0xdb   :  { %v195_v8 = vld [vmem:[%s4531_s9] sm:$0xff]  ;;  %v196_v9 = vld [vmem:[%s4531_s9 + $0x8] sm:$0xff]  ;;  %s3721_s4 = smov 40  }
  0xdc   :  { %3068 = vmatmul.mubr.msk.bf16.vlgmr.msra.gmra.mrb[0].mxu1 %vm223_vm1, %v199_v5  ;;  %v268_v10 = vpack.c.bf16 %v196_v9, %v195_v8  ;;  %v2912_v18 = vld [vmem:[%s4532_s29] ss:$0 sm:$0xff] }
  0xdd   :  { %3072 = vmatpush3.bf16.msra.mxu1 %v3347_v6  ;;  %3075 = vmatprep.mubr.msk.bf16.mxu1 %vm3708_vm0, %v3707_v0 }
  0xde   :  { %3073 = vmatprep.subr.bf16.mxu1 %v3707_v0 }
  0xe1   :  { %3074 = vmatpush3.bf16.msra.mxu1 %v3348_v7 }
  0xe2   :  { %3085 = vmatprep.subr.bf16.mxu1 %v3707_v0 }
  0xe4   :  { %3076 = vmatmul.mubr.msk.bf16.vlgmr.msra.gmra.mrb[4].mxu1 %vm223_vm1, %v268_v10 }
  0xe5   :  { %3087 = vmatprep.mubr.msk.bf16.mxu1 %vm3708_vm0, %v3707_v0 }
 0x1af   :  { %v261_v12 = vpop.f32.mrb[0].mxu1 }
 0x1b0   :  { %v4018_v13 = vadd.f32 %v2908_v11, %v261_v12  ;;  %v3069_v14 = vpop.f32.mrb[1].mxu1 }
 0x1b1   :  { %v264_v15 = vpop.f32.mrb[2].mxu1 }
 0x1b2   :  { %v4020_v16 = vadd.f32 %v2908_v11, %v264_v15  ;;  %374 = vrot.lane.b32.xlu0 %v4018_v13, %s3709_s1  ;;  %v3070_v17 = vpop.f32.mrb[3].mxu1  ;;  %372 = vst.msk [vmem:[#allocation3] sm:$0xff] %vm336_vm2, %v4018_v13 }
 0x1b4   :  { %390 = vst.msk [vmem:[#allocation3 + $0x20] sm:$0xff] %vm336_vm2, %v4020_v16 }
 0x1b6   :  { %379 = vrot.lane.b32.xlu0 %v4018_v13, %s3710_s24 }
 0x1b7   :  { %v329_v19 = vpop.f32.mrb[4].mxu1 }
 0x1b8   :  { %v330_v20 = vadd.f32 %v2912_v18, %v329_v19  ;;  %v3077_v21 = vpop.f32.mrb[5].mxu1 }
 0x1b9   :  { %v332_v22 = vpop.f32.mrb[6].mxu1  ;;  %v462_v23 = vld [vmem:[#allocation3] sm:$0xff] }
 0x1ba   :  { %337 = vst.msk [vmem:[#allocation2] sm:$0xff] %vm336_vm2, %v330_v20  ;;  %v333_v24 = vadd.f32 %v2912_v18, %v332_v22  ;;  %344 = vrot.lane.b32.xlu0 %v330_v20, %s3710_s24  ;;  %339 = vrot.lane.b32.xlu1 %v330_v20, %s3709_s1  ;;  %v3078_v25 = vpop.f32.mrb[7].mxu1  ;;  %v470_v26 = vpack.c.bf16 %v462_v23, %v462_v23 }
 0x1bb   :  { %v466_v45 = vld [vmem:[#allocation3 + $0x20] sm:$0xff] }
 0x1bc   :  { %355 = vst.msk [vmem:[#allocation2 + $0x20] sm:$0xff] %vm336_vm2, %v333_v24  ;;  %v498_v27 = vsel %vm336_vm2, %v470_v26, 0  ;;  %v474_v48 = vpack.c.bf16 %v466_v45, %v466_v45 }
 0x1bd   :  { %3080 = vmatpush3.bf16.xpose.msra.mxu0 %v498_v27 }
 0x1be   :  { %392 = vrot.lane.b32.xlu0 %v4020_v16, %s3709_s1  ;;  %384 = vrot.lane.b32.xlu1 %v4018_v13, %s3711_s6  ;;  %v682_v55 = vsel %vm336_vm2, %v474_v48, 0 }
 0x1bf   :  { %3091 = vmatprep.subr.bf16.mxu0 %v3707_v0 }
 0x1c1   :  { %v446_v28 = vld [vmem:[#allocation2] sm:$0xff] }
 0x1c2   :  { %349 = vrot.lane.b32.xlu1 %v330_v20, %s3711_s6  ;;  %357 = vrot.lane.b32.xlu0 %v333_v24, %s3709_s1  ;;  %v454_v29 = vpack.c.bf16 %v446_v28, %v446_v28 }
 0x1c3   :  { %v450_v60 = vld [vmem:[#allocation2 + $0x20] sm:$0xff] }
 0x1c4   :  { %3082 = vmatmul.mubr.msk.bf16.vlgmr.msra.gmra.mrb[0].mxu0 %vm336_vm2, %v454_v29  ;;  %v458_v5 = vpack.c.bf16 %v450_v60, %v450_v60 }
 0x1c5   :  { %3093 = vmatprep.mubr.msk.bf16.mxu0 %vm3708_vm0, %v3707_v0 }
 0x1c6   :  { %397 = vrot.lane.b32.xlu1 %v4020_v16, %s3710_s24  ;;  %362 = vrot.lane.b32.xlu0 %v333_v24, %s3710_s24 }
 0x1ca   :  { %402 = vrot.lane.b32.xlu1 %v4020_v16, %s3711_s6  ;;  %407 = vrot.lane.b32.xlu0 %v4018_v13, %s3712_s27 }
 0x1ce   :  { %367 = vrot.lane.b32.xlu1 %v333_v24, %s3711_s6  ;;  %421 = vrot.lane.b32.xlu0 %v4018_v13, %s3713_s30 }
 0x1d2   :  { %411 = vrot.lane.b32.xlu1 %v4018_v13, %s3714_s11  ;;  %431 = vrot.lane.b32.xlu0 %v4020_v16, %s3714_s11 }
 0x1d6   :  { %416 = vrot.lane.b32.xlu1 %v4018_v13, %s3715_s7 }
 0x1da   :  { %426 = vrot.lane.b32.xlu1 %v4020_v16, %s3712_s27 }
 0x224   :  { %v375_v30 = vpop.permute.xlu0 %374 }
 0x225   :  { %378 = vst.msk [vmem:[#allocation3 + $0x8] sm:$0xff] %vm336_vm2, %v375_v30 }
 0x228   :  { %v380_v31 = vpop.permute.xlu0 %379 }
 0x229   :  { %383 = vst.msk [vmem:[#allocation3 + $0x10] sm:$0xff] %vm336_vm2, %v380_v31 }
 0x22c   :  { %v345_v32 = vpop.permute.xlu0 %344  ;;  %v340_v33 = vpop.permute.xlu1 %339  ;;  %v463_v34 = vld [vmem:[#allocation3 + $0x8] sm:$0xff] }
 0x22d   :  { %348 = vst.msk [vmem:[#allocation2 + $0x10] sm:$0xff] %vm336_vm2, %v345_v32  ;;  %343 = vst.msk [vmem:[#allocation2 + $0x8] sm:$0xff] %vm336_vm2, %v340_v33  ;;  %v471_v35 = vpack.c.bf16 %v463_v34, %v463_v34 }
 0x22f   :  { %v544_v36 = vsel %vm336_vm2, %v471_v35, 0 }
 0x230   :  { %3086 = vmatpush3.bf16.xpose.msra.mxu1 %v544_v36  ;;  %v393_v37 = vpop.permute.xlu0 %392  ;;  %v385_v38 = vpop.permute.xlu1 %384  ;;  %v464_v39 = vld [vmem:[#allocation3 + $0x10] sm:$0xff] }
 0x231   :  { %396 = vst.msk [vmem:[#allocation3 + $0x28] sm:$0xff] %vm336_vm2, %v393_v37  ;;  %388 = vst.msk [vmem:[#allocation3 + $0x18] sm:$0xff] %vm336_vm2, %v385_v38  ;;  %v472_v40 = vpack.c.bf16 %v464_v39, %v464_v39  ;;  %3097 = vmatprep.subr.bf16.mxu1 %v3707_v0 }
 0x233   :  { %v590_v41 = vsel %vm336_vm2, %v472_v40, 0 }
 0x234   :  { %v350_v42 = vpop.permute.xlu1 %349  ;;  %3092 = vmatpush3.bf16.xpose.msra.mxu0 %v590_v41  ;;  %v358_v43 = vpop.permute.xlu0 %357  ;;  %v447_v44 = vld [vmem:[#allocation2 + $0x8] sm:$0xff]  ;;  %v448_v47 = vld [vmem:[#allocation2 + $0x10] sm:$0xff] }
 0x235   :  { %353 = vst.msk [vmem:[#allocation2 + $0x18] sm:$0xff] %vm336_vm2, %v350_v42  ;;  %361 = vst.msk [vmem:[#allocation2 + $0x28] sm:$0xff] %vm336_vm2, %v358_v43  ;;  %v455_v46 = vpack.c.bf16 %v447_v44, %v447_v44  ;;  %3103 = vmatprep.subr.bf16.mxu0 %v3707_v0  ;;  %v456_v52 = vpack.c.bf16 %v448_v47, %v448_v47 }
 0x237   :  { %3088 = vmatmul.mubr.msk.bf16.vlgmr.msra.gmra.mrb[8].mxu1 %vm336_vm2, %v455_v46 }
 0x238   :  { %v398_v49 = vpop.permute.xlu1 %397  ;;  %v363_v50 = vpop.permute.xlu0 %362  ;;  %v465_v51 = vld [vmem:[#allocation3 + $0x18] sm:$0xff]  ;;  %3099 = vmatprep.mubr.msk.bf16.mxu1 %vm3708_vm0, %v3707_v0  ;;  %v467_v58 = vld [vmem:[#allocation3 + $0x28] sm:$0xff] }
 0x239   :  { %401 = vst.msk [vmem:[#allocation3 + $0x30] sm:$0xff] %vm336_vm2, %v398_v49  ;;  %366 = vst.msk [vmem:[#allocation2 + $0x30] sm:$0xff] %vm336_vm2, %v363_v50  ;;  %v473_v53 = vpack.c.bf16 %v465_v51, %v465_v51  ;;  %v475_v61 = vpack.c.bf16 %v467_v58, %v467_v58 }
 0x23b   :  { %3094 = vmatmul.mubr.msk.bf16.vlgmr.msra.gmra.mrb[4].mxu0 %vm336_vm2, %v456_v52  ;;  %v636_v54 = vsel %vm336_vm2, %v473_v53, 0  ;;  %v728_v7 = vsel %vm336_vm2, %v475_v61, 0 }
 0x23c   :  { %3098 = vmatpush3.bf16.xpose.msra.mxu1 %v636_v54  ;;  %v403_v56 = vpop.permute.xlu1 %402  ;;  %3104 = vmatpush3.bf16.xpose.msra.mxu0 %v682_v55  ;;  %v408_v57 = vpop.permute.xlu0 %407  ;;  %v449_v59 = vld [vmem:[#allocation2 + $0x18] sm:$0xff]  ;;  %v451_v14 = vld [vmem:[#allocation2 + $0x28] sm:$0xff] }
 0x23d   :  { %406 = vst.msk [vmem:[#allocation3 + $0x38] sm:$0xff] %vm336_vm2, %v403_v56  ;;  %410 = vst.msk [vmem:[#allocation4] sm:$0xff] %vm336_vm2, %v408_v57  ;;  %3105 = vmatprep.mubr.msk.bf16.mxu0 %vm3708_vm0, %v3707_v0  ;;  %3109 = vmatprep.subr.bf16.mxu1 %v3707_v0  ;;  %v457_v2 = vpack.c.bf16 %v449_v59, %v449_v59  ;;  %v459_v20 = vpack.c.bf16 %v451_v14, %v451_v14 }
 0x23e   :  { %3115 = vmatprep.subr.bf16.mxu0 %v3707_v0 }
 0x240   :  { %v368_v62 = vpop.permute.xlu1 %367  ;;  %v422_v63 = vpop.permute.xlu0 %421  ;;  %v468_v1 = vld [vmem:[#allocation3 + $0x30] sm:$0xff] }
 0x241   :  { %371 = vst.msk [vmem:[#allocation2 + $0x38] sm:$0xff] %vm336_vm2, %v368_v62  ;;  %425 = vst.msk [vmem:[#allocation4 + $0x18] sm:$0xff] %vm336_vm2, %v422_v63  ;;  %v476_v6 = vpack.c.bf16 %v468_v1, %v468_v1  ;;  %v452_v15 = vld [vmem:[#allocation2 + $0x30] sm:$0xff] }
 0x242   :  { %v460_v21 = vpack.c.bf16 %v452_v15, %v452_v15 }
 0x243   :  { %3100 = vmatmul.mubr.msk.bf16.vlgmr.msra.gmra.mrb[12].mxu1 %vm336_vm2, %v457_v2  ;;  %3106 = vmatmul.mubr.msk.bf16.vlgmr.msra.gmra.mrb[8].mxu0 %vm336_vm2, %v458_v5  ;;  %v774_v8 = vsel %vm336_vm2, %v476_v6, 0 }
 0x244   :  { %3110 = vmatpush3.bf16.xpose.msra.mxu1 %v728_v7  ;;  %v412_v9 = vpop.permute.xlu1 %411  ;;  %v432_v10 = vpop.permute.xlu0 %431  ;;  %3116 = vmatpush3.bf16.xpose.msra.mxu0 %v774_v8  ;;  %v469_v11 = vld [vmem:[#allocation3 + $0x38] sm:$0xff]  ;;  %v478_v12 = vld [vmem:[#allocation4] sm:$0xff] }
 0x245   :  { %415 = vst.msk [vmem:[#allocation4 + $0x8] sm:$0xff] %vm336_vm2, %v412_v9  ;;  %435 = vst.msk [vmem:[#allocation4 + $0x28] sm:$0xff] %vm336_vm2, %v432_v10  ;;  %3111 = vmatprep.mubr.msk.bf16.mxu1 %vm3708_vm0, %v3707_v0  ;;  %3117 = vmatprep.mubr.msk.bf16.mxu0 %vm3708_vm0, %v3707_v0  ;;  %v477_v17 = vpack.c.bf16 %v469_v11, %v469_v11  ;;  %v486_v18 = vpack.c.bf16 %v478_v12, %v478_v12 }
 0x246   :  { %3121 = vmatprep.subr.bf16.mxu1 %v3707_v0  ;;  %3127 = vmatprep.subr.bf16.mxu0 %v3707_v0 }
 0x247   :  { %v820_v22 = vsel %vm336_vm2, %v477_v17, 0  ;;  %v955_v23 = vsel %vm953_vm3, %v486_v18, 0 }
 0x248   :  { %v417_v19 = vpop.permute.xlu1 %416  ;;  %v453_v26 = vld [vmem:[#allocation2 + $0x38] sm:$0xff] }
 0x249   :  { %420 = vst.msk [vmem:[#allocation4 + $0x10] sm:$0xff] %vm336_vm2, %v417_v19  ;;  %v461_v28 = vpack.c.bf16 %v453_v26, %v453_v26 }
 0x24b   :  { %3112 = vmatmul.mubr.msk.bf16.vlgmr.msra.gmra.mrb[16].mxu1 %vm336_vm2, %v459_v20  ;;  %3118 = vmatmul.mubr.msk.bf16.vlgmr.msra.gmra.mrb[12].mxu0 %vm336_vm2, %v460_v21 }
 0x24c   :  { %v427_v24 = vpop.permute.xlu1 %426  ;;  %3122 = vmatpush3.bf16.xpose.msra.mxu1 %v820_v22  ;;  %3128 = vmatpush3.bf16.msra.mxu0 %v955_v23  ;;  %v479_v25 = vld [vmem:[#allocation4 + $0x8] sm:$0xff] }
 0x24d   :  { %430 = vst.msk [vmem:[#allocation4 + $0x20] sm:$0xff] %vm336_vm2, %v427_v24  ;;  %3123 = vmatprep.mubr.msk.bf16.mxu1 %vm3708_vm0, %v3707_v0  ;;  %3133 = vmatprep.subr.bf16.mxu1 %v3707_v0  ;;  %v487_v27 = vpack.c.bf16 %v479_v25, %v479_v25 }
 0x24e   :  { %3129 = vmatprep.mubr.msk.bf16.mxu0 %vm3708_vm0, %v3707_v0  ;;  %3139 = vmatprep.subr.bf16.mxu0 %v3707_v0 }
 0x24f   :  { %v1001_v29 = vsel %vm953_vm3, %v487_v27, 0 }
 0x250   :  { %v480_v22 = vld [vmem:[#allocation4 + $0x10] sm:$0xff] }
 0x251   :  { %v488_v23 = vpack.c.bf16 %v480_v22, %v480_v22 }
 0x253   :  { %3124 = vmatmul.mubr.msk.bf16.vlgmr.msra.gmra.mrb[20].mxu1 %vm336_vm2, %v461_v28  ;;  %v1047_v26 = vsel %vm953_vm3, %v488_v23, 0 }
 0x254   :  { %3134 = vmatpush3.bf16.msra.mxu1 %v1001_v29  ;;  %3135 = vmatprep.mubr.msk.bf16.mxu1 %vm3708_vm0, %v3707_v0 }
 0x255   :  { %3145 = vmatprep.subr.bf16.mxu1 %v3707_v0 }
 0x297   :  { %v534_v30 = vpop.f32.mrb[0].mxu0 }
 0x298   :  { %v862_v31 = vmul.f32 0.35355338, %v534_v30  ;;  %v3083_v32 = vpop.f32.mrb[1].mxu0 }
 0x299   :  { %v537_v33 = vpop.f32.mrb[2].mxu0 }
 0x29a   :  { %v3084_v34 = vpop.f32.mrb[3].mxu0  ;;  %v870_v35 = vsel %vm336_vm2, %v862_v31, -inf  ;;  %v481_v33 = vld [vmem:[#allocation4 + $0x18] sm:$0xff] }
 0x29b   :  { %871 = vmax.xlane.f32.xlu0 %v870_v35 }
 0x30a   :  { %v580_v36 = vpop.f32.mrb[8].mxu1 }
 0x30b   :  { %v4120_v37 = vmul.f32 0.35355338, %v580_v36  ;;  %v3089_v38 = vpop.f32.mrb[9].mxu1 }
 0x30c   :  { %v583_v39 = vpop.f32.mrb[10].mxu1 }
 0x30d   :  { %v3090_v40 = vpop.f32.mrb[11].mxu1  ;;  %v873_v41 = vsel %vm336_vm2, %v4120_v37, -inf  ;;  %v489_v39 = vpack.c.bf16 %v481_v33, %v481_v33 }
 0x30e   :  { %v626_v42 = vpop.f32.mrb[4].mxu0  ;;  %874 = vmax.xlane.f32.xlu1 %v873_v41 }
 0x30f   :  { %v864_v43 = vmul.f32 0.35355338, %v626_v42  ;;  %v3095_v44 = vpop.f32.mrb[5].mxu0 }
 0x310   :  { %v629_v45 = vpop.f32.mrb[6].mxu0  ;;  %v482_v44 = vld [vmem:[#allocation4 + $0x20] sm:$0xff] }
 0x311   :  { %v3096_v46 = vpop.f32.mrb[7].mxu0  ;;  %v876_v47 = vsel %vm336_vm2, %v864_v43, -inf }
 0x312   :  { %877 = vmax.xlane.f32.xlu0 %v876_v47  ;;  %v490_v46 = vpack.c.bf16 %v482_v44, %v482_v44 }
 0x316   :  { %v672_v48 = vpop.f32.mrb[12].mxu1  ;;  %v718_v49 = vpop.f32.mrb[8].mxu0 }
 0x317   :  { %v4125_v50 = vmul.f32 0.35355338, %v672_v48  ;;  %v866_v51 = vmul.f32 0.35355338, %v718_v49  ;;  %v3101_v52 = vpop.f32.mrb[13].mxu1  ;;  %v3107_v53 = vpop.f32.mrb[9].mxu0 }
 0x318   :  { %v675_v54 = vpop.f32.mrb[14].mxu1  ;;  %v721_v55 = vpop.f32.mrb[10].mxu0 }
 0x319   :  { %v3102_v56 = vpop.f32.mrb[15].mxu1  ;;  %v3108_v57 = vpop.f32.mrb[11].mxu0  ;;  %v882_v58 = vsel %vm336_vm2, %v866_v51, -inf  ;;  %v879_v59 = vsel %vm336_vm2, %v4125_v50, -inf  ;;  %v1139_v54 = vsel %vm953_vm3, %v490_v46, 0 }
 0x31a   :  { %883 = vmax.xlane.f32.xlu1 %v882_v58  ;;  %880 = vmax.xlane.f32.xlu0 %v879_v59  ;;  %v483_v58 = vld [vmem:[#allocation4 + $0x28] sm:$0xff] }
 0x31e   :  { %v764_v60 = vpop.f32.mrb[16].mxu1  ;;  %v810_v61 = vpop.f32.mrb[12].mxu0 }
 0x31f   :  { %v4130_v62 = vmul.f32 0.35355338, %v764_v60  ;;  %v4132_v63 = vmul.f32 0.35355338, %v810_v61  ;;  %v3113_v1 = vpop.f32.mrb[17].mxu1  ;;  %v3119_v2 = vpop.f32.mrb[13].mxu0  ;;  %v491_v60 = vpack.c.bf16 %v483_v58, %v483_v58 }
 0x320   :  { %v767_v5 = vpop.f32.mrb[18].mxu1  ;;  %v813_v6 = vpop.f32.mrb[14].mxu0 }
 0x321   :  { %v3114_v7 = vpop.f32.mrb[19].mxu1  ;;  %v3120_v8 = vpop.f32.mrb[15].mxu0  ;;  %v888_v9 = vsel %vm336_vm2, %v4132_v63, -inf  ;;  %v885_v10 = vsel %vm336_vm2, %v4130_v62, -inf  ;;  %v1185_v6 = vsel %vm953_vm3, %v491_v60, 0 }
 0x322   :  { %889 = vmax.xlane.f32.xlu0 %v888_v9  ;;  %886 = vmax.xlane.f32.xlu1 %v885_v10 }
 0x326   :  { %v856_v11 = vpop.f32.mrb[20].mxu1 }
 0x327   :  { %v4138_v12 = vmul.f32 0.35355338, %v856_v11  ;;  %v3125_v14 = vpop.f32.mrb[21].mxu1 }
 0x328   :  { %v872_v15 = vpop.xlane.xlu0 %871  ;;  %v859_v17 = vpop.f32.mrb[22].mxu1 }
 0x329   :  { %v894_v18 = vsub.f32 %v862_v31, %v872_v15  ;;  %v3126_v19 = vpop.f32.mrb[23].mxu1  ;;  %v891_v20 = vsel %vm336_vm2, %v4138_v12, -inf }
 0x32a   :  { %892 = vmax.xlane.f32.xlu1 %v891_v20 }
 0x32b   :  { %v902_v21 = vmul.f32 1.442695, %v894_v18 }
 0x32d   :  { %3361 = vpow2.f32 %v902_v21 }
 0x337   :  { %v4142_v24 = vpop.eup %3361 }
 0x338   :  { %436 = vrot.lane.b32.xlu0 %v4020_v16, %s3715_s7  ;;  %v942_v25 = vpack.c.bf16 %v4142_v24, %v4142_v24 }
 0x33a   :  { %3130 = vmatmul.mubr.msk.bf16.vlgmr.msra.gmra.mrb[16].mxu0 %vm336_vm2, %v942_v25 }
 0x33b   :  { %3140 = vmatpush3.bf16.msra.mxu0 %v1047_v26  ;;  %441 = vrot.lane.b32.xlu1 %v4020_v16, %s3713_s30 }
 0x33c   :  { %3141 = vmatprep.mubr.msk.bf16.mxu0 %vm3708_vm0, %v3707_v0  ;;  %3151 = vmatprep.subr.bf16.mxu0 %v3707_v0 }
 0x39b   :  { %v875_v27 = vpop.xlane.xlu1 %874 }
 0x39c   :  { %v895_v28 = vsub.f32 %v4120_v37, %v875_v27  ;;  %v918_v27 = vsel %vm336_vm2, %v4142_v24, 0.0 }
 0x39e   :  { %v904_v29 = vmul.f32 1.442695, %v895_v28 }
 0x39f   :  { %v878_v30 = vpop.xlane.xlu0 %877 }
 0x3a0   :  { %3363 = vpow2.f32 %v904_v29  ;;  %v896_v31 = vsub.f32 %v864_v43, %v878_v30  ;;  %v1093_v43 = vsel %vm953_vm3, %v489_v39, 0 }
 0x3a2   :  { %v906_v32 = vmul.f32 1.442695, %v896_v31 }
 0x3a4   :  { %3365 = vpow2.f32 %v906_v32 }
 0x3a7   :  { %v884_v34 = vpop.xlane.xlu1 %883  ;;  %v881_v35 = vpop.xlane.xlu0 %880 }
 0x3a8   :  { %v898_v36 = vsub.f32 %v866_v51, %v884_v34  ;;  %v897_v38 = vsub.f32 %v4125_v50, %v881_v35 }
 0x3aa   :  { %v3364_v40 = vpop.eup %3363  ;;  %v910_v41 = vmul.f32 1.442695, %v898_v36  ;;  %v908_v42 = vmul.f32 1.442695, %v897_v38 }
 0x3ab   :  { %v921_v45 = vsel %vm336_vm2, %v3364_v40, 0.0  ;;  %v943_v37 = vpack.c.bf16 %v3364_v40, %v3364_v40 }
 0x3ac   :  { %3367 = vpow2.f32 %v910_v41  ;;  %922 = vadd.xlane.f32.xlu0 %v921_v45 }
 0x3ad   :  { %3369 = vpow2.f32 %v908_v42  ;;  %3136 = vmatmul.mubr.msk.bf16.vlgmr.msra.gmra.mrb[24].mxu1 %vm336_vm2, %v943_v37 }
 0x3ae   :  { %v3366_v47 = vpop.eup %3365  ;;  %3146 = vmatpush3.bf16.msra.mxu1 %v1093_v43  ;;  %3147 = vmatprep.mubr.msk.bf16.mxu1 %vm3708_vm0, %v3707_v0 }
 0x3af   :  { %v890_v48 = vpop.xlane.xlu0 %889  ;;  %v887_v49 = vpop.xlane.xlu1 %886  ;;  %v924_v50 = vsel %vm336_vm2, %v3366_v47, 0.0  ;;  %v944_v51 = vpack.c.bf16 %v3366_v47, %v3366_v47  ;;  %3157 = vmatprep.subr.bf16.mxu1 %v3707_v0 }
 0x3b0   :  { %v900_v52 = vsub.f32 %v4132_v63, %v890_v48  ;;  %v899_v53 = vsub.f32 %v4130_v62, %v887_v49  ;;  %925 = vadd.xlane.f32.xlu0 %v924_v50 }
 0x3b1   :  { %3142 = vmatmul.mubr.msk.bf16.vlgmr.msra.gmra.mrb[20].mxu0 %vm336_vm2, %v944_v51 }
 0x3b2   :  { %v914_v55 = vmul.f32 1.442695, %v900_v52  ;;  %v912_v56 = vmul.f32 1.442695, %v899_v53  ;;  %3152 = vmatpush3.bf16.msra.mxu0 %v1139_v54  ;;  %3153 = vmatprep.mubr.msk.bf16.mxu0 %vm3708_vm0, %v3707_v0 }
 0x3b3   :  { %v437_v57 = vpop.permute.xlu0 %436  ;;  %3163 = vmatprep.subr.bf16.mxu0 %v3707_v0 }
 0x3b4   :  { %3371 = vpow2.f32 %v914_v55  ;;  %440 = vst.msk [vmem:[#allocation4 + $0x30] sm:$0xff] %vm336_vm2, %v437_v57 }
 0x3b5   :  { %3373 = vpow2.f32 %v912_v56 }
 0x3b6   :  { %v3368_v59 = vpop.eup %3367 }
 0x3b7   :  { %v3370_v61 = vpop.eup %3369  ;;  %v893_v62 = vpop.xlane.xlu1 %892  ;;  %v946_v63 = vpack.c.bf16 %v3368_v59, %v3368_v59  ;;  %v930_v28 = vsel %vm336_vm2, %v3368_v59, 0.0 }
 0x3b8   :  { %v901_v1 = vsub.f32 %v4138_v12, %v893_v62  ;;  %v945_v2 = vpack.c.bf16 %v3370_v61, %v3370_v61  ;;  %v927_v20 = vsel %vm336_vm2, %v3370_v61, 0.0 }
 0x3b9   :  { %3154 = vmatmul.mubr.msk.bf16.vlgmr.msra.gmra.mrb[24].mxu0 %vm336_vm2, %v946_v63 }
 0x3ba   :  { %v916_v5 = vmul.f32 1.442695, %v901_v1  ;;  %3148 = vmatmul.mubr.msk.bf16.vlgmr.msra.gmra.mrb[28].mxu1 %vm336_vm2, %v945_v2  ;;  %3165 = vmatprep.mubr.msk.bf16.mxu0 %vm3708_vm0, %v3707_v0  ;;  %v3349_v1 = vld [vmem:[#allocation6] sm:$0xff]  }
 0x3bb   :  { %3158 = vmatpush3.bf16.msra.mxu1 %v1185_v6  ;;  %v442_v7 = vpop.permute.xlu1 %441  ;;  %v484_v8 = vld [vmem:[#allocation4 + $0x30] sm:$0xff]  ;;  %3159 = vmatprep.mubr.msk.bf16.mxu1 %vm3708_vm0, %v3707_v0 }
 0x3bc   :  { %3375 = vpow2.f32 %v916_v5  ;;  %445 = vst.msk [vmem:[#allocation4 + $0x38] sm:$0xff] %vm336_vm2, %v442_v7  ;;  %v492_v9 = vpack.c.bf16 %v484_v8, %v484_v8  ;;  %3169 = vmatprep.subr.bf16.mxu1 %v3707_v0  ;;  %v3350_v8 = vld [vmem:[#allocation6 + $0x8] sm:$0xff]  }
 0x3be   :  { %v3372_v10 = vpop.eup %3371  ;;  %v1231_v11 = vsel %vm953_vm3, %v492_v9, 0 }
 0x3bf   :  { %v3374_v12 = vpop.eup %3373  ;;  %3164 = vmatpush3.bf16.msra.mxu0 %v1231_v11  ;;  %v936_v14 = vsel %vm336_vm2, %v3372_v10, 0.0  ;;  %v948_v15 = vpack.c.bf16 %v3372_v10, %v3372_v10 }
 0x3c0   :  { %937 = vadd.xlane.f32.xlu0 %v936_v14  ;;  %v933_v17 = vsel %vm336_vm2, %v3374_v12, 0.0  ;;  %v947_v18 = vpack.c.bf16 %v3374_v12, %v3374_v12  ;;  %3175 = vmatprep.subr.bf16.mxu0 %v3707_v0 }
 0x3c1   :  { %934 = vadd.xlane.f32.xlu1 %v933_v17 }
 0x3c2   :  { %3160 = vmatmul.mubr.msk.bf16.vlgmr.msra.gmra.mrb[32].mxu1 %vm336_vm2, %v947_v18  ;;  %3166 = vmatmul.mubr.msk.bf16.vlgmr.msra.gmra.mrb[28].mxu0 %vm336_vm2, %v948_v15 }
 0x3c3   :  { %v485_v19 = vld [vmem:[#allocation4 + $0x38] sm:$0xff]  ;;  %3171 = vmatprep.mubr.msk.bf16.mxu1 %vm3708_vm0, %v3707_v0  ;;  %3179 = vmatprep.mubr.msk.bf16.mxu0 %vm3708_vm0, %v3707_v0 }
 0x3c4   :  { %v493_v21 = vpack.c.bf16 %v485_v19, %v485_v19  ;;  %3176 = vmatpush3.bf16.msra.mxu0 %v3349_v1 }
 0x3c5   :  { %928 = vadd.xlane.f32.xlu1 %v927_v20  ;;  %3177 = vmatprep.subr.bf16.mxu0 %v3707_v0 }
 0x3c6   :  { %v3376_v22 = vpop.eup %3375  ;;  %v1277_v23 = vsel %vm953_vm3, %v493_v21, 0 }
 0x3c7   :  { %3170 = vmatpush3.bf16.msra.mxu1 %v1277_v23  ;;  %v939_v25 = vsel %vm336_vm2, %v3376_v22, 0.0  ;;  %v949_v26 = vpack.c.bf16 %v3376_v22, %v3376_v22 }
 0x3c8   :  { %940 = vadd.xlane.f32.xlu0 %v939_v25  ;;  %3183 = vmatprep.subr.bf16.mxu1 %v3707_v0 }
 0x3c9   :  { %919 = vadd.xlane.f32.xlu1 %v918_v27  ;;  %3178 = vmatpush3.bf16.msra.mxu0 %v3350_v8 }
 0x3ca   :  { %3172 = vmatmul.mubr.msk.bf16.vlgmr.msra.gmra.mrb[36].mxu1 %vm336_vm2, %v949_v26  ;;  %3191 = vmatprep.subr.bf16.mxu0 %v3707_v0 }
 0x3cb   :  { %3187 = vmatprep.mubr.msk.bf16.mxu1 %vm3708_vm0, %v3707_v0 }
 0x3cc   :  { %931 = vadd.xlane.f32.xlu0 %v930_v28 }
 0x40d   :  { %v991_v29 = vpop.f32.mrb[16].mxu0 }
 0x40e   :  { %v3131_v30 = vpop.f32.mrb[17].mxu0 }
 0x40f   :  { %v994_v31 = vpop.f32.mrb[18].mxu0 }
 0x410   :  { %v3132_v32 = vpop.f32.mrb[19].mxu0 }
 0x439   :  { %v923_v38 = vpop.xlane.xlu0 %922 }
 0x43d   :  { %v926_v39 = vpop.xlane.xlu0 %925 }
 0x44d   :  { %v938_v40 = vpop.xlane.xlu0 %937 }
 0x44e   :  { %v935_v33 = vpop.xlane.xlu1 %934 }
 0x452   :  { %v929_v34 = vpop.xlane.xlu1 %928 }
 0x455   :  { %v941_v41 = vpop.xlane.xlu0 %940 }
 0x456   :  { %v920_v35 = vpop.xlane.xlu1 %919 }
 0x457   :  { %3377 = vrcp.f32 %v920_v35 }
 0x458   :  { %3379 = vrcp.f32 %v923_v38 }
 0x459   :  { %3381 = vrcp.f32 %v926_v39  ;;  %v932_v42 = vpop.xlane.xlu0 %931 }
 0x45a   :  { %3383 = vrcp.f32 %v932_v42 }
 0x45b   :  { %3385 = vrcp.f32 %v938_v40 }
 0x45c   :  { %3387 = vrcp.f32 %v935_v33 }
 0x45d   :  { %3389 = vrcp.f32 %v929_v34 }
 0x45e   :  { %3391 = vrcp.f32 %v941_v41 }
 0x461   :  { %v3378_v24 = vpop.eup %3377 }
 0x462   :  { %v1320_v36 = vmul.f32 %v3378_v24, %v991_v29  ;;  %v3380_v44 = vpop.eup %3379 }
 0x463   :  { %v3382_v48 = vpop.eup %3381 }
 0x464   :  { %1335 = vst.msk [vmem:[#allocation5] sm:$0xff] %vm336_vm2, %v1320_v36  ;;  %v3384_v54 = vpop.eup %3383  ;;  %v2932_v36 = vld [vmem:[#allocation9] ss:$0 sm:$0xff] }
 0x465   :  { %v3386_v2 = vpop.eup %3385 }
 0x466   :  { %v3388_v5 = vpop.eup %3387 }
 0x467   :  { %v3390_v19 = vpop.eup %3389 }
 0x468   :  { %v3392_v21 = vpop.eup %3391 }
 0x480   :  { %v1037_v45 = vpop.f32.mrb[24].mxu1 }
 0x481   :  { %v1322_v37 = vmul.f32 %v3380_v44, %v1037_v45  ;;  %v3137_v43 = vpop.f32.mrb[25].mxu1 }
 0x482   :  { %v1040_v46 = vpop.f32.mrb[26].mxu1 }
 0x483   :  { %1337 = vrot.lane.b32.xlu1 %v1322_v37, %s3716_s2  ;;  %v3138_v47 = vpop.f32.mrb[27].mxu1 }
 0x484   :  { %v1083_v49 = vpop.f32.mrb[20].mxu0 }
 0x485   :  { %v1324_v50 = vmul.f32 %v3382_v48, %v1083_v49  ;;  %v3143_v51 = vpop.f32.mrb[21].mxu0 }
 0x486   :  { %v1086_v52 = vpop.f32.mrb[22].mxu0 }
 0x487   :  { %v3144_v53 = vpop.f32.mrb[23].mxu0  ;;  %1343 = vrot.lane.b32.xlu1 %v1324_v50, %s3717_s3 }
 0x48c   :  { %v1175_v55 = vpop.f32.mrb[24].mxu0 }
 0x48d   :  { %v1129_v56 = vpop.f32.mrb[28].mxu1  ;;  %v1328_v57 = vmul.f32 %v3384_v54, %v1175_v55  ;;  %v3155_v58 = vpop.f32.mrb[25].mxu0 }
 0x48e   :  { %v3149_v59 = vpop.f32.mrb[29].mxu1  ;;  %v1178_v60 = vpop.f32.mrb[26].mxu0  ;;  %v1326_v20 = vmul.f32 %v3390_v19, %v1129_v56  ;;  %v2937_v19 = vld [vmem:[#allocation12] ss:$0 sm:$0xff] }
 0x48f   :  { %1354 = vst.msk [vmem:[#allocation5 + $0x8] sm:$0xff] %vm336_vm2, %v1328_v57  ;;  %v1132_v61 = vpop.f32.mrb[30].mxu1  ;;  %v3156_v62 = vpop.f32.mrb[27].mxu0  ;;  %v3351_v60 = vld [vmem:[#allocation14] sm:$0xff]  }
 0x490   :  { %v3150_v63 = vpop.f32.mrb[31].mxu1  ;;  %3184 = vmatpush3.bf16.msra.mxu1 %v3351_v60  ;;  %v3352_v61 = vld [vmem:[#allocation14 + $0x8] sm:$0xff]  }
 0x491   :  { %3185 = vmatprep.subr.bf16.mxu1 %v3707_v0 }
 0x494   :  { %3186 = vmatpush3.bf16.msra.mxu1 %v3352_v61 }
 0x495   :  { %v1221_v6 = vpop.f32.mrb[32].mxu1  ;;  %v1267_v7 = vpop.f32.mrb[28].mxu0  ;;  %3197 = vmatprep.subr.bf16.mxu1 %v3707_v0 }
 0x496   :  { %v1330_v9 = vmul.f32 %v3388_v5, %v1221_v6  ;;  %v3161_v10 = vpop.f32.mrb[33].mxu1  ;;  %v1332_v11 = vmul.f32 %v3386_v2, %v1267_v7  ;;  %v3167_v12 = vpop.f32.mrb[29].mxu0 }
 0x497   :  { %v1224_v14 = vpop.f32.mrb[34].mxu1  ;;  %v1270_v15 = vpop.f32.mrb[30].mxu0  ;;  %v2936_v12 = vld [vmem:[#allocation11] ss:$0 sm:$0xff] }
 0x498   :  { %1356 = vrot.lane.b32.xlu0 %v1330_v9, %s3716_s2  ;;  %v3162_v17 = vpop.f32.mrb[35].mxu1  ;;  %v3168_v18 = vpop.f32.mrb[31].mxu0  ;;  %1361 = vrot.lane.b32.xlu1 %v1332_v11, %s3717_s3 }
 0x49c   :  { %1349 = vrot.lane.b32.xlu0 %v1326_v20, %s3718_s14 }
 0x49d   :  { %v1313_v22 = vpop.f32.mrb[36].mxu1 }
 0x49e   :  { %v1334_v23 = vmul.f32 %v3392_v21, %v1313_v22  ;;  %v3173_v25 = vpop.f32.mrb[37].mxu1 }
 0x49f   :  { %v1316_v26 = vpop.f32.mrb[38].mxu1 }
 0x4a0   :  { %1366 = vrot.lane.b32.xlu1 %v1334_v23, %s3718_s14  ;;  %v3174_v27 = vpop.f32.mrb[39].mxu1 }
 0x4f5   :  { %v1338_v28 = vpop.permute.xlu1 %1337 }
 0x4f6   :  { %1341 = vst.msk [vmem:[#allocation5] sm:$0xff] %vm1340_vm4, %v1338_v28  ;;  %v2938_v28 = vld [vmem:[#allocation15] ss:$0 sm:$0xff] }
 0x4f9   :  { %v1344_v29 = vpop.permute.xlu1 %1343 }
 0x4fa   :  { %1347 = vst.msk [vmem:[#allocation5] sm:$0xff] %vm1346_vm5, %v1344_v29 }
 0x50a   :  { %v1357_v30 = vpop.permute.xlu0 %1356  ;;  %v1362_v31 = vpop.permute.xlu1 %1361 }
 0x50b   :  { %1359 = vst.msk [vmem:[#allocation5 + $0x8] sm:$0xff] %vm1340_vm4, %v1357_v30 }
 0x50c   :  { %1364 = vst.msk [vmem:[#allocation5 + $0x8] sm:$0xff] %vm1346_vm5, %v1362_v31 }
 0x50e   :  { %v1350_v32 = vpop.permute.xlu0 %1349 }
 0x50f   :  { %1353 = vst.msk [vmem:[#allocation5] sm:$0xff] %vm1352_vm6, %v1350_v32 }
 0x512   :  { %v1367_v33 = vpop.permute.xlu1 %1366 }
 0x513   :  { %1369 = vst.msk [vmem:[#allocation5 + $0x8] sm:$0xff] %vm1352_vm6, %v1367_v33 }
 0x516   :  { %v1370_v34 = vld [vmem:[#allocation5] sm:$0xff] }
 0x51a   :  { %v1371_v35 = vld [vmem:[#allocation5 + $0x8] sm:$0xff] }
 0x51b   :  { %v1372_v24 = vpack.c.bf16 %v1371_v35, %v1370_v34 }
 0x51d   :  { %3180 = vmatmul.mubr.msk.bf16.vlgmr.msra.gmra.mrb[32].mxu0 %vm223_vm1, %v1372_v24 }
 0x51e   :  { %3193 = vmatprep.mubr.msk.bf16.mxu0 %vm3708_vm0, %v3707_v0 }
 0x5f0   :  { %v1433_v38 = vpop.f32.mrb[32].mxu0 }
 0x5f1   :  { %v1434_v39 = vadd.f32 %v2932_v36, %v1433_v38  ;;  %v3181_v40 = vpop.f32.mrb[33].mxu0 }
 0x5f2   :  { %v1436_v41 = vpop.f32.mrb[34].mxu0 }
 0x5f3   :  { %v1437_v42 = vadd.f32 %v2932_v36, %v1436_v41  ;;  %v3182_v44 = vpop.f32.mrb[35].mxu0  ;;  %v1440_v45 = vadd.f32 %v1434_v39, %v3984_v3 }
 0x5f5   :  { %v1444_v37 = vsel %vm223_vm1, %v1440_v45, 0.0  ;;  %v1441_v43 = vadd.f32 %v1437_v42, %v3989_v4 }
 0x5f6   :  { %1445 = vadd.xlane.f32.xlu0 %v1444_v37 }
 0x5f7   :  { %v1447_v46 = vsel %vm223_vm1, %v1441_v43, 0.0 }
 0x5f8   :  { %1448 = vadd.xlane.f32.xlu1 %v1447_v46 }
 0x609   :  { %1583 = vrot.lane.b32.xlu1 %v4018_v13, %s3700_s12 }
 0x60d   :  { %1591 = vrot.lane.b32.xlu1 %v4018_v13, %s3719_s8 }
 0x683   :  { %v1446_v47 = vpop.xlane.xlu0 %1445 }
 0x684   :  { %v1451_v48 = vmul.f32 0.03125, %v1446_v47 }
 0x685   :  { %v1449_v49 = vpop.xlane.xlu1 %1448 }
 0x686   :  { %v1453_v50 = vsub.f32 %v1440_v45, %v1451_v48  ;;  %v1452_v3 = vmul.f32 0.03125, %v1449_v49 }
 0x688   :  { %v1454_v51 = vsub.f32 %v1441_v43, %v1452_v3  ;;  %v1455_v52 = vmul.f32 %v1453_v50, %v1453_v50 }
 0x689   :  { %v1584_v53 = vpop.permute.xlu1 %1583 }
 0x68a   :  { %1586 = vst.msk [vmem:[#allocation3] sm:$0xff] %vm336_vm2, %v1584_v53  ;;  %v1457_v4 = vsel %vm223_vm1, %v1455_v52, 0.0  ;;  %v1456_v54 = vmul.f32 %v1454_v51, %v1454_v51 }
 0x68b   :  { %1458 = vadd.xlane.f32.xlu0 %v1457_v4 }
 0x68c   :  { %v1460_v56 = vsel %vm223_vm1, %v1456_v54, 0.0 }
 0x68d   :  { %v1592_v55 = vpop.permute.xlu1 %1591 }
 0x68e   :  { %1594 = vst.msk [vmem:[#allocation3 + $0x10] sm:$0xff] %vm336_vm2, %v1592_v55 }
 0x68f   :  { %1461 = vadd.xlane.f32.xlu0 %v1460_v56 }
 0x691   :  { %v1663_v57 = vld [vmem:[#allocation3] sm:$0xff] }
 0x692   :  { %v1671_v58 = vpack.c.bf16 %v1663_v57, %v1663_v57 }
 0x694   :  { %v1699_v59 = vsel %vm336_vm2, %v1671_v58, 0 }
 0x695   :  { %3192 = vmatpush3.bf16.xpose.msra.mxu0 %v1699_v59  ;;  %v1665_v35 = vld [vmem:[#allocation3 + $0x10] sm:$0xff] }
 0x696   :  { %3203 = vmatprep.subr.bf16.mxu0 %v3707_v0  ;;  %v1673_v24 = vpack.c.bf16 %v1665_v35, %v1665_v35 }
 0x698   :  { %v1791_v39 = vsel %vm336_vm2, %v1673_v24, 0 }
 0x6a5   :  { %1587 = vrot.lane.b32.xlu0 %v4018_v13, %s3720_s25 }
 0x6a9   :  { %1595 = vrot.lane.b32.xlu0 %v4018_v13, %s3721_s4 }
 0x6ad   :  { %1599 = vrot.lane.b32.xlu0 %v4020_v16, %s3700_s12  ;;  %s3722_s12 = smov 32  }
 0x6b1   :  { %1603 = vrot.lane.b32.xlu0 %v4020_v16, %s3720_s25  ;;  %s3723_s25 = smov [#allocation23]  }
 0x718   :  { %v1459_v62 = vpop.xlane.xlu0 %1458 }
 0x719   :  { %v1463_v63 = vmul.f32 0.03125, %v1459_v62 }
 0x71b   :  { %v1465_v1 = vadd.f32 1e-05, %v1463_v63 }
 0x71c   :  { %v1462_v2 = vpop.xlane.xlu0 %1461 }
 0x71d   :  { %3393 = vrsqrt.f32 %v1465_v1  ;;  %v1464_v5 = vmul.f32 0.03125, %v1462_v2 }
 0x71f   :  { %v1466_v6 = vadd.f32 1e-05, %v1464_v5 }
 0x720   :  { %v1588_v7 = vpop.permute.xlu0 %1587 }
 0x721   :  { %3395 = vrsqrt.f32 %v1466_v6  ;;  %1590 = vst.msk [vmem:[#allocation3 + $0x8] sm:$0xff] %vm336_vm2, %v1588_v7 }
 0x724   :  { %v1596_v8 = vpop.permute.xlu0 %1595 }
 0x725   :  { %1598 = vst.msk [vmem:[#allocation3 + $0x18] sm:$0xff] %vm336_vm2, %v1596_v8 }
 0x727   :  { %v3394_v9 = vpop.eup %3393 }
 0x728   :  { %v1469_v10 = vmul.f32 %v3394_v9, %v1453_v50  ;;  %v1600_v11 = vpop.permute.xlu0 %1599  ;;  %v1664_v20 = vld [vmem:[#allocation3 + $0x8] sm:$0xff] }
 0x729   :  { %1602 = vst.msk [vmem:[#allocation3 + $0x20] sm:$0xff] %vm336_vm2, %v1600_v11  ;;  %v1672_v25 = vpack.c.bf16 %v1664_v20, %v1664_v20 }
 0x72a   :  { %v1477_v15 = vmul.f32 %v2936_v12, %v1469_v10 }
 0x72b   :  { %v3396_v14 = vpop.eup %3395  ;;  %v1745_v27 = vsel %vm336_vm2, %v1672_v25, 0 }
 0x72c   :  { %v1470_v17 = vmul.f32 %v3396_v14, %v1454_v51  ;;  %v1604_v18 = vpop.permute.xlu0 %1603  ;;  %v1485_v22 = vadd.f32 %v2937_v19, %v1477_v15  ;;  %v1666_v44 = vld [vmem:[#allocation3 + $0x18] sm:$0xff] }
 0x72d   :  { %1606 = vst.msk [vmem:[#allocation3 + $0x28] sm:$0xff] %vm336_vm2, %v1604_v18  ;;  %v1674_v37 = vpack.c.bf16 %v1666_v44, %v1666_v44 }
 0x72e   :  { %v1478_v21 = vmul.f32 %v2936_v12, %v1470_v17 }
 0x72f   :  { %v1837_v49 = vsel %vm336_vm2, %v1674_v37, 0 }
 0x730   :  { %v1486_v23 = vadd.f32 %v2937_v19, %v1478_v21  ;;  %v1667_v47 = vld [vmem:[#allocation3 + $0x20] sm:$0xff] }
 0x731   :  { %v1675_v50 = vpack.c.bf16 %v1667_v47, %v1667_v47 }
 0x732   :  { %v1487_v26 = vpack.c.bf16 %v1486_v23, %v1485_v22 }
 0x733   :  { %v1883_v54 = vsel %vm336_vm2, %v1675_v50, 0 }
 0x734   :  { %3188 = vmatmul.mubr.msk.bf16.vlgmr.msra.gmra.mrb[40].mxu1 %vm223_vm1, %v1487_v26  ;;  %v1668_v52 = vld [vmem:[#allocation3 + $0x28] sm:$0xff] }
 0x735   :  { %3198 = vmatpush3.bf16.xpose.msra.mxu1 %v1745_v27  ;;  %3199 = vmatprep.mubr.msk.bf16.mxu1 %vm3708_vm0, %v3707_v0  ;;  %v1676_v55 = vpack.c.bf16 %v1668_v52, %v1668_v52 }
 0x736   :  { %3209 = vmatprep.subr.bf16.mxu1 %v3707_v0 }
 0x737   :  { %v1929_v61 = vsel %vm336_vm2, %v1676_v55, 0 }
 0x807   :  { %v1548_v29 = vpop.f32.mrb[40].mxu1 }
 0x808   :  { %v1549_v30 = vadd.f32 %v2938_v28, %v1548_v29  ;;  %v3189_v31 = vpop.f32.mrb[41].mxu1 }
 0x809   :  { %v1551_v32 = vpop.f32.mrb[42].mxu1 }
 0x80a   :  { %1555 = vst.msk [vmem:[#allocation2] sm:$0xff] %vm336_vm2, %v1549_v30  ;;  %v1552_v33 = vadd.f32 %v2938_v28, %v1551_v32  ;;  %1557 = vrot.lane.b32.xlu1 %v1549_v30, %s3709_s1  ;;  %v3190_v34 = vpop.f32.mrb[43].mxu1 }
 0x80c   :  { %1569 = vst.msk [vmem:[#allocation2 + $0x20] sm:$0xff] %vm336_vm2, %v1552_v33  ;;  %1571 = vrot.lane.b32.xlu0 %v1552_v33, %s3709_s1 }
 0x80e   :  { %1561 = vrot.lane.b32.xlu1 %v1549_v30, %s3710_s24 }
 0x810   :  { %1575 = vrot.lane.b32.xlu0 %v1552_v33, %s3710_s24 }
 0x811   :  { %v1647_v36 = vld [vmem:[#allocation2] sm:$0xff] }
 0x812   :  { %1565 = vrot.lane.b32.xlu1 %v1549_v30, %s3711_s6  ;;  %v1655_v38 = vpack.c.bf16 %v1647_v36, %v1647_v36 }
 0x813   :  { %v1651_v60 = vld [vmem:[#allocation2 + $0x20] sm:$0xff] }
 0x814   :  { %3194 = vmatmul.mubr.msk.bf16.vlgmr.msra.gmra.mrb[36].mxu0 %vm336_vm2, %v1655_v38  ;;  %1615 = vrot.lane.b32.xlu0 %v4018_v13, %s3722_s12  ;;  %v1659_v1 = vpack.c.bf16 %v1651_v60, %v1651_v60 }
 0x815   :  { %3204 = vmatpush3.bf16.xpose.msra.mxu0 %v1791_v39  ;;  %3205 = vmatprep.mubr.msk.bf16.mxu0 %vm3708_vm0, %v3707_v0 }
 0x816   :  { %1607 = vrot.lane.b32.xlu1 %v4020_v16, %s3719_s8  ;;  %3215 = vmatprep.subr.bf16.mxu0 %v3707_v0 }
 0x818   :  { %1627 = vrot.lane.b32.xlu0 %v4018_v13, %s3716_s2 }
 0x81a   :  { %1611 = vrot.lane.b32.xlu1 %v4020_v16, %s3721_s4  ;;  %s2891_s4 = sshll.u32 %s3723_s25, 4  ;;  %s2892_s4 = int_to_ptr.vmem [resolvable:$true] %s2891_s4 }
 0x81b   :  { %p3664_p11 = scmp.lt.s32.totalorder %s2892_s4, %s2892_s4 }
 0x81c   :  { %1635 = vrot.lane.b32.xlu0 %v4020_v16, %s3718_s14 }
 0x81e   :  { %1579 = vrot.lane.b32.xlu1 %v1552_v33, %s3711_s6 }
 0x822   :  { %1619 = vrot.lane.b32.xlu1 %v4018_v13, %s3718_s14 }
 0x826   :  { %1623 = vrot.lane.b32.xlu1 %v4018_v13, %s3717_s3 }
 0x82a   :  { %1631 = vrot.lane.b32.xlu1 %v4020_v16, %s3722_s12  ;;  %s3659_s12 = scalar_lea.vmem %s2892_s4, 256 }
 0x82b   :  { %p3660_p10 = scmp.ne.s32.totalorder %s2892_s4, %s3659_s12  ;;  %p3665_p12 = scmp.lt.s32.totalorder %s3659_s12, %s3659_s12 }
 0x82d   :  { %p3666_p13 = por %p3665_p12, %p3664_p11 }
 0x82f   :  { %p3667_p0 = pnand %p3666_p13, %p3660_p10 }
 0x87c   :  { %v1558_v40 = vpop.permute.xlu1 %1557 }
 0x87d   :  { %1560 = vst.msk [vmem:[#allocation2 + $0x8] sm:$0xff] %vm336_vm2, %v1558_v40 }
 0x87e   :  { %v1572_v41 = vpop.permute.xlu0 %1571 }
 0x87f   :  { %1574 = vst.msk [vmem:[#allocation2 + $0x28] sm:$0xff] %vm336_vm2, %v1572_v41 }
 0x880   :  { %v1562_v42 = vpop.permute.xlu1 %1561 }
 0x881   :  { %1564 = vst.msk [vmem:[#allocation2 + $0x10] sm:$0xff] %vm336_vm2, %v1562_v42 }
 0x882   :  { %v1576_v45 = vpop.permute.xlu0 %1575 }
 0x883   :  { %1578 = vst.msk [vmem:[#allocation2 + $0x30] sm:$0xff] %vm336_vm2, %v1576_v45 }
 0x884   :  { %v1566_v43 = vpop.permute.xlu1 %1565  ;;  %v1648_v46 = vld [vmem:[#allocation2 + $0x8] sm:$0xff] }
 0x885   :  { %1568 = vst.msk [vmem:[#allocation2 + $0x18] sm:$0xff] %vm336_vm2, %v1566_v43  ;;  %v1656_v13 = vpack.c.bf16 %v1648_v46, %v1648_v46 }
 0x886   :  { %v1616_v48 = vpop.permute.xlu0 %1615  ;;  %v1652_v5 = vld [vmem:[#allocation2 + $0x28] sm:$0xff] }
 0x887   :  { %1618 = vst.msk [vmem:[#allocation4] sm:$0xff] %vm336_vm2, %v1616_v48  ;;  %3200 = vmatmul.mubr.msk.bf16.vlgmr.msra.gmra.mrb[44].mxu1 %vm336_vm2, %v1656_v13  ;;  %v1660_v10 = vpack.c.bf16 %v1652_v5, %v1652_v5 }
 0x888   :  { %3210 = vmatpush3.bf16.xpose.msra.mxu1 %v1837_v49  ;;  %v1608_v3 = vpop.permute.xlu1 %1607  ;;  %v1649_v51 = vld [vmem:[#allocation2 + $0x10] sm:$0xff]  ;;  %3211 = vmatprep.mubr.msk.bf16.mxu1 %vm3708_vm0, %v3707_v0 }
 0x889   :  { %1610 = vst.msk [vmem:[#allocation3 + $0x30] sm:$0xff] %vm336_vm2, %v1608_v3  ;;  %v1657_v53 = vpack.c.bf16 %v1649_v51, %v1649_v51  ;;  %3221 = vmatprep.subr.bf16.mxu1 %v3707_v0 }
 0x88a   :  { %v1628_v4 = vpop.permute.xlu0 %1627  ;;  %v1653_v12 = vld [vmem:[#allocation2 + $0x30] sm:$0xff] }
 0x88b   :  { %1630 = vst.msk [vmem:[#allocation4 + $0x18] sm:$0xff] %vm336_vm2, %v1628_v4  ;;  %3206 = vmatmul.mubr.msk.bf16.vlgmr.msra.gmra.mrb[40].mxu0 %vm336_vm2, %v1657_v53  ;;  %v1661_v18 = vpack.c.bf16 %v1653_v12, %v1653_v12 }
 0x88c   :  { %3216 = vmatpush3.bf16.xpose.msra.mxu0 %v1883_v54  ;;  %v1612_v56 = vpop.permute.xlu1 %1611  ;;  %v1650_v57 = vld [vmem:[#allocation2 + $0x18] sm:$0xff]  ;;  %3217 = vmatprep.mubr.msk.bf16.mxu0 %vm3708_vm0, %v3707_v0 }
 0x88d   :  { %1614 = vst.msk [vmem:[#allocation3 + $0x38] sm:$0xff] %vm336_vm2, %v1612_v56  ;;  %v1658_v58 = vpack.c.bf16 %v1650_v57, %v1650_v57  ;;  %3227 = vmatprep.subr.bf16.mxu0 %v3707_v0 }
 0x88e   :  { %v1636_v59 = vpop.permute.xlu0 %1635  ;;  %v1679_v9 = vld [vmem:[#allocation4] sm:$0xff] }
 0x88f   :  { %1638 = vst.msk [vmem:[#allocation4 + $0x28] sm:$0xff] %vm336_vm2, %v1636_v59  ;;  %3212 = vmatmul.mubr.msk.bf16.vlgmr.msra.gmra.mrb[48].mxu1 %vm336_vm2, %v1658_v58  ;;  %v1687_v15 = vpack.c.bf16 %v1679_v9, %v1679_v9 }
 0x890   :  { %3222 = vmatpush3.bf16.xpose.msra.mxu1 %v1929_v61  ;;  %v1580_v62 = vpop.permute.xlu1 %1579  ;;  %v1669_v63 = vld [vmem:[#allocation3 + $0x30] sm:$0xff]  ;;  %3223 = vmatprep.mubr.msk.bf16.mxu1 %vm3708_vm0, %v3707_v0 }
 0x891   :  { %1582 = vst.msk [vmem:[#allocation2 + $0x38] sm:$0xff] %vm336_vm2, %v1580_v62  ;;  %v1677_v2 = vpack.c.bf16 %v1669_v63, %v1669_v63  ;;  %3233 = vmatprep.subr.bf16.mxu1 %v3707_v0  ;;  %v2155_v20 = vsel %vm953_vm3, %v1687_v15, 0 }
 0x893   :  { %3218 = vmatmul.mubr.msk.bf16.vlgmr.msra.gmra.mrb[44].mxu0 %vm336_vm2, %v1659_v1  ;;  %v1975_v6 = vsel %vm336_vm2, %v1677_v2, 0 }
 0x894   :  { %v1620_v7 = vpop.permute.xlu1 %1619  ;;  %3228 = vmatpush3.bf16.xpose.msra.mxu0 %v1975_v6  ;;  %v1670_v8 = vld [vmem:[#allocation3 + $0x38] sm:$0xff]  ;;  %3229 = vmatprep.mubr.msk.bf16.mxu0 %vm3708_vm0, %v3707_v0 }
 0x895   :  { %1622 = vst.msk [vmem:[#allocation4 + $0x8] sm:$0xff] %vm336_vm2, %v1620_v7  ;;  %v1678_v11 = vpack.c.bf16 %v1670_v8, %v1670_v8  ;;  %3239 = vmatprep.subr.bf16.mxu0 %v3707_v0 }
 0x897   :  { %3224 = vmatmul.mubr.msk.bf16.vlgmr.msra.gmra.mrb[52].mxu1 %vm336_vm2, %v1660_v10  ;;  %v2021_v14 = vsel %vm336_vm2, %v1678_v11, 0 }
 0x898   :  { %v1624_v17 = vpop.permute.xlu1 %1623  ;;  %3234 = vmatpush3.bf16.xpose.msra.mxu1 %v2021_v14  ;;  %3235 = vmatprep.mubr.msk.bf16.mxu1 %vm3708_vm0, %v3707_v0  ;;  %v1654_v19 = vld [vmem:[#allocation2 + $0x38] sm:$0xff] }
 0x899   :  { %1626 = vst.msk [vmem:[#allocation4 + $0x10] sm:$0xff] %vm336_vm2, %v1624_v17  ;;  %3245 = vmatprep.subr.bf16.mxu1 %v3707_v0  ;;  %v1662_v23 = vpack.c.bf16 %v1654_v19, %v1654_v19 }
 0x89b   :  { %3230 = vmatmul.mubr.msk.bf16.vlgmr.msra.gmra.mrb[48].mxu0 %vm336_vm2, %v1661_v18 }
 0x89c   :  { %v1632_v21 = vpop.permute.xlu1 %1631  ;;  %3240 = vmatpush3.bf16.msra.mxu0 %v2155_v20  ;;  %v1680_v22 = vld [vmem:[#allocation4 + $0x8] sm:$0xff]  ;;  %3241 = vmatprep.mubr.msk.bf16.mxu0 %vm3708_vm0, %v3707_v0 }
 0x89d   :  { %1634 = vst.msk [vmem:[#allocation4 + $0x20] sm:$0xff] %vm336_vm2, %v1632_v21  ;;  %v1688_v25 = vpack.c.bf16 %v1680_v22, %v1680_v22  ;;  %3251 = vmatprep.subr.bf16.mxu0 %v3707_v0 }
 0x89f   :  { %3236 = vmatmul.mubr.msk.bf16.vlgmr.msra.gmra.mrb[56].mxu1 %vm336_vm2, %v1662_v23  ;;  %v2201_v26 = vsel %vm953_vm3, %v1688_v25, 0 }
 0x8a0   :  { %3246 = vmatpush3.bf16.msra.mxu1 %v2201_v26  ;;  %3247 = vmatprep.mubr.msk.bf16.mxu1 %vm3708_vm0, %v3707_v0  ;;  %v1681_v14 = vld [vmem:[#allocation4 + $0x10] sm:$0xff] }
 0x8a1   :  { %3257 = vmatprep.subr.bf16.mxu1 %v3707_v0  ;;  %v1689_v15 = vpack.c.bf16 %v1681_v14, %v1681_v14 }
 0x8a3   :  { %v2247_v19 = vsel %vm953_vm3, %v1689_v15, 0 }
 0x8e7   :  { %v1735_v27 = vpop.f32.mrb[36].mxu0 }
 0x8e8   :  { %v2063_v28 = vmul.f32 0.35355338, %v1735_v27  ;;  %v3195_v29 = vpop.f32.mrb[37].mxu0 }
 0x8e9   :  { %v1738_v30 = vpop.f32.mrb[38].mxu0  ;;  %v1682_v29 = vld [vmem:[#allocation4 + $0x18] sm:$0xff] }
 0x8ea   :  { %v3196_v31 = vpop.f32.mrb[39].mxu0  ;;  %v2071_v32 = vsel %vm336_vm2, %v2063_v28, -inf }
 0x8eb   :  { %2072 = vmax.xlane.f32.xlu0 %v2071_v32  ;;  %v1690_v32 = vpack.c.bf16 %v1682_v29, %v1682_v29 }
 0x95a   :  { %v1781_v33 = vpop.f32.mrb[44].mxu1 }
 0x95b   :  { %v4329_v34 = vmul.f32 0.35355338, %v1781_v33  ;;  %v3201_v35 = vpop.f32.mrb[45].mxu1 }
 0x95c   :  { %v1784_v24 = vpop.f32.mrb[46].mxu1 }
 0x95d   :  { %v3202_v36 = vpop.f32.mrb[47].mxu1  ;;  %v2074_v38 = vsel %vm336_vm2, %v4329_v34, -inf  ;;  %v1683_v24 = vld [vmem:[#allocation4 + $0x20] sm:$0xff] }
 0x95e   :  { %v1827_v39 = vpop.f32.mrb[40].mxu0  ;;  %2075 = vmax.xlane.f32.xlu1 %v2074_v38 }
 0x95f   :  { %v2065_v40 = vmul.f32 0.35355338, %v1827_v39  ;;  %v3207_v41 = vpop.f32.mrb[41].mxu0 }
 0x960   :  { %v1830_v42 = vpop.f32.mrb[42].mxu0  ;;  %v1691_v41 = vpack.c.bf16 %v1683_v24, %v1683_v24 }
 0x961   :  { %v3208_v44 = vpop.f32.mrb[43].mxu0  ;;  %v2077_v45 = vsel %vm336_vm2, %v2065_v40, -inf }
 0x962   :  { %2078 = vmax.xlane.f32.xlu0 %v2077_v45  ;;  %v1873_v37 = vpop.f32.mrb[48].mxu1  ;;  %v1684_v45 = vld [vmem:[#allocation4 + $0x28] sm:$0xff] }
 0x963   :  { %v2066_v43 = vmul.f32 0.35355338, %v1873_v37  ;;  %v3213_v46 = vpop.f32.mrb[49].mxu1 }
 0x964   :  { %v1876_v47 = vpop.f32.mrb[50].mxu1 }
 0x965   :  { %v3214_v13 = vpop.f32.mrb[51].mxu1  ;;  %v2080_v48 = vsel %vm336_vm2, %v2066_v43, -inf }
 0x966   :  { %v1919_v49 = vpop.f32.mrb[44].mxu0  ;;  %2081 = vmax.xlane.f32.xlu0 %v2080_v48  ;;  %v2339_v13 = vsel %vm953_vm3, %v1691_v41, 0  ;;  %v1692_v48 = vpack.c.bf16 %v1684_v45, %v1684_v45 }
 0x967   :  { %v2067_v50 = vmul.f32 0.35355338, %v1919_v49  ;;  %v3219_v3 = vpop.f32.mrb[45].mxu0 }
 0x968   :  { %v1922_v51 = vpop.f32.mrb[46].mxu0 }
 0x969   :  { %v3220_v52 = vpop.f32.mrb[47].mxu0  ;;  %v2083_v53 = vsel %vm336_vm2, %v2067_v50, -inf }
 0x96a   :  { %2084 = vmax.xlane.f32.xlu1 %v2083_v53  ;;  %v1965_v4 = vpop.f32.mrb[52].mxu1 }
 0x96b   :  { %v4336_v54 = vmul.f32 0.35355338, %v1965_v4  ;;  %v3225_v55 = vpop.f32.mrb[53].mxu1  ;;  %v2385_v4 = vsel %vm953_vm3, %v1692_v48, 0 }
 0x96c   :  { %v1968_v56 = vpop.f32.mrb[54].mxu1 }
 0x96d   :  { %v3226_v57 = vpop.f32.mrb[55].mxu1  ;;  %v2086_v58 = vsel %vm336_vm2, %v4336_v54, -inf }
 0x96e   :  { %v2011_v59 = vpop.f32.mrb[48].mxu0  ;;  %2087 = vmax.xlane.f32.xlu1 %v2086_v58 }
 0x96f   :  { %v4340_v60 = vmul.f32 0.35355338, %v2011_v59  ;;  %v3231_v61 = vpop.f32.mrb[49].mxu0 }
 0x970   :  { %v2014_v62 = vpop.f32.mrb[50].mxu0 }
 0x971   :  { %v3232_v63 = vpop.f32.mrb[51].mxu0  ;;  %v2089_v1 = vsel %vm336_vm2, %v4340_v60, -inf }
 0x972   :  { %2090 = vmax.xlane.f32.xlu0 %v2089_v1  ;;  %v2057_v2 = vpop.f32.mrb[56].mxu1 }
 0x973   :  { %v4344_v5 = vmul.f32 0.35355338, %v2057_v2  ;;  %v3237_v6 = vpop.f32.mrb[57].mxu1 }
 0x974   :  { %v2060_v7 = vpop.f32.mrb[58].mxu1 }
 0x975   :  { %v3238_v8 = vpop.f32.mrb[59].mxu1  ;;  %v2092_v9 = vsel %vm336_vm2, %v4344_v5, -inf }
 0x976   :  { %2093 = vmax.xlane.f32.xlu1 %v2092_v9 }
 0x978   :  { %v2073_v10 = vpop.xlane.xlu0 %2072 }
 0x979   :  { %v2095_v11 = vsub.f32 %v2063_v28, %v2073_v10 }
 0x97b   :  { %v2103_v12 = vmul.f32 1.442695, %v2095_v11 }
 0x97d   :  { %3397 = vpow2.f32 %v2103_v12 }
 0x987   :  { %v4348_v17 = vpop.eup %3397  ;;  %1643 = vrot.lane.b32.xlu1 %v4020_v16, %s3716_s2 }
 0x988   :  { %1639 = vrot.lane.b32.xlu0 %v4020_v16, %s3717_s3  ;;  %v2143_v18 = vpack.c.bf16 %v4348_v17, %v4348_v17  ;;  %v2119_v11 = vsel %vm336_vm2, %v4348_v17, 0.0 }
 0x98a   :  { %3242 = vmatmul.mubr.msk.bf16.vlgmr.msra.gmra.mrb[52].mxu0 %vm336_vm2, %v2143_v18 }
 0x98b   :  { %3252 = vmatpush3.bf16.msra.mxu0 %v2247_v19  ;;  %3253 = vmatprep.mubr.msk.bf16.mxu0 %vm3708_vm0, %v3707_v0 }
 0x98c   :  { %3263 = vmatprep.subr.bf16.mxu0 %v3707_v0 }
 0x9eb   :  { %v2076_v20 = vpop.xlane.xlu1 %2075 }
 0x9ec   :  { %v2096_v21 = vsub.f32 %v4329_v34, %v2076_v20 }
 0x9ee   :  { %v2105_v22 = vmul.f32 1.442695, %v2096_v21 }
 0x9ef   :  { %v2079_v23 = vpop.xlane.xlu0 %2078 }
 0x9f0   :  { %3399 = vpow2.f32 %v2105_v22  ;;  %v2097_v16 = vsub.f32 %v2065_v40, %v2079_v23  ;;  %v2293_v40 = vsel %vm953_vm3, %v1690_v32, 0 }
 0x9f2   :  { %v2107_v25 = vmul.f32 1.442695, %v2097_v16 }
 0x9f3   :  { %v2082_v26 = vpop.xlane.xlu0 %2081 }
 0x9f4   :  { %3401 = vpow2.f32 %v2107_v25  ;;  %v2098_v27 = vsub.f32 %v2066_v43, %v2082_v26 }
 0x9f6   :  { %v2109_v28 = vmul.f32 1.442695, %v2098_v27 }
 0x9f7   :  { %v2085_v30 = vpop.xlane.xlu1 %2084 }
 0x9f8   :  { %3403 = vpow2.f32 %v2109_v28  ;;  %v2099_v31 = vsub.f32 %v2067_v50, %v2085_v30 }
 0x9fa   :  { %v3400_v33 = vpop.eup %3399  ;;  %v2111_v35 = vmul.f32 1.442695, %v2099_v31 }
 0x9fb   :  { %v2088_v36 = vpop.xlane.xlu1 %2087  ;;  %v2122_v34 = vsel %vm336_vm2, %v3400_v33, 0.0  ;;  %v2144_v38 = vpack.c.bf16 %v3400_v33, %v3400_v33 }
 0x9fc   :  { %3405 = vpow2.f32 %v2111_v35  ;;  %v2100_v39 = vsub.f32 %v4336_v54, %v2088_v36  ;;  %2123 = vadd.xlane.f32.xlu0 %v2122_v34 }
 0x9fd   :  { %3248 = vmatmul.mubr.msk.bf16.vlgmr.msra.gmra.mrb[60].mxu1 %vm336_vm2, %v2144_v38 }
 0x9fe   :  { %v3402_v42 = vpop.eup %3401  ;;  %v2113_v44 = vmul.f32 1.442695, %v2100_v39  ;;  %3258 = vmatpush3.bf16.msra.mxu1 %v2293_v40  ;;  %3259 = vmatprep.mubr.msk.bf16.mxu1 %vm3708_vm0, %v3707_v0 }
 0x9ff   :  { %v2091_v37 = vpop.xlane.xlu0 %2090  ;;  %v2125_v43 = vsel %vm336_vm2, %v3402_v42, 0.0  ;;  %v2145_v46 = vpack.c.bf16 %v3402_v42, %v3402_v42  ;;  %3269 = vmatprep.subr.bf16.mxu1 %v3707_v0 }
 0xa00   :  { %3407 = vpow2.f32 %v2113_v44  ;;  %v2101_v47 = vsub.f32 %v4340_v60, %v2091_v37  ;;  %2126 = vadd.xlane.f32.xlu0 %v2125_v43 }
 0xa01   :  { %3254 = vmatmul.mubr.msk.bf16.vlgmr.msra.gmra.mrb[56].mxu0 %vm336_vm2, %v2145_v46 }
 0xa02   :  { %v3404_v49 = vpop.eup %3403  ;;  %v2115_v50 = vmul.f32 1.442695, %v2101_v47  ;;  %3264 = vmatpush3.bf16.msra.mxu0 %v2339_v13  ;;  %3265 = vmatprep.mubr.msk.bf16.mxu0 %vm3708_vm0, %v3707_v0 }
 0xa03   :  { %v1640_v3 = vpop.permute.xlu0 %1639  ;;  %v2094_v51 = vpop.xlane.xlu1 %2093  ;;  %v2146_v52 = vpack.c.bf16 %v3404_v49, %v3404_v49  ;;  %3275 = vmatprep.subr.bf16.mxu0 %v3707_v0 }
 0xa04   :  { %3409 = vpow2.f32 %v2115_v50  ;;  %1642 = vst.msk [vmem:[#allocation4 + $0x30] sm:$0xff] %vm336_vm2, %v1640_v3  ;;  %v2102_v53 = vsub.f32 %v4344_v5, %v2094_v51  ;;  %v2128_v5 = vsel %vm336_vm2, %v3404_v49, 0.0  ;;  %v3353_v3 = vld [vmem:[%s4500_s10] sm:$0xff]  }
 0xa05   :  { %3260 = vmatmul.mubr.msk.bf16.vlgmr.msra.gmra.mrb[64].mxu1 %vm336_vm2, %v2146_v52 }
 0xa06   :  { %v3406_v54 = vpop.eup %3405  ;;  %v2117_v55 = vmul.f32 1.442695, %v2102_v53  ;;  %3270 = vmatpush3.bf16.msra.mxu1 %v2385_v4  ;;  %3271 = vmatprep.mubr.msk.bf16.mxu1 %vm3708_vm0, %v3707_v0 }
 0xa07   :  { %v1644_v56 = vpop.permute.xlu1 %1643  ;;  %v2147_v57 = vpack.c.bf16 %v3406_v54, %v3406_v54  ;;  %3281 = vmatprep.subr.bf16.mxu1 %v3707_v0  ;;  %v2131_v15 = vsel %vm336_vm2, %v3406_v54, 0.0  ;;  %v3354_v54 = vld [vmem:[%s4500_s10 + $0x8] sm:$0xff]  }
 0xa08   :  { %3411 = vpow2.f32 %v2117_v55  ;;  %1646 = vst.msk [vmem:[#allocation4 + $0x38] sm:$0xff] %vm336_vm2, %v1644_v56 }
 0xa09   :  { %3266 = vmatmul.mubr.msk.bf16.vlgmr.msra.gmra.mrb[60].mxu0 %vm336_vm2, %v2147_v57 }
 0xa0a   :  { %v3408_v58 = vpop.eup %3407  ;;  %3277 = vmatprep.mubr.msk.bf16.mxu0 %vm3708_vm0, %v3707_v0 }
 0xa0b   :  { %v2134_v59 = vsel %vm336_vm2, %v3408_v58, 0.0  ;;  %v2148_v60 = vpack.c.bf16 %v3408_v58, %v3408_v58  ;;  %v1685_v61 = vld [vmem:[#allocation4 + $0x30] sm:$0xff] }
 0xa0c   :  { %2135 = vadd.xlane.f32.xlu1 %v2134_v59  ;;  %v1693_v62 = vpack.c.bf16 %v1685_v61, %v1685_v61 }
 0xa0d   :  { %3272 = vmatmul.mubr.msk.bf16.vlgmr.msra.gmra.mrb[68].mxu1 %vm336_vm2, %v2148_v60 }
 0xa0e   :  { %v3410_v63 = vpop.eup %3409  ;;  %v2431_v1 = vsel %vm953_vm3, %v1693_v62, 0  ;;  %3283 = vmatprep.mubr.msk.bf16.mxu1 %vm3708_vm0, %v3707_v0 }
 0xa0f   :  { %3276 = vmatpush3.bf16.msra.mxu0 %v2431_v1  ;;  %v2137_v2 = vsel %vm336_vm2, %v3410_v63, 0.0  ;;  %v2149_v6 = vpack.c.bf16 %v3410_v63, %v3410_v63  ;;  %v1686_v7 = vld [vmem:[#allocation4 + $0x38] sm:$0xff] }
 0xa10   :  { %2138 = vadd.xlane.f32.xlu0 %v2137_v2  ;;  %2129 = vadd.xlane.f32.xlu1 %v2128_v5  ;;  %v1694_v8 = vpack.c.bf16 %v1686_v7, %v1686_v7 }
 0xa11   :  { %3287 = vmatprep.subr.bf16.mxu0 %v3707_v0 }
 0xa12   :  { %v3412_v9 = vpop.eup %3411  ;;  %3278 = vmatmul.mubr.msk.bf16.vlgmr.msra.gmra.mrb[64].mxu0 %vm336_vm2, %v2149_v6  ;;  %v2477_v10 = vsel %vm953_vm3, %v1694_v8, 0 }
 0xa13   :  { %3282 = vmatpush3.bf16.msra.mxu1 %v2477_v10  ;;  %v2140_v12 = vsel %vm336_vm2, %v3412_v9, 0.0  ;;  %v2150_v14 = vpack.c.bf16 %v3412_v9, %v3412_v9  ;;  %3291 = vmatprep.mubr.msk.bf16.mxu0 %vm3708_vm0, %v3707_v0 }
 0xa14   :  { %2120 = vadd.xlane.f32.xlu1 %v2119_v11  ;;  %2141 = vadd.xlane.f32.xlu0 %v2140_v12 }
 0xa15   :  { %3295 = vmatprep.subr.bf16.mxu1 %v3707_v0  ;;  %3288 = vmatpush3.bf16.msra.mxu0 %v3353_v3 }
 0xa16   :  { %3284 = vmatmul.mubr.msk.bf16.vlgmr.msra.gmra.mrb[72].mxu1 %vm336_vm2, %v2150_v14  ;;  %3289 = vmatprep.subr.bf16.mxu0 %v3707_v0 }
 0xa17   :  { %3299 = vmatprep.mubr.msk.bf16.mxu1 %vm3708_vm0, %v3707_v0 }
 0xa18   :  { %2132 = vadd.xlane.f32.xlu0 %v2131_v15 }
 0xa19   :  { %3290 = vmatpush3.bf16.msra.mxu0 %v3354_v54 }
 0xa1a   :  { %3303 = vmatprep.subr.bf16.mxu0 %v3707_v0 }
 0xa5d   :  { %v2191_v18 = vpop.f32.mrb[52].mxu0 }
 0xa5e   :  { %v3243_v17 = vpop.f32.mrb[53].mxu0 }
 0xa5f   :  { %v2194_v19 = vpop.f32.mrb[54].mxu0 }
 0xa60   :  { %v3244_v20 = vpop.f32.mrb[55].mxu0 }
 0xa89   :  { %v2124_v26 = vpop.xlane.xlu0 %2123 }
 0xa8d   :  { %v2127_v27 = vpop.xlane.xlu0 %2126 }
 0xa99   :  { %v2136_v21 = vpop.xlane.xlu1 %2135 }
 0xa9d   :  { %v2130_v22 = vpop.xlane.xlu1 %2129  ;;  %v2139_v28 = vpop.xlane.xlu0 %2138 }
 0xaa1   :  { %v2121_v23 = vpop.xlane.xlu1 %2120  ;;  %v2142_v29 = vpop.xlane.xlu0 %2141 }
 0xaa2   :  { %3413 = vrcp.f32 %v2121_v23 }
 0xaa3   :  { %3415 = vrcp.f32 %v2124_v26 }
 0xaa4   :  { %3417 = vrcp.f32 %v2127_v27 }
 0xaa5   :  { %v2133_v30 = vpop.xlane.xlu0 %2132 }
 0xaa6   :  { %3419 = vrcp.f32 %v2133_v30 }
 0xaa7   :  { %3421 = vrcp.f32 %v2136_v21  ;;  %v2958_v21 = vld [vmem:[#allocation17] ss:$0 sm:$0xff] }
 0xaa8   :  { %3423 = vrcp.f32 %v2130_v22 }
 0xaa9   :  { %3425 = vrcp.f32 %v2139_v28  ;;  %v3437_v28 = vld [vmem:[%s4529_s26] sm:$0xff] }
 0xaaa   :  { %3427 = vrcp.f32 %v2142_v29 }
 0xaac   :  { %v3414_v16 = vpop.eup %3413 }
 0xaad   :  { %v2520_v25 = vmul.f32 %v3414_v16, %v2191_v18  ;;  %v3416_v31 = vpop.eup %3415 }
 0xaae   :  { %v3418_v34 = vpop.eup %3417 }
 0xaaf   :  { %2535 = vst.msk [vmem:[#allocation5] sm:$0xff] %vm336_vm2, %v2520_v25 }
 0xab0   :  { %v3420_v46 = vpop.eup %3419 }
 0xab1   :  { %v3422_v51 = vpop.eup %3421 }
 0xab2   :  { %v3424_v57 = vpop.eup %3423 }
 0xab3   :  { %v3426_v58 = vpop.eup %3425 }
 0xab4   :  { %v3428_v2 = vpop.eup %3427 }
 0xad0   :  { %v2237_v32 = vpop.f32.mrb[60].mxu1 }
 0xad1   :  { %v2522_v33 = vmul.f32 %v3416_v31, %v2237_v32  ;;  %v3249_v35 = vpop.f32.mrb[61].mxu1  ;;  %v3438_v31 = vld [vmem:[%s4529_s26 + $0x8] sm:$0xff] }
 0xad2   :  { %v2240_v24 = vpop.f32.mrb[62].mxu1 }
 0xad3   :  { %2537 = vrot.lane.b32.xlu1 %v2522_v33, %s3716_s2  ;;  %v3250_v36 = vpop.f32.mrb[63].mxu1 }
 0xad4   :  { %v2283_v38 = vpop.f32.mrb[56].mxu0 }
 0xad5   :  { %v2524_v39 = vmul.f32 %v3418_v34, %v2283_v38  ;;  %v3255_v40 = vpop.f32.mrb[57].mxu0 }
 0xad6   :  { %v2286_v41 = vpop.f32.mrb[58].mxu0 }
 0xad7   :  { %v3256_v42 = vpop.f32.mrb[59].mxu0  ;;  %2542 = vrot.lane.b32.xlu1 %v2524_v39, %s3717_s3 }
 0xad8   :  { %v2329_v44 = vpop.f32.mrb[64].mxu1 }
 0xad9   :  { %v3261_v45 = vpop.f32.mrb[65].mxu1  ;;  %v2526_v59 = vmul.f32 %v3424_v57, %v2329_v44 }
 0xada   :  { %v2332_v37 = vpop.f32.mrb[66].mxu1  ;;  %v3355_v45 = vld [vmem:[#allocation21] sm:$0xff]  }
 0xadb   :  { %v3262_v43 = vpop.f32.mrb[67].mxu1  ;;  %3296 = vmatpush3.bf16.msra.mxu1 %v3355_v45  ;;  %v3356_v37 = vld [vmem:[#allocation21 + $0x8] sm:$0xff]   ;;  %v2975_v45 = vld [vmem:[%s4511_s21] ss:$0 sm:$0xff] }
 0xadc   :  { %v2375_v47 = vpop.f32.mrb[60].mxu0  ;;  %3297 = vmatprep.subr.bf16.mxu1 %v3707_v0  ;;  %v3357_v43 = vld [vmem:[%s4508_s18] sm:$0xff]  }
 0xadd   :  { %v2528_v13 = vmul.f32 %v3420_v46, %v2375_v47  ;;  %v3267_v48 = vpop.f32.mrb[61].mxu0  ;;  %v3358_v46 = vld [vmem:[%s4508_s18 + $0x8] sm:$0xff]  }
 0xade   :  { %v2378_v49 = vpop.f32.mrb[62].mxu0 }
 0xadf   :  { %2551 = vst.msk [vmem:[#allocation5 + $0x8] sm:$0xff] %vm336_vm2, %v2528_v13  ;;  %v3268_v50 = vpop.f32.mrb[63].mxu0  ;;  %3298 = vmatpush3.bf16.msra.mxu1 %v3356_v37 }
 0xae0   :  { %v2421_v52 = vpop.f32.mrb[68].mxu1 }
 0xae1   :  { %v2530_v53 = vmul.f32 %v3422_v51, %v2421_v52  ;;  %v3273_v4 = vpop.f32.mrb[69].mxu1 }
 0xae2   :  { %v2424_v55 = vpop.f32.mrb[70].mxu1 }
 0xae3   :  { %2553 = vrot.lane.b32.xlu0 %v2530_v53, %s3716_s2  ;;  %v3274_v56 = vpop.f32.mrb[71].mxu1  ;;  %v2962_v53 = vld [vmem:[#allocation18] ss:$0 sm:$0xff] }
 0xae4   :  { %v2963_v56 = vld [vmem:[#allocation20] ss:$0 sm:$0xff] }
 0xae5   :  { %v2467_v60 = vpop.f32.mrb[64].mxu0 }
 0xae6   :  { %v2532_v61 = vmul.f32 %v3426_v58, %v2467_v60  ;;  %v3279_v62 = vpop.f32.mrb[65].mxu0 }
 0xae7   :  { %v2470_v63 = vpop.f32.mrb[66].mxu0  ;;  %2547 = vrot.lane.b32.xlu0 %v2526_v59, %s3718_s14  ;;  %v3360_v62 = vld [vmem:[%s4508_s18 + $0x18] sm:$0xff]  }
 0xae8   :  { %v3280_v1 = vpop.f32.mrb[67].mxu0  ;;  %2558 = vrot.lane.b32.xlu1 %v2532_v61, %s3717_s3  ;;  %v3359_v61 = vld [vmem:[%s4508_s18 + $0x10] sm:$0xff]   ;;  %v2964_v63 = vld [vmem:[%s4507_s17] ss:$0 sm:$0xff] }
 0xae9   :  { %v2513_v5 = vpop.f32.mrb[72].mxu1 }
 0xaea   :  { %v2534_v6 = vmul.f32 %v3428_v2, %v2513_v5  ;;  %v3285_v7 = vpop.f32.mrb[73].mxu1 }
 0xaeb   :  { %v2516_v8 = vpop.f32.mrb[74].mxu1 }
 0xaec   :  { %2563 = vrot.lane.b32.xlu1 %v2534_v6, %s3718_s14  ;;  %v3286_v9 = vpop.f32.mrb[75].mxu1 }
 0xb45   :  { %v2538_v10 = vpop.permute.xlu1 %2537 }
 0xb46   :  { %2540 = vst.msk [vmem:[#allocation5] sm:$0xff] %vm1340_vm4, %v2538_v10 }
 0xb49   :  { %v2543_v11 = vpop.permute.xlu1 %2542 }
 0xb4a   :  { %2545 = vst.msk [vmem:[#allocation5] sm:$0xff] %vm1346_vm5, %v2543_v11 }
 0xb55   :  { %v2554_v12 = vpop.permute.xlu0 %2553 }
 0xb56   :  { %2556 = vst.msk [vmem:[#allocation5 + $0x8] sm:$0xff] %vm1340_vm4, %v2554_v12 }
 0xb59   :  { %v2548_v14 = vpop.permute.xlu0 %2547 }
 0xb5a   :  { %2550 = vst.msk [vmem:[#allocation5] sm:$0xff] %vm1352_vm6, %v2548_v14  ;;  %v2559_v15 = vpop.permute.xlu1 %2558 }
 0xb5b   :  { %2561 = vst.msk [vmem:[#allocation5 + $0x8] sm:$0xff] %vm1346_vm5, %v2559_v15 }
 0xb5e   :  { %v2564_v18 = vpop.permute.xlu1 %2563 }
 0xb5f   :  { %2566 = vst.msk [vmem:[#allocation5 + $0x8] sm:$0xff] %vm1352_vm6, %v2564_v18 }
 0xb61   :  { %v2567_v17 = vld [vmem:[#allocation5] sm:$0xff] }
 0xb66   :  { %v2568_v19 = vld [vmem:[#allocation5 + $0x8] sm:$0xff] }
 0xb67   :  { %v2569_v20 = vpack.c.bf16 %v2568_v19, %v2567_v17 }
 0xb69   :  { %3292 = vmatmul.mubr.msk.bf16.vlgmr.msra.gmra.mrb[68].mxu0 %vm223_vm1, %v2569_v20 }
 0xb6a   :  { %3311 = vmatprep.mubr.msk.bf16.mxu0 %vm3708_vm0, %v3707_v0  ;;  %3304 = vmatpush3.bf16.msra.mxu0 %v3357_v43 }
 0xb6b   :  { %3305 = vmatprep.subr.bf16.mxu0 %v3707_v0 }
 0xb6e   :  { %3306 = vmatpush3.bf16.msra.mxu0 %v3358_v46 }
 0xb6f   :  { %3307 = vmatprep.subr.bf16.mxu0 %v3707_v0 }
 0xb72   :  { %3308 = vmatpush3.bf16.msra.mxu0 %v3359_v61 }
 0xb73   :  { %3309 = vmatprep.subr.bf16.mxu0 %v3707_v0  ;;  %v2968_v0 = vld [vmem:[%s4509_s19] ss:$0 sm:$0xff] }
 0xb76   :  { %3310 = vmatpush3.bf16.msra.mxu0 %v3360_v62 }
 0xc3c   :  { %v2630_v22 = vpop.f32.mrb[68].mxu0 }
 0xc3d   :  { %v2631_v23 = vadd.f32 %v2958_v21, %v2630_v22  ;;  %v3293_v16 = vpop.f32.mrb[69].mxu0 }
 0xc3e   :  { %v2633_v25 = vpop.f32.mrb[70].mxu0 }
 0xc3f   :  { %v2634_v26 = vadd.f32 %v2958_v21, %v2633_v25  ;;  %v3294_v27 = vpop.f32.mrb[71].mxu0  ;;  %v2637_v29 = vadd.f32 %v3437_v28, %v2631_v23 }
 0xc41   :  { %v2641_v30 = vsel %vm223_vm1, %v2637_v29, 0.0  ;;  %v2638_v32 = vadd.f32 %v3438_v31, %v2634_v26 }
 0xc42   :  { %2642 = vadd.xlane.f32.xlu0 %v2641_v30 }
 0xc43   :  { %v2644_v33 = vsel %vm223_vm1, %v2638_v32, 0.0 }
 0xc44   :  { %2645 = vadd.xlane.f32.xlu1 %v2644_v33 }
 0xccf   :  { %v2643_v35 = vpop.xlane.xlu0 %2642 }
 0xcd0   :  { %v2647_v24 = vmul.f32 0.03125, %v2643_v35 }
 0xcd1   :  { %v2646_v36 = vpop.xlane.xlu1 %2645 }
 0xcd2   :  { %v2649_v34 = vsub.f32 %v2637_v29, %v2647_v24  ;;  %v2648_v38 = vmul.f32 0.03125, %v2646_v36 }
 0xcd4   :  { %v2650_v39 = vsub.f32 %v2638_v32, %v2648_v38  ;;  %v2651_v40 = vmul.f32 %v2649_v34, %v2649_v34 }
 0xcd6   :  { %v2653_v41 = vsel %vm223_vm1, %v2651_v40, 0.0  ;;  %v2652_v42 = vmul.f32 %v2650_v39, %v2650_v39 }
 0xcd7   :  { %2654 = vadd.xlane.f32.xlu0 %v2653_v41  ;;  %v2974_v41 = vld [vmem:[%s4510_s20] ss:$0 sm:$0xff] }
 0xcd8   :  { %v2656_v44 = vsel %vm223_vm1, %v2652_v42, 0.0 }
 0xcdb   :  { %2657 = vadd.xlane.f32.xlu0 %v2656_v44 }
 0xd64   :  { %v2655_v47 = vpop.xlane.xlu0 %2654 }
 0xd65   :  { %v2659_v13 = vmul.f32 0.03125, %v2655_v47 }
 0xd67   :  { %v2661_v48 = vadd.f32 1e-05, %v2659_v13 }
 0xd68   :  { %v2658_v49 = vpop.xlane.xlu0 %2657 }
 0xd69   :  { %3429 = vrsqrt.f32 %v2661_v48  ;;  %v2660_v50 = vmul.f32 0.03125, %v2658_v49 }
 0xd6b   :  { %v2662_v3 = vadd.f32 1e-05, %v2660_v50 }
 0xd6d   :  { %3431 = vrsqrt.f32 %v2662_v3 }
 0xd73   :  { %v3430_v51 = vpop.eup %3429 }
 0xd74   :  { %v2665_v52 = vmul.f32 %v3430_v51, %v2649_v34 }
 0xd76   :  { %v2673_v54 = vmul.f32 %v2962_v53, %v2665_v52 }
 0xd77   :  { %v3432_v4 = vpop.eup %3431 }
 0xd78   :  { %v2666_v55 = vmul.f32 %v3432_v4, %v2650_v39  ;;  %v2681_v58 = vadd.f32 %v2963_v56, %v2673_v54 }
 0xd7a   :  { %v2674_v57 = vmul.f32 %v2962_v53, %v2666_v55 }
 0xd7c   :  { %v2682_v59 = vadd.f32 %v2963_v56, %v2674_v57 }
 0xd7e   :  { %v2683_v60 = vpack.c.bf16 %v2682_v59, %v2681_v58 }
 0xd80   :  { %3300 = vmatmul.mubr.msk.bf16.vlgmr.msra.gmra.mrb[76].mxu1 %vm223_vm1, %v2683_v60 }
 0xe53   :  { %v2744_v1 = vpop.f32.mrb[76].mxu1 }
 0xe54   :  { %v2745_v2 = vadd.f32 %v2964_v63, %v2744_v1  ;;  %v3301_v5 = vpop.f32.mrb[77].mxu1 }
 0xe55   :  { %v2747_v6 = vpop.f32.mrb[78].mxu1 }
 0xe56   :  { %v2748_v7 = vadd.f32 %v2964_v63, %v2747_v6  ;;  %v3302_v8 = vpop.f32.mrb[79].mxu1  ;;  %v2751_v9 = vmax.f32 %v2745_v2, 0.0 }
 0xe58   :  { %v2752_v10 = vmax.f32 %v2748_v7, 0.0 }
 0xe5a   :  { %v2753_v11 = vpack.c.bf16 %v2752_v10, %v2751_v9 }
 0xe5c   :  { %3312 = vmatmul.mubr.msk.bf16.vlgmr.msra.gmra.mrb[72].mxu0 %vm2793_vm7, %v2753_v11 }
 0xf2f   :  { %v2831_v12 = vpop.f32.mrb[72].mxu0 }
 0xf30   :  { %v2832_v14 = vadd.f32 %v2968_v0, %v2831_v12  ;;  %v3313_v15 = vpop.f32.mrb[73].mxu0 }
 0xf31   :  { %v2834_v18 = vpop.f32.mrb[74].mxu0 }
 0xf32   :  { %v2835_v17 = vadd.f32 %v2968_v0, %v2834_v18  ;;  %v3314_v19 = vpop.f32.mrb[75].mxu0  ;;  %v2838_v20 = vadd.f32 %v2832_v14, %v2681_v58 }
 0xf34   :  { %v2842_v21 = vsel %vm223_vm1, %v2838_v20, 0.0  ;;  %v2839_v22 = vadd.f32 %v2835_v17, %v2682_v59 }
 0xf35   :  { %2843 = vadd.xlane.f32.xlu1 %v2842_v21 }
 0xf36   :  { %v2845_v23 = vsel %vm223_vm1, %v2839_v22, 0.0 }
 0xf37   :  { %2846 = vadd.xlane.f32.xlu0 %v2845_v23 }
 0xfc2   :  { %v2844_v16 = vpop.xlane.xlu1 %2843 }
 0xfc3   :  { %v2848_v25 = vmul.f32 0.03125, %v2844_v16 }
 0xfc4   :  { %v2847_v26 = vpop.xlane.xlu0 %2846 }
 0xfc5   :  { %v2850_v27 = vsub.f32 %v2838_v20, %v2848_v25  ;;  %v2849_v28 = vmul.f32 0.03125, %v2847_v26 }
 0xfc7   :  { %v2851_v29 = vsub.f32 %v2839_v22, %v2849_v28  ;;  %v2852_v30 = vmul.f32 %v2850_v27, %v2850_v27 }
 0xfc9   :  { %v2854_v31 = vsel %vm223_vm1, %v2852_v30, 0.0  ;;  %v2853_v32 = vmul.f32 %v2851_v29, %v2851_v29 }
 0xfca   :  { %2855 = vadd.xlane.f32.xlu1 %v2854_v31 }
 0xfcb   :  { %v2857_v33 = vsel %vm223_vm1, %v2853_v32, 0.0 }
 0xfcc   :  { %2858 = vadd.xlane.f32.xlu0 %v2857_v33 }
0x1057   :  { %v2856_v35 = vpop.xlane.xlu1 %2855 }
0x1058   :  { %v2860_v24 = vmul.f32 0.03125, %v2856_v35 }
0x1059   :  { %v2859_v36 = vpop.xlane.xlu0 %2858 }
0x105a   :  { %v2862_v34 = vadd.f32 1e-05, %v2860_v24  ;;  %v2861_v38 = vmul.f32 0.03125, %v2859_v36 }
0x105c   :  { %3433 = vrsqrt.f32 %v2862_v34  ;;  %v2863_v39 = vadd.f32 1e-05, %v2861_v38 }
0x105e   :  { %3435 = vrsqrt.f32 %v2863_v39 }
0x1066   :  { %v3434_v40 = vpop.eup %3433 }
0x1067   :  { %v2866_v42 = vmul.f32 %v3434_v40, %v2850_v27 }
0x1068   :  { %v3436_v44 = vpop.eup %3435 }
0x1069   :  { %v2874_v37 = vmul.f32 %v2974_v41, %v2866_v42  ;;  %v2867_v43 = vmul.f32 %v3436_v44, %v2851_v29 }
0x106b   :  { %v2875_v46 = vmul.f32 %v2974_v41, %v2867_v43  ;;  %v2882_v47 = vadd.f32 %v2975_v45, %v2874_v37 }
0x106d   :  { %v2883_v13 = vadd.f32 %v2975_v45, %v2875_v46  ;;  %2884 = vst.msk [vmem:[#allocation23] sm:$0xff] %vm223_vm1, %v2882_v47 }
0x106f   :  { %2885 = vst.msk [vmem:[#allocation23 + $0x8] sm:$0xff] %vm223_vm1, %v2883_v13 }
0x1070   :  { %3670 = shalt.err (!%p3667_p0)
}
0x1071   :  { %s3671_s0 = scalar_lea.hbm %s4512_s22, 256 }
0x1072   :  { %p3672_p1 = scmp.ne.s32.totalorder %s4512_s22, %s3671_s0  ;;  %p3675_p2 = scmp.lt.u32.totalorder %s3671_s0, %s4512_s22 }
0x1074   :  { %p3677_p3 = pnand %p3675_p2, %p3672_p1 }
0x1076   :  { %3680 = shalt.err (!%p3677_p3)
}
0x1077   :  { %s3724_s28 = smov 128  }
0x1078   :  { %2897 = dma.vmem_to_hbm [thread:$0]  %s2892_s4, 256, %s4512_s22, [#allocation8], %s3724_s28, %s3724_s28, %s3716_s2  }
0x1079   :  { %3693 = dma.done.wait [#allocation8], 256  }
0x107a   :  { %3694 = vsyncadd [#allocation8], 4294967040 }
0x107b   :  { %2901 = vsyncpa [#allocation7], 1 }
0x107c   :  { %2902 = vsyncpa [#allocation10], 1 }
0x107d   :  { %2903 = vsyncpa [#allocation13], 1 }
0x107e   :  { %2904 = vsyncpa [#allocation16], 1 }
0x107f   :  { %2905 = vsyncpa [#allocation19], 1 }
0x1080   :  { %2906 = vsyncpa [#allocation22], 1 }
0x1081   :  { %2907 = vsyncpa [#allocation8], 1 }

</bundles_post_ra>
